<compile_context>
chip_gen: v7x
topology: tpu7x:2x2x1
jax: 0.10.0
libtpu: 0.0.40
codegen_flags: <defaults>
</compile_context>

<pallas_src>
import math
import jax
import jax.numpy as jnp
from jax.experimental import pallas as pl
from jax.experimental.pallas import tpu as pltpu

# ----------------------- small, module-consistent config ---------------------
BATCH = 2
IN_CH = 3
IMG = 16           # img_size
P = 4              # patch_size
NP = IMG // P      # patches per side = 4
NPIX = NP * NP     # 16 patches
E = 96             # emb_size (divisible by 3, 6, 12, 24, 48 like 768)
NUM_HEADS = 4
HEAD_DIM = E // NUM_HEADS
MLP = 4 * E
NUM_LAYERS = 12    # forward slices outs[:3],[3:6],[6:9],[9:] -> 12 layers
NUM_CLASSES = 5
SEQ = 1 + NPIX     # cls token + patches
LN_EPS = 1e-12     # HF ViT layer_norm_eps


# --------------------- fused 12-layer encoder (one pallas_call) --------------
def vit_encoder(patches, params, batch):
    """patches: (batch*NPIX, IN_CH*P*P). Returns all layer outputs (12, batch*SEQ, E)."""
    S = SEQ
    BS = batch * S
    scale = 1.0 / math.sqrt(HEAD_DIM)

    def kernel(patches_ref, pw_ref, pb_ref, cls_ref, pos_ref,
               ln1g_ref, ln1b_ref, qkvw_ref, qkvb_ref, projw_ref, projb_ref,
               ln2g_ref, ln2b_ref, m1w_ref, m1b_ref, m2w_ref, m2b_ref,
               out_ref, h_ref, attn_ref):
        layer = pl.program_id(0)

        # --- patch embedding + cls token + position embedding (layer 0 only) ---
        @pl.when(layer == 0)
        def _embed():
            emb = jnp.dot(patches_ref[...], pw_ref[...],
                          preferred_element_type=jnp.float32) + pb_ref[...]
            cls_tok = cls_ref[...] + pos_ref[0:1, :]            # (1, E)
            pos_p = pos_ref[1:, :]                              # (NPIX, E)
            for b in range(batch):
                h_ref[b * S:b * S + 1, :] = cls_tok
                h_ref[b * S + 1:(b + 1) * S, :] = (
                    emb[b * NPIX:(b + 1) * NPIX, :] + pos_p)

        def layer_norm(x, g, beta):
            mu = jnp.mean(x, axis=-1, keepdims=True)
            xc = x - mu
            var = jnp.mean(xc * xc, axis=-1, keepdims=True)
            return xc * jax.lax.rsqrt(var + LN_EPS) * g + beta

        h = h_ref[...]                                          # (BS, E), f32

        # --- attention block ---
        hn = layer_norm(h, ln1g_ref[0], ln1b_ref[0])
        qkv = jnp.dot(hn, qkvw_ref[0],
                      preferred_element_type=jnp.float32) + qkvb_ref[0]  # (BS, 3E)

        for b in range(batch):
            blk = qkv[b * S:(b + 1) * S, :]                     # (S, 3E)
            for hd in range(NUM_HEADS):
                q = blk[:, hd * HEAD_DIM:(hd + 1) * HEAD_DIM]
                k = blk[:, E + hd * HEAD_DIM:E + (hd + 1) * HEAD_DIM]
                v = blk[:, 2 * E + hd * HEAD_DIM:2 * E + (hd + 1) * HEAD_DIM]
                # q @ k^T without materializing a transpose
                s = jax.lax.dot_general(
                    q, k, (((1,), (1,)), ((), ())),
                    preferred_element_type=jnp.float32) * scale
                s = s - jnp.max(s, axis=-1, keepdims=True)
                p = jnp.exp(s)
                p = p / jnp.sum(p, axis=-1, keepdims=True)
                o = jnp.dot(p, v, preferred_element_type=jnp.float32)   # (S, dh)
                attn_ref[b * S:(b + 1) * S,
                         hd * HEAD_DIM:(hd + 1) * HEAD_DIM] = o

        attn = attn_ref[...]                                    # (BS, E)
        h = h + jnp.dot(attn, projw_ref[0],
                        preferred_element_type=jnp.float32) + projb_ref[0]

        # --- MLP block ---
        hn2 = layer_norm(h, ln2g_ref[0], ln2b_ref[0])
        m = jnp.dot(hn2, m1w_ref[0],
                    preferred_element_type=jnp.float32) + m1b_ref[0]
        m = jax.nn.gelu(m, approximate=True)
        h = h + jnp.dot(m, m2w_ref[0],
                        preferred_element_type=jnp.float32) + m2b_ref[0]

        h_ref[...] = h          # activation stays in VMEM for the next layer
        out_ref[0] = h          # this layer's tokens go to HBM (decoder needs them)

    const = lambda l: (0, 0)            # resident inputs (loaded once)
    per_layer2 = lambda l: (l, 0, 0)    # stacked per-layer weights

    return pl.pallas_call(
        kernel,
        out_shape=jax.ShapeDtypeStruct((NUM_LAYERS, BS, E), jnp.float32),
        grid=(NUM_LAYERS,),
        in_specs=[
            pl.BlockSpec((batch * NPIX, IN_CH * P * P), const),      # patches
            pl.BlockSpec((IN_CH * P * P, E), const),                 # patch_w
            pl.BlockSpec((1, E), const),                             # patch_b
            pl.BlockSpec((1, E), const),                             # cls
            pl.BlockSpec((S, E), const),                             # pos
            pl.BlockSpec((1, 1, E), per_layer2),                     # ln1_g
            pl.BlockSpec((1, 1, E), per_layer2),                     # ln1_b
            pl.BlockSpec((1, E, 3 * E), per_layer2),                 # qkv_w
            pl.BlockSpec((1, 1, 3 * E), per_layer2),                 # qkv_b
            pl.BlockSpec((1, E, E), per_layer2),                     # proj_w
            pl.BlockSpec((1, 1, E), per_layer2),                     # proj_b
            pl.BlockSpec((1, 1, E), per_layer2),                     # ln2_g
            pl.BlockSpec((1, 1, E), per_layer2),                     # ln2_b
            pl.BlockSpec((1, E, MLP), per_layer2),                   # mlp1_w
            pl.BlockSpec((1, 1, MLP), per_layer2),                   # mlp1_b
            pl.BlockSpec((1, MLP, E), per_layer2),                   # mlp2_w
            pl.BlockSpec((1, 1, E), per_layer2),                     # mlp2_b
        ],
        out_specs=pl.BlockSpec((1, BS, E), lambda l: (l, 0, 0)),
        scratch_shapes=[pltpu.VMEM((BS, E), jnp.float32),            # resident tokens
                        pltpu.VMEM((BS, E), jnp.float32)],           # attn assembly
        compiler_params=pltpu.CompilerParams(
            dimension_semantics=("arbitrary",)),
    )(patches, params["patch_w"], params["patch_b"], params["cls"], params["pos"],
      params["ln1_g"], params["ln1_b"], params["qkv_w"], params["qkv_b"],
      params["proj_w"], params["proj_b"], params["ln2_g"], params["ln2_b"],
      params["mlp1_w"], params["mlp1_b"], params["mlp2_w"], params["mlp2_b"])


# ---------------- grouped 1x1 conv, channels-first / pixels-on-lanes ---------
def grouped_conv_cf(x, w, b, groups):
    """Batched grouped 1x1 conv with pixels on the lane dim (lane-dense output).

    x: (R, Cin, N)  -- R independent stage instances, N = B*H*W pixels (lanes)
    w: (R, g, Cout/g, Cin/g), b: (R, g, Cout/g, 1)
    Returns (R, Cout, N).
    """
    R, Cin, N = x.shape
    g = groups
    cig = Cin // g
    cog = w.shape[2]
    Cout = g * cog
    bn = N if N <= 2048 else 2048        # pixel-block so v7x's 2 TCs can split work
    assert N % bn == 0

    def kernel(x_ref, w_ref, b_ref, o_ref):
        for gi in range(g):
            xg = x_ref[0, gi * cig:(gi + 1) * cig, :]            # (cig, bn)
            wg = w_ref[0, gi]                                    # (cog, cig)
            yg = jnp.dot(wg, xg,
                         preferred_element_type=jnp.float32) + b_ref[0, gi]
            o_ref[0, gi * cog:(gi + 1) * cog, :] = yg.astype(o_ref.dtype)

    return pl.pallas_call(
        kernel,
        out_shape=jax.ShapeDtypeStruct((R, Cout, N), x.dtype),
        grid=(R, N // bn),
        in_specs=[
            pl.BlockSpec((1, Cin, bn), lambda r, n: (r, 0, n)),
            pl.BlockSpec((1, g, cog, cig), lambda r, n: (r, 0, 0, 0)),
            pl.BlockSpec((1, g, cog, 1), lambda r, n: (r, 0, 0, 0)),
        ],
        out_specs=pl.BlockSpec((1, Cout, bn), lambda r, n: (r, 0, n)),
        compiler_params=pltpu.CompilerParams(
            dimension_semantics=("parallel", "parallel")),
    )(x, w, b)


def pixel_shuffle_cf(x, r=2):
    """PixelShuffle(r) in (R, C*r*r, B, H, W) layout -> (R, C, B, H*r, W*r)."""
    R, crr, Bb, H, W = x.shape
    C = crr // (r * r)
    y = x.reshape(R, C, r, r, Bb, H, W)
    y = y.transpose(0, 1, 4, 5, 2, 6, 3)          # (R, C, B, H, i, W, j)
    return y.reshape(R, C, Bb, H * r, W * r)


# ------------------------------------ forward --------------------------------
def my_vit_forward(x, params):
    B_, C_, H_, W_ = x.shape

    # Patch extraction: (B, C, H, W) -> (B*NP*NP, C*P*P)   (pure layout op)
    patches = (x.reshape(B_, C_, NP, P, NP, P)
                 .transpose(0, 2, 4, 1, 3, 5)
                 .reshape(B_ * NPIX, C_ * P * P))

    enc = vit_encoder(patches, params, B_)                  # (12, B*SEQ, E)

    # Patchify all layers (drop cls) into channels-first, pixels-on-lanes layout.
    x_cf = (enc.reshape(NUM_LAYERS, B_, SEQ, E)[:, :, 1:, :]  # (12, B, 16, E)
              .transpose(0, 3, 1, 2)                           # (12, E, B, 16)
              .reshape(NUM_LAYERS, E, B_ * NPIX))              # (12, E, 32)

    # up1_{1..4}: cat(outs[3g:3g+3], dim=1) is just a reshape in this layout.
    u1_in = x_cf.reshape(4, 3 * E, B_ * NPIX)                  # (4, 288, 32)
    u1 = grouped_conv_cf(u1_in, params["up1_w"], params["up1_b"], groups=3)
    u1 = pixel_shuffle_cf(u1.reshape(4, 2 * E, B_, NP, NP))    # (4, 48, B, 8, 8)

    # up2_{1,2}: cat([up1_1,up1_2]) / cat([up1_3,up1_4]) along channels = reshape.
    u2_in = u1.reshape(2, E, B_ * 64)                          # (2, 96, 128)
    u2 = grouped_conv_cf(u2_in, params["up2_w"], params["up2_b"], groups=2)
    u2 = pixel_shuffle_cf(u2.reshape(2, 2 * E // 3, B_, 8, 8)) # (2, 16, B, 16, 16)

    # up3: cat([out1_2, out3_4]) along channels = reshape.
    u3_in = u2.reshape(1, E // 3, B_ * 256)                    # (1, 32, 512)
    u3 = grouped_conv_cf(u3_in, params["up3_w"], params["up3_b"], groups=1)
    u3 = pixel_shuffle_cf(u3.reshape(1, E // 3, B_, 16, 16))   # (1, 8, B, 32, 32)

    # up4
    u4_in = u3.reshape(1, E // 12, B_ * 1024)                  # (1, 8, 2048)
    u4 = grouped_conv_cf(u4_in, params["up4_w"], params["up4_b"], groups=1)
    u4 = pixel_shuffle_cf(u4.reshape(1, E // 12, B_, 32, 32))  # (1, 2, B, 64, 64)

    # fc: 1x1 conv to num_classes (lane-dense, 8192 pixels on lanes)
    fc_in = u4.reshape(1, E // 48, B_ * 4096)                  # (1, 2, 8192)
    logits = grouped_conv_cf(fc_in, params["fc_w"], params["fc_b"], groups=1)
    out_hw = NP * 16
    logits = logits.reshape(NUM_CLASSES, B_, out_hw, out_hw).transpose(1, 0, 2, 3)
    return logits, None


# ------------------------------ parameter init --------------------------------
def init_params(key):
    keys = jax.random.split(key, 16)

    def nrm(k, shape):
        return jax.random.normal(k, shape, jnp.float32) * 0.02

    params = {
        # embedding
        "patch_w": nrm(keys[0], (IN_CH * P * P, E)),
        "patch_b": jnp.zeros((1, E), jnp.float32),
        "cls": nrm(keys[1], (1, E)),
        "pos": nrm(keys[2], (SEQ, E)),
        # stacked encoder weights (layer axis first)
        "ln1_g": jnp.ones((NUM_LAYERS, 1, E), jnp.float32),
        "ln1_b": jnp.zeros((NUM_LAYERS, 1, E), jnp.float32),
        "qkv_w": nrm(keys[3], (NUM_LAYERS, E, 3 * E)),
        "qkv_b": jnp.zeros((NUM_LAYERS, 1, 3 * E), jnp.float32),
        "proj_w": nrm(keys[4], (NUM_LAYERS, E, E)),
        "proj_b": jnp.zeros((NUM_LAYERS, 1, E), jnp.float32),
        "ln2_g": jnp.ones((NUM_LAYERS, 1, E), jnp.float32),
        "ln2_b": jnp.zeros((NUM_LAYERS, 1, E), jnp.float32),
        "mlp1_w": nrm(keys[5], (NUM_LAYERS, E, MLP)),
        "mlp1_b": jnp.zeros((NUM_LAYERS, 1, MLP), jnp.float32),
        "mlp2_w": nrm(keys[6], (NUM_LAYERS, MLP, E)),
        "mlp2_b": jnp.zeros((NUM_LAYERS, 1, E), jnp.float32),
        # decoder: (instances, groups, Cout/g, Cin/g) — UpSample = grouped 1x1
        # conv to 2*out_ch followed by PixelShuffle(2)
        "up1_w": nrm(keys[7], (4, 3, 2 * E // 3, E)),          # 288 -> 192, g=3
        "up1_b": jnp.zeros((4, 3, 2 * E // 3, 1), jnp.float32),
        "up2_w": nrm(keys[8], (2, 2, E // 3, E // 2)),         # 96 -> 64, g=2
        "up2_b": jnp.zeros((2, 2, E // 3, 1), jnp.float32),
        "up3_w": nrm(keys[9], (1, 1, E // 3, E // 3)),         # 32 -> 32
        "up3_b": jnp.zeros((1, 1, E // 3, 1), jnp.float32),
        "up4_w": nrm(keys[10], (1, 1, E // 12, E // 12)),      # 8 -> 8
        "up4_b": jnp.zeros((1, 1, E // 12, 1), jnp.float32),
        "fc_w": nrm(keys[11], (1, 1, NUM_CLASSES, E // 48)),   # 2 -> 5
        "fc_b": jnp.zeros((1, 1, NUM_CLASSES, 1), jnp.float32),
    }
    return params


# ------------------------------------ main -------------------------------------
if __name__ == "__main__":
    key = jax.random.PRNGKey(0)
    pkey, xkey = jax.random.split(key)
    params = init_params(pkey)
    x = jax.random.normal(xkey, (BATCH, IN_CH, IMG, IMG), jnp.float32)

    fwd = jax.jit(my_vit_forward)
    logits, aux = fwd(x, params)
    logits = jax.block_until_ready(logits)

    expected_hw = NP * 16  # 4 UpSample stages: 4 -> 8 -> 16 -> 32 -> 64
    assert logits.shape == (BATCH, NUM_CLASSES, expected_hw, expected_hw), logits.shape
    assert aux is None
    assert bool(jnp.all(jnp.isfinite(logits)))
    print("KERNEL_OK")
</pallas_src>

<mosaic_0001>
module attributes {stable_mosaic.version = 11 : i64} {
  func.func @kernel(%arg0: i32, %arg1: memref<32x48xf32, #tpu.memory_space<vmem>>, %arg2: memref<48x96xf32, #tpu.memory_space<vmem>>, %arg3: memref<1x96xf32, #tpu.memory_space<vmem>>, %arg4: memref<1x96xf32, #tpu.memory_space<vmem>>, %arg5: memref<17x96xf32, #tpu.memory_space<vmem>>, %arg6: memref<1x1x96xf32, #tpu.memory_space<vmem>>, %arg7: memref<1x1x96xf32, #tpu.memory_space<vmem>>, %arg8: memref<1x96x288xf32, #tpu.memory_space<vmem>>, %arg9: memref<1x1x288xf32, #tpu.memory_space<vmem>>, %arg10: memref<1x96x96xf32, #tpu.memory_space<vmem>>, %arg11: memref<1x1x96xf32, #tpu.memory_space<vmem>>, %arg12: memref<1x1x96xf32, #tpu.memory_space<vmem>>, %arg13: memref<1x1x96xf32, #tpu.memory_space<vmem>>, %arg14: memref<1x96x384xf32, #tpu.memory_space<vmem>>, %arg15: memref<1x1x384xf32, #tpu.memory_space<vmem>>, %arg16: memref<1x384x96xf32, #tpu.memory_space<vmem>>, %arg17: memref<1x1x96xf32, #tpu.memory_space<vmem>>, %arg18: memref<1x34x96xf32, #tpu.memory_space<vmem>>, %arg19: memref<34x96xf32, #tpu.memory_space<vmem>>, %arg20: memref<34x96xf32, #tpu.memory_space<vmem>>) attributes {dimension_semantics = [#tpu.dimension_semantics<arbitrary>], iteration_bounds = array<i64: 12>, scalar_prefetch = 0 : i64, scratch_operands = 2 : i64, tpu.core_type = #tpu.core_type<tc>, window_params = [{pipeline_mode = #tpu.pipeline_mode<synchronous>, transform_indices = @transform_0, window_bounds = array<i64: 32, 48>}, {pipeline_mode = #tpu.pipeline_mode<synchronous>, transform_indices = @transform_1, window_bounds = array<i64: 48, 96>}, {pipeline_mode = #tpu.pipeline_mode<synchronous>, transform_indices = @transform_2, window_bounds = array<i64: 1, 96>}, {pipeline_mode = #tpu.pipeline_mode<synchronous>, transform_indices = @transform_3, window_bounds = array<i64: 1, 96>}, {pipeline_mode = #tpu.pipeline_mode<synchronous>, transform_indices = @transform_4, window_bounds = array<i64: 17, 96>}, {transform_indices = @transform_5, window_bounds = array<i64: 1, 1, 96>}, {transform_indices = @transform_6, window_bounds = array<i64: 1, 1, 96>}, {transform_indices = @transform_7, window_bounds = array<i64: 1, 96, 288>}, {transform_indices = @transform_8, window_bounds = array<i64: 1, 1, 288>}, {transform_indices = @transform_9, window_bounds = array<i64: 1, 96, 96>}, {transform_indices = @transform_10, window_bounds = array<i64: 1, 1, 96>}, {transform_indices = @transform_11, window_bounds = array<i64: 1, 1, 96>}, {transform_indices = @transform_12, window_bounds = array<i64: 1, 1, 96>}, {transform_indices = @transform_13, window_bounds = array<i64: 1, 96, 384>}, {transform_indices = @transform_14, window_bounds = array<i64: 1, 1, 384>}, {transform_indices = @transform_15, window_bounds = array<i64: 1, 384, 96>}, {transform_indices = @transform_16, window_bounds = array<i64: 1, 1, 96>}, {transform_indices = @transform_17, window_bounds = array<i64: 1, 34, 96>}]} {
    %c0_i32 = arith.constant 0 : i32
    %0 = arith.cmpi eq, %arg0, %c0_i32 : i32
    %1 = arith.extui %0 : i1 to i32
    %c0_i32_0 = arith.constant 0 : i32
    %2 = arith.cmpi ne, %1, %c0_i32_0 : i32
    scf.if %2 {
      %c0_114 = arith.constant 0 : index
      %c0_115 = arith.constant 0 : index
      %238 = vector.load %arg1[%c0_114, %c0_115] : memref<32x48xf32, #tpu.memory_space<vmem>>, vector<32x48xf32>
      %c0_116 = arith.constant 0 : index
      %c0_117 = arith.constant 0 : index
      %239 = vector.load %arg2[%c0_116, %c0_117] : memref<48x96xf32, #tpu.memory_space<vmem>>, vector<48x96xf32>
      %cst_118 = arith.constant dense<0.000000e+00> : vector<32x96xf32>
      %240 = tpu.matmul %238, %239, %cst_118 {dimension_numbers = #tpu.dot_dimension_numbers<[1], [0], [0], [1], [0, 0, 1, 1], [], []>} : vector<32x48xf32>, vector<48x96xf32>, vector<32x96xf32> -> vector<32x96xf32>
      %c0_119 = arith.constant 0 : index
      %c0_120 = arith.constant 0 : index
      %241 = vector.load %arg3[%c0_119, %c0_120] : memref<1x96xf32, #tpu.memory_space<vmem>>, vector<1x96xf32>
      %242 = vector.broadcast %241 : vector<1x96xf32> to vector<32x96xf32>
      %243 = arith.addf %240, %242 : vector<32x96xf32>
      %c0_121 = arith.constant 0 : index
      %c0_122 = arith.constant 0 : index
      %244 = vector.load %arg4[%c0_121, %c0_122] : memref<1x96xf32, #tpu.memory_space<vmem>>, vector<1x96xf32>
      %c0_123 = arith.constant 0 : index
      %c0_124 = arith.constant 0 : index
      %245 = vector.load %arg5[%c0_123, %c0_124] : memref<17x96xf32, #tpu.memory_space<vmem>>, vector<1x96xf32>
      %246 = arith.addf %244, %245 : vector<1x96xf32>
      %c1 = arith.constant 1 : index
      %c0_125 = arith.constant 0 : index
      %247 = vector.load %arg5[%c1, %c0_125] : memref<17x96xf32, #tpu.memory_space<vmem>>, vector<16x96xf32>
      %c0_126 = arith.constant 0 : index
      %c0_127 = arith.constant 0 : index
      %248 = vector.load %arg19[%c0_126, %c0_127] : memref<34x96xf32, #tpu.memory_space<vmem>>, vector<1x96xf32>
      tpu.vector_store %arg19[%c0_126, %c0_127], %246 {strides = array<i32>} : memref<34x96xf32, #tpu.memory_space<vmem>>, vector<1x96xf32>,
      %249 = vector.extract_strided_slice %243 {offsets = [0, 0], sizes = [16, 96], strides = [1, 1]} : vector<32x96xf32> to vector<16x96xf32>
      %250 = arith.addf %249, %247 : vector<16x96xf32>
      %c1_128 = arith.constant 1 : index
      %c0_129 = arith.constant 0 : index
      %251 = vector.load %arg19[%c1_128, %c0_129] : memref<34x96xf32, #tpu.memory_space<vmem>>, vector<16x96xf32>
      tpu.vector_store %arg19[%c1_128, %c0_129], %250 {strides = array<i32>} : memref<34x96xf32, #tpu.memory_space<vmem>>, vector<16x96xf32>,
      %c17_130 = arith.constant 17 : index
      %c0_131 = arith.constant 0 : index
      %252 = vector.load %arg19[%c17_130, %c0_131] : memref<34x96xf32, #tpu.memory_space<vmem>>, vector<1x96xf32>
      tpu.vector_store %arg19[%c17_130, %c0_131], %246 {strides = array<i32>} : memref<34x96xf32, #tpu.memory_space<vmem>>, vector<1x96xf32>,
      %253 = vector.extract_strided_slice %243 {offsets = [16, 0], sizes = [16, 96], strides = [1, 1]} : vector<32x96xf32> to vector<16x96xf32>
      %254 = arith.addf %253, %247 : vector<16x96xf32>
      %c18 = arith.constant 18 : index
      %c0_132 = arith.constant 0 : index
      %255 = vector.load %arg19[%c18, %c0_132] : memref<34x96xf32, #tpu.memory_space<vmem>>, vector<16x96xf32>
      tpu.vector_store %arg19[%c18, %c0_132], %254 {strides = array<i32>} : memref<34x96xf32, #tpu.memory_space<vmem>>, vector<16x96xf32>,
    } else {
    }
    %c0 = arith.constant 0 : index
    %c0_1 = arith.constant 0 : index
    %3 = vector.load %arg19[%c0, %c0_1] : memref<34x96xf32, #tpu.memory_space<vmem>>, vector<34x96xf32>
    %c0_2 = arith.constant 0 : index
    %c0_3 = arith.constant 0 : index
    %c0_4 = arith.constant 0 : index
    %4 = vector.load %arg6[%c0_2, %c0_3, %c0_4] : memref<1x1x96xf32, #tpu.memory_space<vmem>>, vector<1x1x96xf32>
    %5 = vector.shape_cast %4 : vector<1x1x96xf32> to vector<1x96xf32>
    %c0_5 = arith.constant 0 : index
    %c0_6 = arith.constant 0 : index
    %c0_7 = arith.constant 0 : index
    %6 = vector.load %arg7[%c0_5, %c0_6, %c0_7] : memref<1x1x96xf32, #tpu.memory_space<vmem>>, vector<1x1x96xf32>
    %7 = vector.shape_cast %6 : vector<1x1x96xf32> to vector<1x96xf32>
    %cst = arith.constant dense<0.000000e+00> : vector<34xf32>
    %8 = vector.multi_reduction <add>, %3, %cst [1] : vector<34x96xf32> to vector<34xf32>
    %9 = vector.shape_cast %8 : vector<34xf32> to vector<34x1xf32>
    %cst_8 = arith.constant 9.600000e+01 : f32
    %10 = vector.broadcast %cst_8 : f32 to vector<34x1xf32>
    %11 = arith.divf %9, %10 : vector<34x1xf32>
    %12 = vector.broadcast %11 : vector<34x1xf32> to vector<34x96xf32>
    %13 = arith.subf %3, %12 : vector<34x96xf32>
    %14 = arith.mulf %13, %13 : vector<34x96xf32>
    %cst_9 = arith.constant dense<0.000000e+00> : vector<34xf32>
    %15 = vector.multi_reduction <add>, %14, %cst_9 [1] : vector<34x96xf32> to vector<34xf32>
    %16 = vector.shape_cast %15 : vector<34xf32> to vector<34x1xf32>
    %cst_10 = arith.constant 9.600000e+01 : f32
    %17 = vector.broadcast %cst_10 : f32 to vector<34x1xf32>
    %18 = arith.divf %16, %17 : vector<34x1xf32>
    %cst_11 = arith.constant 9.99999996E-13 : f32
    %19 = vector.broadcast %cst_11 : f32 to vector<34x1xf32>
    %20 = arith.addf %18, %19 : vector<34x1xf32>
    %21 = math.rsqrt %20 : vector<34x1xf32>
    %22 = vector.broadcast %21 : vector<34x1xf32> to vector<34x96xf32>
    %23 = arith.mulf %13, %22 : vector<34x96xf32>
    %24 = vector.broadcast %5 : vector<1x96xf32> to vector<34x96xf32>
    %25 = arith.mulf %23, %24 : vector<34x96xf32>
    %26 = vector.broadcast %7 : vector<1x96xf32> to vector<34x96xf32>
    %27 = arith.addf %25, %26 : vector<34x96xf32>
    %c0_12 = arith.constant 0 : index
    %c0_13 = arith.constant 0 : index
    %c0_14 = arith.constant 0 : index
    %28 = vector.load %arg8[%c0_12, %c0_13, %c0_14] : memref<1x96x288xf32, #tpu.memory_space<vmem>>, vector<1x96x288xf32>
    %29 = vector.shape_cast %28 : vector<1x96x288xf32> to vector<96x288xf32>
    %cst_15 = arith.constant dense<0.000000e+00> : vector<34x288xf32>
    %30 = tpu.matmul %27, %29, %cst_15 {dimension_numbers = #tpu.dot_dimension_numbers<[1], [0], [0], [1], [0, 0, 1, 1], [], []>} : vector<34x96xf32>, vector<96x288xf32>, vector<34x288xf32> -> vector<34x288xf32>
    %c0_16 = arith.constant 0 : index
    %c0_17 = arith.constant 0 : index
    %c0_18 = arith.constant 0 : index
    %31 = vector.load %arg9[%c0_16, %c0_17, %c0_18] : memref<1x1x288xf32, #tpu.memory_space<vmem>>, vector<1x1x288xf32>
    %32 = vector.shape_cast %31 : vector<1x1x288xf32> to vector<1x288xf32>
    %33 = vector.broadcast %32 : vector<1x288xf32> to vector<34x288xf32>
    %34 = arith.addf %30, %33 : vector<34x288xf32>
    %35 = vector.extract_strided_slice %34 {offsets = [0, 0], sizes = [17, 288], strides = [1, 1]} : vector<34x288xf32> to vector<17x288xf32>
    %36 = vector.extract_strided_slice %35 {offsets = [0, 0], sizes = [17, 24], strides = [1, 1]} : vector<17x288xf32> to vector<17x24xf32>
    %37 = vector.extract_strided_slice %35 {offsets = [0, 96], sizes = [17, 24], strides = [1, 1]} : vector<17x288xf32> to vector<17x24xf32>
    %38 = vector.extract_strided_slice %35 {offsets = [0, 192], sizes = [17, 24], strides = [1, 1]} : vector<17x288xf32> to vector<17x24xf32>
    %cst_19 = arith.constant dense<0.000000e+00> : vector<17x17xf32>
    %39 = tpu.matmul %36, %37, %cst_19 {dimension_numbers = #tpu.dot_dimension_numbers<[1], [1], [0], [0], [0, 0, 1, 0], [], []>} : vector<17x24xf32>, vector<17x24xf32>, vector<17x17xf32> -> vector<17x17xf32>
    %cst_20 = arith.constant 0.204124153 : f32
    %40 = vector.broadcast %cst_20 : f32 to vector<17x17xf32>
    %41 = arith.mulf %39, %40 : vector<17x17xf32>
    %cst_21 = arith.constant dense<0xFF800000> : vector<17xf32>
    %42 = vector.multi_reduction <maximumf>, %41, %cst_21 [1] : vector<17x17xf32> to vector<17xf32>
    %43 = vector.shape_cast %42 : vector<17xf32> to vector<17x1xf32>
    %44 = vector.broadcast %43 : vector<17x1xf32> to vector<17x17xf32>
    %45 = arith.subf %41, %44 : vector<17x17xf32>
    %46 = math.exp %45 : vector<17x17xf32>
    %cst_22 = arith.constant dense<0.000000e+00> : vector<17xf32>
    %47 = vector.multi_reduction <add>, %46, %cst_22 [1] : vector<17x17xf32> to vector<17xf32>
    %48 = vector.shape_cast %47 : vector<17xf32> to vector<17x1xf32>
    %49 = vector.broadcast %48 : vector<17x1xf32> to vector<17x17xf32>
    %50 = arith.divf %46, %49 : vector<17x17xf32>
    %cst_23 = arith.constant dense<0.000000e+00> : vector<17x24xf32>
    %51 = tpu.matmul %50, %38, %cst_23 {dimension_numbers = #tpu.dot_dimension_numbers<[1], [0], [0], [1], [0, 0, 1, 1], [], []>} : vector<17x17xf32>, vector<17x24xf32>, vector<17x24xf32> -> vector<17x24xf32>
    %c0_24 = arith.constant 0 : index
    %c0_25 = arith.constant 0 : index
    %52 = vector.load %arg20[%c0_24, %c0_25] : memref<34x96xf32, #tpu.memory_space<vmem>>, vector<17x24xf32>
    tpu.vector_store %arg20[%c0_24, %c0_25], %51 {strides = array<i32>} : memref<34x96xf32, #tpu.memory_space<vmem>>, vector<17x24xf32>,
    %53 = vector.extract_strided_slice %35 {offsets = [0, 24], sizes = [17, 24], strides = [1, 1]} : vector<17x288xf32> to vector<17x24xf32>
    %54 = vector.extract_strided_slice %35 {offsets = [0, 120], sizes = [17, 24], strides = [1, 1]} : vector<17x288xf32> to vector<17x24xf32>
    %55 = vector.extract_strided_slice %35 {offsets = [0, 216], sizes = [17, 24], strides = [1, 1]} : vector<17x288xf32> to vector<17x24xf32>
    %cst_26 = arith.constant dense<0.000000e+00> : vector<17x17xf32>
    %56 = tpu.matmul %53, %54, %cst_26 {dimension_numbers = #tpu.dot_dimension_numbers<[1], [1], [0], [0], [0, 0, 1, 0], [], []>} : vector<17x24xf32>, vector<17x24xf32>, vector<17x17xf32> -> vector<17x17xf32>
    %cst_27 = arith.constant 0.204124153 : f32
    %57 = vector.broadcast %cst_27 : f32 to vector<17x17xf32>
    %58 = arith.mulf %56, %57 : vector<17x17xf32>
    %cst_28 = arith.constant dense<0xFF800000> : vector<17xf32>
    %59 = vector.multi_reduction <maximumf>, %58, %cst_28 [1] : vector<17x17xf32> to vector<17xf32>
    %60 = vector.shape_cast %59 : vector<17xf32> to vector<17x1xf32>
    %61 = vector.broadcast %60 : vector<17x1xf32> to vector<17x17xf32>
    %62 = arith.subf %58, %61 : vector<17x17xf32>
    %63 = math.exp %62 : vector<17x17xf32>
    %cst_29 = arith.constant dense<0.000000e+00> : vector<17xf32>
    %64 = vector.multi_reduction <add>, %63, %cst_29 [1] : vector<17x17xf32> to vector<17xf32>
    %65 = vector.shape_cast %64 : vector<17xf32> to vector<17x1xf32>
    %66 = vector.broadcast %65 : vector<17x1xf32> to vector<17x17xf32>
    %67 = arith.divf %63, %66 : vector<17x17xf32>
    %cst_30 = arith.constant dense<0.000000e+00> : vector<17x24xf32>
    %68 = tpu.matmul %67, %55, %cst_30 {dimension_numbers = #tpu.dot_dimension_numbers<[1], [0], [0], [1], [0, 0, 1, 1], [], []>} : vector<17x17xf32>, vector<17x24xf32>, vector<17x24xf32> -> vector<17x24xf32>
    %c0_31 = arith.constant 0 : index
    %c24 = arith.constant 24 : index
    %69 = vector.load %arg20[%c0_31, %c24] : memref<34x96xf32, #tpu.memory_space<vmem>>, vector<17x24xf32>
    tpu.vector_store %arg20[%c0_31, %c24], %68 {strides = array<i32>} : memref<34x96xf32, #tpu.memory_space<vmem>>, vector<17x24xf32>,
    %70 = vector.extract_strided_slice %35 {offsets = [0, 48], sizes = [17, 24], strides = [1, 1]} : vector<17x288xf32> to vector<17x24xf32>
    %71 = vector.extract_strided_slice %35 {offsets = [0, 144], sizes = [17, 24], strides = [1, 1]} : vector<17x288xf32> to vector<17x24xf32>
    %72 = vector.extract_strided_slice %35 {offsets = [0, 240], sizes = [17, 24], strides = [1, 1]} : vector<17x288xf32> to vector<17x24xf32>
    %cst_32 = arith.constant dense<0.000000e+00> : vector<17x17xf32>
    %73 = tpu.matmul %70, %71, %cst_32 {dimension_numbers = #tpu.dot_dimension_numbers<[1], [1], [0], [0], [0, 0, 1, 0], [], []>} : vector<17x24xf32>, vector<17x24xf32>, vector<17x17xf32> -> vector<17x17xf32>
    %cst_33 = arith.constant 0.204124153 : f32
    %74 = vector.broadcast %cst_33 : f32 to vector<17x17xf32>
    %75 = arith.mulf %73, %74 : vector<17x17xf32>
    %cst_34 = arith.constant dense<0xFF800000> : vector<17xf32>
    %76 = vector.multi_reduction <maximumf>, %75, %cst_34 [1] : vector<17x17xf32> to vector<17xf32>
    %77 = vector.shape_cast %76 : vector<17xf32> to vector<17x1xf32>
    %78 = vector.broadcast %77 : vector<17x1xf32> to vector<17x17xf32>
    %79 = arith.subf %75, %78 : vector<17x17xf32>
    %80 = math.exp %79 : vector<17x17xf32>
    %cst_35 = arith.constant dense<0.000000e+00> : vector<17xf32>
    %81 = vector.multi_reduction <add>, %80, %cst_35 [1] : vector<17x17xf32> to vector<17xf32>
    %82 = vector.shape_cast %81 : vector<17xf32> to vector<17x1xf32>
    %83 = vector.broadcast %82 : vector<17x1xf32> to vector<17x17xf32>
    %84 = arith.divf %80, %83 : vector<17x17xf32>
    %cst_36 = arith.constant dense<0.000000e+00> : vector<17x24xf32>
    %85 = tpu.matmul %84, %72, %cst_36 {dimension_numbers = #tpu.dot_dimension_numbers<[1], [0], [0], [1], [0, 0, 1, 1], [], []>} : vector<17x17xf32>, vector<17x24xf32>, vector<17x24xf32> -> vector<17x24xf32>
    %c0_37 = arith.constant 0 : index
    %c48 = arith.constant 48 : index
    %86 = vector.load %arg20[%c0_37, %c48] : memref<34x96xf32, #tpu.memory_space<vmem>>, vector<17x24xf32>
    tpu.vector_store %arg20[%c0_37, %c48], %85 {strides = array<i32>} : memref<34x96xf32, #tpu.memory_space<vmem>>, vector<17x24xf32>,
    %87 = vector.extract_strided_slice %35 {offsets = [0, 72], sizes = [17, 24], strides = [1, 1]} : vector<17x288xf32> to vector<17x24xf32>
    %88 = vector.extract_strided_slice %35 {offsets = [0, 168], sizes = [17, 24], strides = [1, 1]} : vector<17x288xf32> to vector<17x24xf32>
    %89 = vector.extract_strided_slice %35 {offsets = [0, 264], sizes = [17, 24], strides = [1, 1]} : vector<17x288xf32> to vector<17x24xf32>
    %cst_38 = arith.constant dense<0.000000e+00> : vector<17x17xf32>
    %90 = tpu.matmul %87, %88, %cst_38 {dimension_numbers = #tpu.dot_dimension_numbers<[1], [1], [0], [0], [0, 0, 1, 0], [], []>} : vector<17x24xf32>, vector<17x24xf32>, vector<17x17xf32> -> vector<17x17xf32>
    %cst_39 = arith.constant 0.204124153 : f32
    %91 = vector.broadcast %cst_39 : f32 to vector<17x17xf32>
    %92 = arith.mulf %90, %91 : vector<17x17xf32>
    %cst_40 = arith.constant dense<0xFF800000> : vector<17xf32>
    %93 = vector.multi_reduction <maximumf>, %92, %cst_40 [1] : vector<17x17xf32> to vector<17xf32>
    %94 = vector.shape_cast %93 : vector<17xf32> to vector<17x1xf32>
    %95 = vector.broadcast %94 : vector<17x1xf32> to vector<17x17xf32>
    %96 = arith.subf %92, %95 : vector<17x17xf32>
    %97 = math.exp %96 : vector<17x17xf32>
    %cst_41 = arith.constant dense<0.000000e+00> : vector<17xf32>
    %98 = vector.multi_reduction <add>, %97, %cst_41 [1] : vector<17x17xf32> to vector<17xf32>
    %99 = vector.shape_cast %98 : vector<17xf32> to vector<17x1xf32>
    %100 = vector.broadcast %99 : vector<17x1xf32> to vector<17x17xf32>
    %101 = arith.divf %97, %100 : vector<17x17xf32>
    %cst_42 = arith.constant dense<0.000000e+00> : vector<17x24xf32>
    %102 = tpu.matmul %101, %89, %cst_42 {dimension_numbers = #tpu.dot_dimension_numbers<[1], [0], [0], [1], [0, 0, 1, 1], [], []>} : vector<17x17xf32>, vector<17x24xf32>, vector<17x24xf32> -> vector<17x24xf32>
    %c0_43 = arith.constant 0 : index
    %c72 = arith.constant 72 : index
    %103 = vector.load %arg20[%c0_43, %c72] : memref<34x96xf32, #tpu.memory_space<vmem>>, vector<17x24xf32>
    tpu.vector_store %arg20[%c0_43, %c72], %102 {strides = array<i32>} : memref<34x96xf32, #tpu.memory_space<vmem>>, vector<17x24xf32>,
    %104 = vector.extract_strided_slice %34 {offsets = [17, 0], sizes = [17, 288], strides = [1, 1]} : vector<34x288xf32> to vector<17x288xf32>
    %105 = vector.extract_strided_slice %104 {offsets = [0, 0], sizes = [17, 24], strides = [1, 1]} : vector<17x288xf32> to vector<17x24xf32>
    %106 = vector.extract_strided_slice %104 {offsets = [0, 96], sizes = [17, 24], strides = [1, 1]} : vector<17x288xf32> to vector<17x24xf32>
    %107 = vector.extract_strided_slice %104 {offsets = [0, 192], sizes = [17, 24], strides = [1, 1]} : vector<17x288xf32> to vector<17x24xf32>
    %cst_44 = arith.constant dense<0.000000e+00> : vector<17x17xf32>
    %108 = tpu.matmul %105, %106, %cst_44 {dimension_numbers = #tpu.dot_dimension_numbers<[1], [1], [0], [0], [0, 0, 1, 0], [], []>} : vector<17x24xf32>, vector<17x24xf32>, vector<17x17xf32> -> vector<17x17xf32>
    %cst_45 = arith.constant 0.204124153 : f32
    %109 = vector.broadcast %cst_45 : f32 to vector<17x17xf32>
    %110 = arith.mulf %108, %109 : vector<17x17xf32>
    %cst_46 = arith.constant dense<0xFF800000> : vector<17xf32>
    %111 = vector.multi_reduction <maximumf>, %110, %cst_46 [1] : vector<17x17xf32> to vector<17xf32>
    %112 = vector.shape_cast %111 : vector<17xf32> to vector<17x1xf32>
    %113 = vector.broadcast %112 : vector<17x1xf32> to vector<17x17xf32>
    %114 = arith.subf %110, %113 : vector<17x17xf32>
    %115 = math.exp %114 : vector<17x17xf32>
    %cst_47 = arith.constant dense<0.000000e+00> : vector<17xf32>
    %116 = vector.multi_reduction <add>, %115, %cst_47 [1] : vector<17x17xf32> to vector<17xf32>
    %117 = vector.shape_cast %116 : vector<17xf32> to vector<17x1xf32>
    %118 = vector.broadcast %117 : vector<17x1xf32> to vector<17x17xf32>
    %119 = arith.divf %115, %118 : vector<17x17xf32>
    %cst_48 = arith.constant dense<0.000000e+00> : vector<17x24xf32>
    %120 = tpu.matmul %119, %107, %cst_48 {dimension_numbers = #tpu.dot_dimension_numbers<[1], [0], [0], [1], [0, 0, 1, 1], [], []>} : vector<17x17xf32>, vector<17x24xf32>, vector<17x24xf32> -> vector<17x24xf32>
    %c17 = arith.constant 17 : index
    %c0_49 = arith.constant 0 : index
    %121 = vector.load %arg20[%c17, %c0_49] : memref<34x96xf32, #tpu.memory_space<vmem>>, vector<17x24xf32>
    tpu.vector_store %arg20[%c17, %c0_49], %120 {strides = array<i32>} : memref<34x96xf32, #tpu.memory_space<vmem>>, vector<17x24xf32>,
    %122 = vector.extract_strided_slice %104 {offsets = [0, 24], sizes = [17, 24], strides = [1, 1]} : vector<17x288xf32> to vector<17x24xf32>
    %123 = vector.extract_strided_slice %104 {offsets = [0, 120], sizes = [17, 24], strides = [1, 1]} : vector<17x288xf32> to vector<17x24xf32>
    %124 = vector.extract_strided_slice %104 {offsets = [0, 216], sizes = [17, 24], strides = [1, 1]} : vector<17x288xf32> to vector<17x24xf32>
    %cst_50 = arith.constant dense<0.000000e+00> : vector<17x17xf32>
    %125 = tpu.matmul %122, %123, %cst_50 {dimension_numbers = #tpu.dot_dimension_numbers<[1], [1], [0], [0], [0, 0, 1, 0], [], []>} : vector<17x24xf32>, vector<17x24xf32>, vector<17x17xf32> -> vector<17x17xf32>
    %cst_51 = arith.constant 0.204124153 : f32
    %126 = vector.broadcast %cst_51 : f32 to vector<17x17xf32>
    %127 = arith.mulf %125, %126 : vector<17x17xf32>
    %cst_52 = arith.constant dense<0xFF800000> : vector<17xf32>
    %128 = vector.multi_reduction <maximumf>, %127, %cst_52 [1] : vector<17x17xf32> to vector<17xf32>
    %129 = vector.shape_cast %128 : vector<17xf32> to vector<17x1xf32>
    %130 = vector.broadcast %129 : vector<17x1xf32> to vector<17x17xf32>
    %131 = arith.subf %127, %130 : vector<17x17xf32>
    %132 = math.exp %131 : vector<17x17xf32>
    %cst_53 = arith.constant dense<0.000000e+00> : vector<17xf32>
    %133 = vector.multi_reduction <add>, %132, %cst_53 [1] : vector<17x17xf32> to vector<17xf32>
    %134 = vector.shape_cast %133 : vector<17xf32> to vector<17x1xf32>
    %135 = vector.broadcast %134 : vector<17x1xf32> to vector<17x17xf32>
    %136 = arith.divf %132, %135 : vector<17x17xf32>
    %cst_54 = arith.constant dense<0.000000e+00> : vector<17x24xf32>
    %137 = tpu.matmul %136, %124, %cst_54 {dimension_numbers = #tpu.dot_dimension_numbers<[1], [0], [0], [1], [0, 0, 1, 1], [], []>} : vector<17x17xf32>, vector<17x24xf32>, vector<17x24xf32> -> vector<17x24xf32>
    %c17_55 = arith.constant 17 : index
    %c24_56 = arith.constant 24 : index
    %138 = vector.load %arg20[%c17_55, %c24_56] : memref<34x96xf32, #tpu.memory_space<vmem>>, vector<17x24xf32>
    tpu.vector_store %arg20[%c17_55, %c24_56], %137 {strides = array<i32>} : memref<34x96xf32, #tpu.memory_space<vmem>>, vector<17x24xf32>,
    %139 = vector.extract_strided_slice %104 {offsets = [0, 48], sizes = [17, 24], strides = [1, 1]} : vector<17x288xf32> to vector<17x24xf32>
    %140 = vector.extract_strided_slice %104 {offsets = [0, 144], sizes = [17, 24], strides = [1, 1]} : vector<17x288xf32> to vector<17x24xf32>
    %141 = vector.extract_strided_slice %104 {offsets = [0, 240], sizes = [17, 24], strides = [1, 1]} : vector<17x288xf32> to vector<17x24xf32>
    %cst_57 = arith.constant dense<0.000000e+00> : vector<17x17xf32>
    %142 = tpu.matmul %139, %140, %cst_57 {dimension_numbers = #tpu.dot_dimension_numbers<[1], [1], [0], [0], [0, 0, 1, 0], [], []>} : vector<17x24xf32>, vector<17x24xf32>, vector<17x17xf32> -> vector<17x17xf32>
    %cst_58 = arith.constant 0.204124153 : f32
    %143 = vector.broadcast %cst_58 : f32 to vector<17x17xf32>
    %144 = arith.mulf %142, %143 : vector<17x17xf32>
    %cst_59 = arith.constant dense<0xFF800000> : vector<17xf32>
    %145 = vector.multi_reduction <maximumf>, %144, %cst_59 [1] : vector<17x17xf32> to vector<17xf32>
    %146 = vector.shape_cast %145 : vector<17xf32> to vector<17x1xf32>
    %147 = vector.broadcast %146 : vector<17x1xf32> to vector<17x17xf32>
    %148 = arith.subf %144, %147 : vector<17x17xf32>
    %149 = math.exp %148 : vector<17x17xf32>
    %cst_60 = arith.constant dense<0.000000e+00> : vector<17xf32>
    %150 = vector.multi_reduction <add>, %149, %cst_60 [1] : vector<17x17xf32> to vector<17xf32>
    %151 = vector.shape_cast %150 : vector<17xf32> to vector<17x1xf32>
    %152 = vector.broadcast %151 : vector<17x1xf32> to vector<17x17xf32>
    %153 = arith.divf %149, %152 : vector<17x17xf32>
    %cst_61 = arith.constant dense<0.000000e+00> : vector<17x24xf32>
    %154 = tpu.matmul %153, %141, %cst_61 {dimension_numbers = #tpu.dot_dimension_numbers<[1], [0], [0], [1], [0, 0, 1, 1], [], []>} : vector<17x17xf32>, vector<17x24xf32>, vector<17x24xf32> -> vector<17x24xf32>
    %c17_62 = arith.constant 17 : index
    %c48_63 = arith.constant 48 : index
    %155 = vector.load %arg20[%c17_62, %c48_63] : memref<34x96xf32, #tpu.memory_space<vmem>>, vector<17x24xf32>
    tpu.vector_store %arg20[%c17_62, %c48_63], %154 {strides = array<i32>} : memref<34x96xf32, #tpu.memory_space<vmem>>, vector<17x24xf32>,
    %156 = vector.extract_strided_slice %104 {offsets = [0, 72], sizes = [17, 24], strides = [1, 1]} : vector<17x288xf32> to vector<17x24xf32>
    %157 = vector.extract_strided_slice %104 {offsets = [0, 168], sizes = [17, 24], strides = [1, 1]} : vector<17x288xf32> to vector<17x24xf32>
    %158 = vector.extract_strided_slice %104 {offsets = [0, 264], sizes = [17, 24], strides = [1, 1]} : vector<17x288xf32> to vector<17x24xf32>
    %cst_64 = arith.constant dense<0.000000e+00> : vector<17x17xf32>
    %159 = tpu.matmul %156, %157, %cst_64 {dimension_numbers = #tpu.dot_dimension_numbers<[1], [1], [0], [0], [0, 0, 1, 0], [], []>} : vector<17x24xf32>, vector<17x24xf32>, vector<17x17xf32> -> vector<17x17xf32>
    %cst_65 = arith.constant 0.204124153 : f32
    %160 = vector.broadcast %cst_65 : f32 to vector<17x17xf32>
    %161 = arith.mulf %159, %160 : vector<17x17xf32>
    %cst_66 = arith.constant dense<0xFF800000> : vector<17xf32>
    %162 = vector.multi_reduction <maximumf>, %161, %cst_66 [1] : vector<17x17xf32> to vector<17xf32>
    %163 = vector.shape_cast %162 : vector<17xf32> to vector<17x1xf32>
    %164 = vector.broadcast %163 : vector<17x1xf32> to vector<17x17xf32>
    %165 = arith.subf %161, %164 : vector<17x17xf32>
    %166 = math.exp %165 : vector<17x17xf32>
    %cst_67 = arith.constant dense<0.000000e+00> : vector<17xf32>
    %167 = vector.multi_reduction <add>, %166, %cst_67 [1] : vector<17x17xf32> to vector<17xf32>
    %168 = vector.shape_cast %167 : vector<17xf32> to vector<17x1xf32>
    %169 = vector.broadcast %168 : vector<17x1xf32> to vector<17x17xf32>
    %170 = arith.divf %166, %169 : vector<17x17xf32>
    %cst_68 = arith.constant dense<0.000000e+00> : vector<17x24xf32>
    %171 = tpu.matmul %170, %158, %cst_68 {dimension_numbers = #tpu.dot_dimension_numbers<[1], [0], [0], [1], [0, 0, 1, 1], [], []>} : vector<17x17xf32>, vector<17x24xf32>, vector<17x24xf32> -> vector<17x24xf32>
    %c17_69 = arith.constant 17 : index
    %c72_70 = arith.constant 72 : index
    %172 = vector.load %arg20[%c17_69, %c72_70] : memref<34x96xf32, #tpu.memory_space<vmem>>, vector<17x24xf32>
    tpu.vector_store %arg20[%c17_69, %c72_70], %171 {strides = array<i32>} : memref<34x96xf32, #tpu.memory_space<vmem>>, vector<17x24xf32>,
    %c0_71 = arith.constant 0 : index
    %c0_72 = arith.constant 0 : index
    %173 = vector.load %arg20[%c0_71, %c0_72] : memref<34x96xf32, #tpu.memory_space<vmem>>, vector<34x96xf32>
    %c0_73 = arith.constant 0 : index
    %c0_74 = arith.constant 0 : index
    %c0_75 = arith.constant 0 : index
    %174 = vector.load %arg10[%c0_73, %c0_74, %c0_75] : memref<1x96x96xf32, #tpu.memory_space<vmem>>, vector<1x96x96xf32>
    %175 = vector.shape_cast %174 : vector<1x96x96xf32> to vector<96x96xf32>
    %cst_76 = arith.constant dense<0.000000e+00> : vector<34x96xf32>
    %176 = tpu.matmul %173, %175, %cst_76 {dimension_numbers = #tpu.dot_dimension_numbers<[1], [0], [0], [1], [0, 0, 1, 1], [], []>} : vector<34x96xf32>, vector<96x96xf32>, vector<34x96xf32> -> vector<34x96xf32>
    %177 = arith.addf %3, %176 : vector<34x96xf32>
    %c0_77 = arith.constant 0 : index
    %c0_78 = arith.constant 0 : index
    %c0_79 = arith.constant 0 : index
    %178 = vector.load %arg11[%c0_77, %c0_78, %c0_79] : memref<1x1x96xf32, #tpu.memory_space<vmem>>, vector<1x1x96xf32>
    %179 = vector.shape_cast %178 : vector<1x1x96xf32> to vector<1x96xf32>
    %180 = vector.broadcast %179 : vector<1x96xf32> to vector<34x96xf32>
    %181 = arith.addf %177, %180 : vector<34x96xf32>
    %c0_80 = arith.constant 0 : index
    %c0_81 = arith.constant 0 : index
    %c0_82 = arith.constant 0 : index
    %182 = vector.load %arg12[%c0_80, %c0_81, %c0_82] : memref<1x1x96xf32, #tpu.memory_space<vmem>>, vector<1x1x96xf32>
    %183 = vector.shape_cast %182 : vector<1x1x96xf32> to vector<1x96xf32>
    %c0_83 = arith.constant 0 : index
    %c0_84 = arith.constant 0 : index
    %c0_85 = arith.constant 0 : index
    %184 = vector.load %arg13[%c0_83, %c0_84, %c0_85] : memref<1x1x96xf32, #tpu.memory_space<vmem>>, vector<1x1x96xf32>
    %185 = vector.shape_cast %184 : vector<1x1x96xf32> to vector<1x96xf32>
    %cst_86 = arith.constant dense<0.000000e+00> : vector<34xf32>
    %186 = vector.multi_reduction <add>, %181, %cst_86 [1] : vector<34x96xf32> to vector<34xf32>
    %187 = vector.shape_cast %186 : vector<34xf32> to vector<34x1xf32>
    %cst_87 = arith.constant 9.600000e+01 : f32
    %188 = vector.broadcast %cst_87 : f32 to vector<34x1xf32>
    %189 = arith.divf %187, %188 : vector<34x1xf32>
    %190 = vector.broadcast %189 : vector<34x1xf32> to vector<34x96xf32>
    %191 = arith.subf %181, %190 : vector<34x96xf32>
    %192 = arith.mulf %191, %191 : vector<34x96xf32>
    %cst_88 = arith.constant dense<0.000000e+00> : vector<34xf32>
    %193 = vector.multi_reduction <add>, %192, %cst_88 [1] : vector<34x96xf32> to vector<34xf32>
    %194 = vector.shape_cast %193 : vector<34xf32> to vector<34x1xf32>
    %cst_89 = arith.constant 9.600000e+01 : f32
    %195 = vector.broadcast %cst_89 : f32 to vector<34x1xf32>
    %196 = arith.divf %194, %195 : vector<34x1xf32>
    %cst_90 = arith.constant 9.99999996E-13 : f32
    %197 = vector.broadcast %cst_90 : f32 to vector<34x1xf32>
    %198 = arith.addf %196, %197 : vector<34x1xf32>
    %199 = math.rsqrt %198 : vector<34x1xf32>
    %200 = vector.broadcast %199 : vector<34x1xf32> to vector<34x96xf32>
    %201 = arith.mulf %191, %200 : vector<34x96xf32>
    %202 = vector.broadcast %183 : vector<1x96xf32> to vector<34x96xf32>
    %203 = arith.mulf %201, %202 : vector<34x96xf32>
    %204 = vector.broadcast %185 : vector<1x96xf32> to vector<34x96xf32>
    %205 = arith.addf %203, %204 : vector<34x96xf32>
    %c0_91 = arith.constant 0 : index
    %c0_92 = arith.constant 0 : index
    %c0_93 = arith.constant 0 : index
    %206 = vector.load %arg14[%c0_91, %c0_92, %c0_93] : memref<1x96x384xf32, #tpu.memory_space<vmem>>, vector<1x96x384xf32>
    %207 = vector.shape_cast %206 : vector<1x96x384xf32> to vector<96x384xf32>
    %cst_94 = arith.constant dense<0.000000e+00> : vector<34x384xf32>
    %208 = tpu.matmul %205, %207, %cst_94 {dimension_numbers = #tpu.dot_dimension_numbers<[1], [0], [0], [1], [0, 0, 1, 1], [], []>} : vector<34x96xf32>, vector<96x384xf32>, vector<34x384xf32> -> vector<34x384xf32>
    %c0_95 = arith.constant 0 : index
    %c0_96 = arith.constant 0 : index
    %c0_97 = arith.constant 0 : index
    %209 = vector.load %arg15[%c0_95, %c0_96, %c0_97] : memref<1x1x384xf32, #tpu.memory_space<vmem>>, vector<1x1x384xf32>
    %210 = vector.shape_cast %209 : vector<1x1x384xf32> to vector<1x384xf32>
    %211 = vector.broadcast %210 : vector<1x384xf32> to vector<34x384xf32>
    %212 = arith.addf %208, %211 : vector<34x384xf32>
    %213 = arith.mulf %212, %212 : vector<34x384xf32>
    %214 = arith.mulf %212, %213 : vector<34x384xf32>
    %cst_98 = arith.constant 4.471500e-02 : f32
    %215 = vector.broadcast %cst_98 : f32 to vector<34x384xf32>
    %216 = arith.mulf %215, %214 : vector<34x384xf32>
    %217 = arith.addf %212, %216 : vector<34x384xf32>
    %cst_99 = arith.constant 0.797884583 : f32
    %218 = vector.broadcast %cst_99 : f32 to vector<34x384xf32>
    %219 = arith.mulf %218, %217 : vector<34x384xf32>
    %220 = math.tanh %219 : vector<34x384xf32>
    %cst_100 = arith.constant 1.000000e+00 : f32
    %221 = vector.broadcast %cst_100 : f32 to vector<34x384xf32>
    %222 = arith.addf %221, %220 : vector<34x384xf32>
    %cst_101 = arith.constant 5.000000e-01 : f32
    %223 = vector.broadcast %cst_101 : f32 to vector<34x384xf32>
    %224 = arith.mulf %223, %222 : vector<34x384xf32>
    %225 = arith.mulf %212, %224 : vector<34x384xf32>
    %c0_102 = arith.constant 0 : index
    %c0_103 = arith.constant 0 : index
    %c0_104 = arith.constant 0 : index
    %226 = vector.load %arg16[%c0_102, %c0_103, %c0_104] : memref<1x384x96xf32, #tpu.memory_space<vmem>>, vector<1x384x96xf32>
    %227 = vector.shape_cast %226 : vector<1x384x96xf32> to vector<384x96xf32>
    %cst_105 = arith.constant dense<0.000000e+00> : vector<34x96xf32>
    %228 = tpu.matmul %225, %227, %cst_105 {dimension_numbers = #tpu.dot_dimension_numbers<[1], [0], [0], [1], [0, 0, 1, 1], [], []>} : vector<34x384xf32>, vector<384x96xf32>, vector<34x96xf32> -> vector<34x96xf32>
    %229 = arith.addf %181, %228 : vector<34x96xf32>
    %c0_106 = arith.constant 0 : index
    %c0_107 = arith.constant 0 : index
    %c0_108 = arith.constant 0 : index
    %230 = vector.load %arg17[%c0_106, %c0_107, %c0_108] : memref<1x1x96xf32, #tpu.memory_space<vmem>>, vector<1x1x96xf32>
    %231 = vector.shape_cast %230 : vector<1x1x96xf32> to vector<1x96xf32>
    %232 = vector.broadcast %231 : vector<1x96xf32> to vector<34x96xf32>
    %233 = arith.addf %229, %232 : vector<34x96xf32>
    %c0_109 = arith.constant 0 : index
    %c0_110 = arith.constant 0 : index
    %234 = vector.load %arg19[%c0_109, %c0_110] : memref<34x96xf32, #tpu.memory_space<vmem>>, vector<34x96xf32>
    tpu.vector_store %arg19[%c0_109, %c0_110], %233 {strides = array<i32>} : memref<34x96xf32, #tpu.memory_space<vmem>>, vector<34x96xf32>,
    %c0_111 = arith.constant 0 : index
    %c0_112 = arith.constant 0 : index
    %c0_113 = arith.constant 0 : index
    %235 = vector.load %arg18[%c0_111, %c0_112, %c0_113] : memref<1x34x96xf32, #tpu.memory_space<vmem>>, vector<1x34x96xf32>
    %236 = vector.shape_cast %235 : vector<1x34x96xf32> to vector<34x96xf32>
    %237 = vector.shape_cast %233 : vector<34x96xf32> to vector<1x34x96xf32>
    tpu.vector_store %arg18[%c0_111, %c0_112, %c0_113], %237 {strides = array<i32>} : memref<1x34x96xf32, #tpu.memory_space<vmem>>, vector<1x34x96xf32>,
    return
  }
  func.func @transform_0(%arg0: i32) -> (i32, i32) {
    %c0_i32 = arith.constant 0 : i32
    %c0_i32_0 = arith.constant 0 : i32
    %c0_i32_1 = arith.constant 0 : i32
    return %c0_i32, %c0_i32_0 : i32, i32
  }
  func.func @transform_1(%arg0: i32) -> (i32, i32) {
    %c0_i32 = arith.constant 0 : i32
    %c0_i32_0 = arith.constant 0 : i32
    %c0_i32_1 = arith.constant 0 : i32
    return %c0_i32, %c0_i32_0 : i32, i32
  }
  func.func @transform_2(%arg0: i32) -> (i32, i32) {
    %c0_i32 = arith.constant 0 : i32
    %c0_i32_0 = arith.constant 0 : i32
    %c0_i32_1 = arith.constant 0 : i32
    return %c0_i32, %c0_i32_0 : i32, i32
  }
  func.func @transform_3(%arg0: i32) -> (i32, i32) {
    %c0_i32 = arith.constant 0 : i32
    %c0_i32_0 = arith.constant 0 : i32
    %c0_i32_1 = arith.constant 0 : i32
    return %c0_i32, %c0_i32_0 : i32, i32
  }
  func.func @transform_4(%arg0: i32) -> (i32, i32) {
    %c0_i32 = arith.constant 0 : i32
    %c0_i32_0 = arith.constant 0 : i32
    %c0_i32_1 = arith.constant 0 : i32
    return %c0_i32, %c0_i32_0 : i32, i32
  }
  func.func @transform_5(%arg0: i32) -> (i32, i32, i32) {
    %c0_i32 = arith.constant 0 : i32
    %c0_i32_0 = arith.constant 0 : i32
    %c0_i32_1 = arith.constant 0 : i32
    return %arg0, %c0_i32, %c0_i32_0 : i32, i32, i32
  }
  func.func @transform_6(%arg0: i32) -> (i32, i32, i32) {
    %c0_i32 = arith.constant 0 : i32
    %c0_i32_0 = arith.constant 0 : i32
    %c0_i32_1 = arith.constant 0 : i32
    return %arg0, %c0_i32, %c0_i32_0 : i32, i32, i32
  }
  func.func @transform_7(%arg0: i32) -> (i32, i32, i32) {
    %c0_i32 = arith.constant 0 : i32
    %c0_i32_0 = arith.constant 0 : i32
    %c0_i32_1 = arith.constant 0 : i32
    return %arg0, %c0_i32, %c0_i32_0 : i32, i32, i32
  }
  func.func @transform_8(%arg0: i32) -> (i32, i32, i32) {
    %c0_i32 = arith.constant 0 : i32
    %c0_i32_0 = arith.constant 0 : i32
    %c0_i32_1 = arith.constant 0 : i32
    return %arg0, %c0_i32, %c0_i32_0 : i32, i32, i32
  }
  func.func @transform_9(%arg0: i32) -> (i32, i32, i32) {
    %c0_i32 = arith.constant 0 : i32
    %c0_i32_0 = arith.constant 0 : i32
    %c0_i32_1 = arith.constant 0 : i32
    return %arg0, %c0_i32, %c0_i32_0 : i32, i32, i32
  }
  func.func @transform_10(%arg0: i32) -> (i32, i32, i32) {
    %c0_i32 = arith.constant 0 : i32
    %c0_i32_0 = arith.constant 0 : i32
    %c0_i32_1 = arith.constant 0 : i32
    return %arg0, %c0_i32, %c0_i32_0 : i32, i32, i32
  }
  func.func @transform_11(%arg0: i32) -> (i32, i32, i32) {
    %c0_i32 = arith.constant 0 : i32
    %c0_i32_0 = arith.constant 0 : i32
    %c0_i32_1 = arith.constant 0 : i32
    return %arg0, %c0_i32, %c0_i32_0 : i32, i32, i32
  }
  func.func @transform_12(%arg0: i32) -> (i32, i32, i32) {
    %c0_i32 = arith.constant 0 : i32
    %c0_i32_0 = arith.constant 0 : i32
    %c0_i32_1 = arith.constant 0 : i32
    return %arg0, %c0_i32, %c0_i32_0 : i32, i32, i32
  }
  func.func @transform_13(%arg0: i32) -> (i32, i32, i32) {
    %c0_i32 = arith.constant 0 : i32
    %c0_i32_0 = arith.constant 0 : i32
    %c0_i32_1 = arith.constant 0 : i32
    return %arg0, %c0_i32, %c0_i32_0 : i32, i32, i32
  }
  func.func @transform_14(%arg0: i32) -> (i32, i32, i32) {
    %c0_i32 = arith.constant 0 : i32
    %c0_i32_0 = arith.constant 0 : i32
    %c0_i32_1 = arith.constant 0 : i32
    return %arg0, %c0_i32, %c0_i32_0 : i32, i32, i32
  }
  func.func @transform_15(%arg0: i32) -> (i32, i32, i32) {
    %c0_i32 = arith.constant 0 : i32
    %c0_i32_0 = arith.constant 0 : i32
    %c0_i32_1 = arith.constant 0 : i32
    return %arg0, %c0_i32, %c0_i32_0 : i32, i32, i32
  }
  func.func @transform_16(%arg0: i32) -> (i32, i32, i32) {
    %c0_i32 = arith.constant 0 : i32
    %c0_i32_0 = arith.constant 0 : i32
    %c0_i32_1 = arith.constant 0 : i32
    return %arg0, %c0_i32, %c0_i32_0 : i32, i32, i32
  }
  func.func @transform_17(%arg0: i32) -> (i32, i32, i32) {
    %c0_i32 = arith.constant 0 : i32
    %c0_i32_0 = arith.constant 0 : i32
    %c0_i32_1 = arith.constant 0 : i32
    return %arg0, %c0_i32, %c0_i32_0 : i32, i32, i32
  }
}

module attributes {stable_mosaic.version = 11 : i64} {
  func.func @kernel(%arg0: i32, %arg1: i32, %arg2: memref<1x288x32xf32, #tpu.memory_space<vmem>>, %arg3: memref<1x3x64x96xf32, #tpu.memory_space<vmem>>, %arg4: memref<1x3x64x1xf32, #tpu.memory_space<vmem>>, %arg5: memref<1x192x32xf32, #tpu.memory_space<vmem>>) attributes {dimension_semantics = [#tpu.dimension_semantics<parallel>, #tpu.dimension_semantics<parallel>], iteration_bounds = array<i64: 4, 1>, scalar_prefetch = 0 : i64, scratch_operands = 0 : i64, tpu.core_type = #tpu.core_type<tc>, window_params = [{transform_indices = @transform_0, window_bounds = array<i64: 1, 288, 32>}, {transform_indices = @transform_1, window_bounds = array<i64: 1, 3, 64, 96>}, {transform_indices = @transform_2, window_bounds = array<i64: 1, 3, 64, 1>}, {transform_indices = @transform_3, window_bounds = array<i64: 1, 192, 32>}]} {
    %c0 = arith.constant 0 : index
    %c0_0 = arith.constant 0 : index
    %c0_1 = arith.constant 0 : index
    %0 = vector.load %arg2[%c0, %c0_0, %c0_1] : memref<1x288x32xf32, #tpu.memory_space<vmem>>, vector<1x96x32xf32>
    %1 = vector.shape_cast %0 : vector<1x96x32xf32> to vector<96x32xf32>
    %c0_2 = arith.constant 0 : index
    %c0_3 = arith.constant 0 : index
    %c0_4 = arith.constant 0 : index
    %c0_5 = arith.constant 0 : index
    %2 = vector.load %arg3[%c0_2, %c0_3, %c0_4, %c0_5] : memref<1x3x64x96xf32, #tpu.memory_space<vmem>>, vector<1x1x64x96xf32>
    %3 = vector.shape_cast %2 : vector<1x1x64x96xf32> to vector<64x96xf32>
    %cst = arith.constant dense<0.000000e+00> : vector<64x32xf32>
    %4 = tpu.matmul %3, %1, %cst {dimension_numbers = #tpu.dot_dimension_numbers<[1], [0], [0], [1], [0, 0, 1, 1], [], []>} : vector<64x96xf32>, vector<96x32xf32>, vector<64x32xf32> -> vector<64x32xf32>
    %c0_6 = arith.constant 0 : index
    %c0_7 = arith.constant 0 : index
    %c0_8 = arith.constant 0 : index
    %c0_9 = arith.constant 0 : index
    %5 = vector.load %arg4[%c0_6, %c0_7, %c0_8, %c0_9] : memref<1x3x64x1xf32, #tpu.memory_space<vmem>>, vector<1x1x64x1xf32>
    %6 = vector.shape_cast %5 : vector<1x1x64x1xf32> to vector<64x1xf32>
    %7 = vector.broadcast %6 : vector<64x1xf32> to vector<64x32xf32>
    %8 = arith.addf %4, %7 : vector<64x32xf32>
    %c0_10 = arith.constant 0 : index
    %c0_11 = arith.constant 0 : index
    %c0_12 = arith.constant 0 : index
    %9 = vector.load %arg5[%c0_10, %c0_11, %c0_12] : memref<1x192x32xf32, #tpu.memory_space<vmem>>, vector<1x64x32xf32>
    %10 = vector.shape_cast %9 : vector<1x64x32xf32> to vector<64x32xf32>
    %11 = vector.shape_cast %8 : vector<64x32xf32> to vector<1x64x32xf32>
    tpu.vector_store %arg5[%c0_10, %c0_11, %c0_12], %11 {strides = array<i32>} : memref<1x192x32xf32, #tpu.memory_space<vmem>>, vector<1x64x32xf32>,
    %c0_13 = arith.constant 0 : index
    %c96 = arith.constant 96 : index
    %c0_14 = arith.constant 0 : index
    %12 = vector.load %arg2[%c0_13, %c96, %c0_14] : memref<1x288x32xf32, #tpu.memory_space<vmem>>, vector<1x96x32xf32>
    %13 = vector.shape_cast %12 : vector<1x96x32xf32> to vector<96x32xf32>
    %c0_15 = arith.constant 0 : index
    %c1 = arith.constant 1 : index
    %c0_16 = arith.constant 0 : index
    %c0_17 = arith.constant 0 : index
    %14 = vector.load %arg3[%c0_15, %c1, %c0_16, %c0_17] : memref<1x3x64x96xf32, #tpu.memory_space<vmem>>, vector<1x1x64x96xf32>
    %15 = vector.shape_cast %14 : vector<1x1x64x96xf32> to vector<64x96xf32>
    %cst_18 = arith.constant dense<0.000000e+00> : vector<64x32xf32>
    %16 = tpu.matmul %15, %13, %cst_18 {dimension_numbers = #tpu.dot_dimension_numbers<[1], [0], [0], [1], [0, 0, 1, 1], [], []>} : vector<64x96xf32>, vector<96x32xf32>, vector<64x32xf32> -> vector<64x32xf32>
    %c0_19 = arith.constant 0 : index
    %c1_20 = arith.constant 1 : index
    %c0_21 = arith.constant 0 : index
    %c0_22 = arith.constant 0 : index
    %17 = vector.load %arg4[%c0_19, %c1_20, %c0_21, %c0_22] : memref<1x3x64x1xf32, #tpu.memory_space<vmem>>, vector<1x1x64x1xf32>
    %18 = vector.shape_cast %17 : vector<1x1x64x1xf32> to vector<64x1xf32>
    %19 = vector.broadcast %18 : vector<64x1xf32> to vector<64x32xf32>
    %20 = arith.addf %16, %19 : vector<64x32xf32>
    %c0_23 = arith.constant 0 : index
    %c64 = arith.constant 64 : index
    %c0_24 = arith.constant 0 : index
    %21 = vector.load %arg5[%c0_23, %c64, %c0_24] : memref<1x192x32xf32, #tpu.memory_space<vmem>>, vector<1x64x32xf32>
    %22 = vector.shape_cast %21 : vector<1x64x32xf32> to vector<64x32xf32>
    %23 = vector.shape_cast %20 : vector<64x32xf32> to vector<1x64x32xf32>
    tpu.vector_store %arg5[%c0_23, %c64, %c0_24], %23 {strides = array<i32>} : memref<1x192x32xf32, #tpu.memory_space<vmem>>, vector<1x64x32xf32>,
    %c0_25 = arith.constant 0 : index
    %c192 = arith.constant 192 : index
    %c0_26 = arith.constant 0 : index
    %24 = vector.load %arg2[%c0_25, %c192, %c0_26] : memref<1x288x32xf32, #tpu.memory_space<vmem>>, vector<1x96x32xf32>
    %25 = vector.shape_cast %24 : vector<1x96x32xf32> to vector<96x32xf32>
    %c0_27 = arith.constant 0 : index
    %c2 = arith.constant 2 : index
    %c0_28 = arith.constant 0 : index
    %c0_29 = arith.constant 0 : index
    %26 = vector.load %arg3[%c0_27, %c2, %c0_28, %c0_29] : memref<1x3x64x96xf32, #tpu.memory_space<vmem>>, vector<1x1x64x96xf32>
    %27 = vector.shape_cast %26 : vector<1x1x64x96xf32> to vector<64x96xf32>
    %cst_30 = arith.constant dense<0.000000e+00> : vector<64x32xf32>
    %28 = tpu.matmul %27, %25, %cst_30 {dimension_numbers = #tpu.dot_dimension_numbers<[1], [0], [0], [1], [0, 0, 1, 1], [], []>} : vector<64x96xf32>, vector<96x32xf32>, vector<64x32xf32> -> vector<64x32xf32>
    %c0_31 = arith.constant 0 : index
    %c2_32 = arith.constant 2 : index
    %c0_33 = arith.constant 0 : index
    %c0_34 = arith.constant 0 : index
    %29 = vector.load %arg4[%c0_31, %c2_32, %c0_33, %c0_34] : memref<1x3x64x1xf32, #tpu.memory_space<vmem>>, vector<1x1x64x1xf32>
    %30 = vector.shape_cast %29 : vector<1x1x64x1xf32> to vector<64x1xf32>
    %31 = vector.broadcast %30 : vector<64x1xf32> to vector<64x32xf32>
    %32 = arith.addf %28, %31 : vector<64x32xf32>
    %c0_35 = arith.constant 0 : index
    %c128 = arith.constant 128 : index
    %c0_36 = arith.constant 0 : index
    %33 = vector.load %arg5[%c0_35, %c128, %c0_36] : memref<1x192x32xf32, #tpu.memory_space<vmem>>, vector<1x64x32xf32>
    %34 = vector.shape_cast %33 : vector<1x64x32xf32> to vector<64x32xf32>
    %35 = vector.shape_cast %32 : vector<64x32xf32> to vector<1x64x32xf32>
    tpu.vector_store %arg5[%c0_35, %c128, %c0_36], %35 {strides = array<i32>} : memref<1x192x32xf32, #tpu.memory_space<vmem>>, vector<1x64x32xf32>,
    return
  }
  func.func @transform_0(%arg0: i32, %arg1: i32) -> (i32, i32, i32) {
    %c0_i32 = arith.constant 0 : i32
    %c0_i32_0 = arith.constant 0 : i32
    return %arg0, %c0_i32, %arg1 : i32, i32, i32
  }
  func.func @transform_1(%arg0: i32, %arg1: i32) -> (i32, i32, i32, i32) {
    %c0_i32 = arith.constant 0 : i32
    %c0_i32_0 = arith.constant 0 : i32
    %c0_i32_1 = arith.constant 0 : i32
    %c0_i32_2 = arith.constant 0 : i32
    return %arg0, %c0_i32, %c0_i32_0, %c0_i32_1 : i32, i32, i32, i32
  }
  func.func @transform_2(%arg0: i32, %arg1: i32) -> (i32, i32, i32, i32) {
    %c0_i32 = arith.constant 0 : i32
    %c0_i32_0 = arith.constant 0 : i32
    %c0_i32_1 = arith.constant 0 : i32
    %c0_i32_2 = arith.constant 0 : i32
    return %arg0, %c0_i32, %c0_i32_0, %c0_i32_1 : i32, i32, i32, i32
  }
  func.func @transform_3(%arg0: i32, %arg1: i32) -> (i32, i32, i32) {
    %c0_i32 = arith.constant 0 : i32
    %c0_i32_0 = arith.constant 0 : i32
    return %arg0, %c0_i32, %arg1 : i32, i32, i32
  }
}

module attributes {stable_mosaic.version = 11 : i64} {
  func.func @kernel(%arg0: i32, %arg1: i32, %arg2: memref<1x96x128xf32, #tpu.memory_space<vmem>>, %arg3: memref<1x2x32x48xf32, #tpu.memory_space<vmem>>, %arg4: memref<1x2x32x1xf32, #tpu.memory_space<vmem>>, %arg5: memref<1x64x128xf32, #tpu.memory_space<vmem>>) attributes {dimension_semantics = [#tpu.dimension_semantics<parallel>, #tpu.dimension_semantics<parallel>], iteration_bounds = array<i64: 2, 1>, scalar_prefetch = 0 : i64, scratch_operands = 0 : i64, tpu.core_type = #tpu.core_type<tc>, window_params = [{transform_indices = @transform_0, window_bounds = array<i64: 1, 96, 128>}, {transform_indices = @transform_1, window_bounds = array<i64: 1, 2, 32, 48>}, {transform_indices = @transform_2, window_bounds = array<i64: 1, 2, 32, 1>}, {transform_indices = @transform_3, window_bounds = array<i64: 1, 64, 128>}]} {
    %c0 = arith.constant 0 : index
    %c0_0 = arith.constant 0 : index
    %c0_1 = arith.constant 0 : index
    %0 = vector.load %arg2[%c0, %c0_0, %c0_1] : memref<1x96x128xf32, #tpu.memory_space<vmem>>, vector<1x48x128xf32>
    %1 = vector.shape_cast %0 : vector<1x48x128xf32> to vector<48x128xf32>
    %c0_2 = arith.constant 0 : index
    %c0_3 = arith.constant 0 : index
    %c0_4 = arith.constant 0 : index
    %c0_5 = arith.constant 0 : index
    %2 = vector.load %arg3[%c0_2, %c0_3, %c0_4, %c0_5] : memref<1x2x32x48xf32, #tpu.memory_space<vmem>>, vector<1x1x32x48xf32>
    %3 = vector.shape_cast %2 : vector<1x1x32x48xf32> to vector<32x48xf32>
    %cst = arith.constant dense<0.000000e+00> : vector<32x128xf32>
    %4 = tpu.matmul %3, %1, %cst {dimension_numbers = #tpu.dot_dimension_numbers<[1], [0], [0], [1], [0, 0, 1, 1], [], []>} : vector<32x48xf32>, vector<48x128xf32>, vector<32x128xf32> -> vector<32x128xf32>
    %c0_6 = arith.constant 0 : index
    %c0_7 = arith.constant 0 : index
    %c0_8 = arith.constant 0 : index
    %c0_9 = arith.constant 0 : index
    %5 = vector.load %arg4[%c0_6, %c0_7, %c0_8, %c0_9] : memref<1x2x32x1xf32, #tpu.memory_space<vmem>>, vector<1x1x32x1xf32>
    %6 = vector.shape_cast %5 : vector<1x1x32x1xf32> to vector<32x1xf32>
    %7 = vector.broadcast %6 : vector<32x1xf32> to vector<32x128xf32>
    %8 = arith.addf %4, %7 : vector<32x128xf32>
    %c0_10 = arith.constant 0 : index
    %c0_11 = arith.constant 0 : index
    %c0_12 = arith.constant 0 : index
    %9 = vector.load %arg5[%c0_10, %c0_11, %c0_12] : memref<1x64x128xf32, #tpu.memory_space<vmem>>, vector<1x32x128xf32>
    %10 = vector.shape_cast %9 : vector<1x32x128xf32> to vector<32x128xf32>
    %11 = vector.shape_cast %8 : vector<32x128xf32> to vector<1x32x128xf32>
    tpu.vector_store %arg5[%c0_10, %c0_11, %c0_12], %11 {strides = array<i32>} : memref<1x64x128xf32, #tpu.memory_space<vmem>>, vector<1x32x128xf32>,
    %c0_13 = arith.constant 0 : index
    %c48 = arith.constant 48 : index
    %c0_14 = arith.constant 0 : index
    %12 = vector.load %arg2[%c0_13, %c48, %c0_14] : memref<1x96x128xf32, #tpu.memory_space<vmem>>, vector<1x48x128xf32>
    %13 = vector.shape_cast %12 : vector<1x48x128xf32> to vector<48x128xf32>
    %c0_15 = arith.constant 0 : index
    %c1 = arith.constant 1 : index
    %c0_16 = arith.constant 0 : index
    %c0_17 = arith.constant 0 : index
    %14 = vector.load %arg3[%c0_15, %c1, %c0_16, %c0_17] : memref<1x2x32x48xf32, #tpu.memory_space<vmem>>, vector<1x1x32x48xf32>
    %15 = vector.shape_cast %14 : vector<1x1x32x48xf32> to vector<32x48xf32>
    %cst_18 = arith.constant dense<0.000000e+00> : vector<32x128xf32>
    %16 = tpu.matmul %15, %13, %cst_18 {dimension_numbers = #tpu.dot_dimension_numbers<[1], [0], [0], [1], [0, 0, 1, 1], [], []>} : vector<32x48xf32>, vector<48x128xf32>, vector<32x128xf32> -> vector<32x128xf32>
    %c0_19 = arith.constant 0 : index
    %c1_20 = arith.constant 1 : index
    %c0_21 = arith.constant 0 : index
    %c0_22 = arith.constant 0 : index
    %17 = vector.load %arg4[%c0_19, %c1_20, %c0_21, %c0_22] : memref<1x2x32x1xf32, #tpu.memory_space<vmem>>, vector<1x1x32x1xf32>
    %18 = vector.shape_cast %17 : vector<1x1x32x1xf32> to vector<32x1xf32>
    %19 = vector.broadcast %18 : vector<32x1xf32> to vector<32x128xf32>
    %20 = arith.addf %16, %19 : vector<32x128xf32>
    %c0_23 = arith.constant 0 : index
    %c32 = arith.constant 32 : index
    %c0_24 = arith.constant 0 : index
    %21 = vector.load %arg5[%c0_23, %c32, %c0_24] : memref<1x64x128xf32, #tpu.memory_space<vmem>>, vector<1x32x128xf32>
    %22 = vector.shape_cast %21 : vector<1x32x128xf32> to vector<32x128xf32>
    %23 = vector.shape_cast %20 : vector<32x128xf32> to vector<1x32x128xf32>
    tpu.vector_store %arg5[%c0_23, %c32, %c0_24], %23 {strides = array<i32>} : memref<1x64x128xf32, #tpu.memory_space<vmem>>, vector<1x32x128xf32>,
    return
  }
  func.func @transform_0(%arg0: i32, %arg1: i32) -> (i32, i32, i32) {
    %c0_i32 = arith.constant 0 : i32
    %c0_i32_0 = arith.constant 0 : i32
    return %arg0, %c0_i32, %arg1 : i32, i32, i32
  }
  func.func @transform_1(%arg0: i32, %arg1: i32) -> (i32, i32, i32, i32) {
    %c0_i32 = arith.constant 0 : i32
    %c0_i32_0 = arith.constant 0 : i32
    %c0_i32_1 = arith.constant 0 : i32
    %c0_i32_2 = arith.constant 0 : i32
    return %arg0, %c0_i32, %c0_i32_0, %c0_i32_1 : i32, i32, i32, i32
  }
  func.func @transform_2(%arg0: i32, %arg1: i32) -> (i32, i32, i32, i32) {
    %c0_i32 = arith.constant 0 : i32
    %c0_i32_0 = arith.constant 0 : i32
    %c0_i32_1 = arith.constant 0 : i32
    %c0_i32_2 = arith.constant 0 : i32
    return %arg0, %c0_i32, %c0_i32_0, %c0_i32_1 : i32, i32, i32, i32
  }
  func.func @transform_3(%arg0: i32, %arg1: i32) -> (i32, i32, i32) {
    %c0_i32 = arith.constant 0 : i32
    %c0_i32_0 = arith.constant 0 : i32
    return %arg0, %c0_i32, %arg1 : i32, i32, i32
  }
}

module attributes {stable_mosaic.version = 11 : i64} {
  func.func @kernel(%arg0: i32, %arg1: i32, %arg2: memref<1x32x512xf32, #tpu.memory_space<vmem>>, %arg3: memref<1x1x32x32xf32, #tpu.memory_space<vmem>>, %arg4: memref<1x1x32x1xf32, #tpu.memory_space<vmem>>, %arg5: memref<1x32x512xf32, #tpu.memory_space<vmem>>) attributes {dimension_semantics = [#tpu.dimension_semantics<parallel>, #tpu.dimension_semantics<parallel>], iteration_bounds = array<i64: 1, 1>, scalar_prefetch = 0 : i64, scratch_operands = 0 : i64, tpu.core_type = #tpu.core_type<tc>, window_params = [{transform_indices = @transform_0, window_bounds = array<i64: 1, 32, 512>}, {transform_indices = @transform_1, window_bounds = array<i64: 1, 1, 32, 32>}, {transform_indices = @transform_2, window_bounds = array<i64: 1, 1, 32, 1>}, {transform_indices = @transform_3, window_bounds = array<i64: 1, 32, 512>}]} {
    %c0 = arith.constant 0 : index
    %c0_0 = arith.constant 0 : index
    %c0_1 = arith.constant 0 : index
    %0 = vector.load %arg2[%c0, %c0_0, %c0_1] : memref<1x32x512xf32, #tpu.memory_space<vmem>>, vector<1x32x512xf32>
    %1 = vector.shape_cast %0 : vector<1x32x512xf32> to vector<32x512xf32>
    %c0_2 = arith.constant 0 : index
    %c0_3 = arith.constant 0 : index
    %c0_4 = arith.constant 0 : index
    %c0_5 = arith.constant 0 : index
    %2 = vector.load %arg3[%c0_2, %c0_3, %c0_4, %c0_5] : memref<1x1x32x32xf32, #tpu.memory_space<vmem>>, vector<1x1x32x32xf32>
    %3 = vector.shape_cast %2 : vector<1x1x32x32xf32> to vector<32x32xf32>
    %cst = arith.constant dense<0.000000e+00> : vector<32x512xf32>
    %4 = tpu.matmul %3, %1, %cst {dimension_numbers = #tpu.dot_dimension_numbers<[1], [0], [0], [1], [0, 0, 1, 1], [], []>} : vector<32x32xf32>, vector<32x512xf32>, vector<32x512xf32> -> vector<32x512xf32>
    %c0_6 = arith.constant 0 : index
    %c0_7 = arith.constant 0 : index
    %c0_8 = arith.constant 0 : index
    %c0_9 = arith.constant 0 : index
    %5 = vector.load %arg4[%c0_6, %c0_7, %c0_8, %c0_9] : memref<1x1x32x1xf32, #tpu.memory_space<vmem>>, vector<1x1x32x1xf32>
    %6 = vector.shape_cast %5 : vector<1x1x32x1xf32> to vector<32x1xf32>
    %7 = vector.broadcast %6 : vector<32x1xf32> to vector<32x512xf32>
    %8 = arith.addf %4, %7 : vector<32x512xf32>
    %c0_10 = arith.constant 0 : index
    %c0_11 = arith.constant 0 : index
    %c0_12 = arith.constant 0 : index
    %9 = vector.load %arg5[%c0_10, %c0_11, %c0_12] : memref<1x32x512xf32, #tpu.memory_space<vmem>>, vector<1x32x512xf32>
    %10 = vector.shape_cast %9 : vector<1x32x512xf32> to vector<32x512xf32>
    %11 = vector.shape_cast %8 : vector<32x512xf32> to vector<1x32x512xf32>
    tpu.vector_store %arg5[%c0_10, %c0_11, %c0_12], %11 {strides = array<i32>} : memref<1x32x512xf32, #tpu.memory_space<vmem>>, vector<1x32x512xf32>,
    return
  }
  func.func @transform_0(%arg0: i32, %arg1: i32) -> (i32, i32, i32) {
    %c0_i32 = arith.constant 0 : i32
    %c0_i32_0 = arith.constant 0 : i32
    return %arg0, %c0_i32, %arg1 : i32, i32, i32
  }
  func.func @transform_1(%arg0: i32, %arg1: i32) -> (i32, i32, i32, i32) {
    %c0_i32 = arith.constant 0 : i32
    %c0_i32_0 = arith.constant 0 : i32
    %c0_i32_1 = arith.constant 0 : i32
    %c0_i32_2 = arith.constant 0 : i32
    return %arg0, %c0_i32, %c0_i32_0, %c0_i32_1 : i32, i32, i32, i32
  }
  func.func @transform_2(%arg0: i32, %arg1: i32) -> (i32, i32, i32, i32) {
    %c0_i32 = arith.constant 0 : i32
    %c0_i32_0 = arith.constant 0 : i32
    %c0_i32_1 = arith.constant 0 : i32
    %c0_i32_2 = arith.constant 0 : i32
    return %arg0, %c0_i32, %c0_i32_0, %c0_i32_1 : i32, i32, i32, i32
  }
  func.func @transform_3(%arg0: i32, %arg1: i32) -> (i32, i32, i32) {
    %c0_i32 = arith.constant 0 : i32
    %c0_i32_0 = arith.constant 0 : i32
    return %arg0, %c0_i32, %arg1 : i32, i32, i32
  }
}

module attributes {stable_mosaic.version = 11 : i64} {
  func.func @kernel(%arg0: i32, %arg1: i32, %arg2: memref<1x8x2048xf32, #tpu.memory_space<vmem>>, %arg3: memref<1x1x8x8xf32, #tpu.memory_space<vmem>>, %arg4: memref<1x1x8x1xf32, #tpu.memory_space<vmem>>, %arg5: memref<1x8x2048xf32, #tpu.memory_space<vmem>>) attributes {dimension_semantics = [#tpu.dimension_semantics<parallel>, #tpu.dimension_semantics<parallel>], iteration_bounds = array<i64: 1, 1>, scalar_prefetch = 0 : i64, scratch_operands = 0 : i64, tpu.core_type = #tpu.core_type<tc>, window_params = [{transform_indices = @transform_0, window_bounds = array<i64: 1, 8, 2048>}, {transform_indices = @transform_1, window_bounds = array<i64: 1, 1, 8, 8>}, {transform_indices = @transform_2, window_bounds = array<i64: 1, 1, 8, 1>}, {transform_indices = @transform_3, window_bounds = array<i64: 1, 8, 2048>}]} {
    %c0 = arith.constant 0 : index
    %c0_0 = arith.constant 0 : index
    %c0_1 = arith.constant 0 : index
    %0 = vector.load %arg2[%c0, %c0_0, %c0_1] : memref<1x8x2048xf32, #tpu.memory_space<vmem>>, vector<1x8x2048xf32>
    %1 = vector.shape_cast %0 : vector<1x8x2048xf32> to vector<8x2048xf32>
    %c0_2 = arith.constant 0 : index
    %c0_3 = arith.constant 0 : index
    %c0_4 = arith.constant 0 : index
    %c0_5 = arith.constant 0 : index
    %2 = vector.load %arg3[%c0_2, %c0_3, %c0_4, %c0_5] : memref<1x1x8x8xf32, #tpu.memory_space<vmem>>, vector<1x1x8x8xf32>
    %3 = vector.shape_cast %2 : vector<1x1x8x8xf32> to vector<8x8xf32>
    %cst = arith.constant dense<0.000000e+00> : vector<8x2048xf32>
    %4 = tpu.matmul %3, %1, %cst {dimension_numbers = #tpu.dot_dimension_numbers<[1], [0], [0], [1], [0, 0, 1, 1], [], []>} : vector<8x8xf32>, vector<8x2048xf32>, vector<8x2048xf32> -> vector<8x2048xf32>
    %c0_6 = arith.constant 0 : index
    %c0_7 = arith.constant 0 : index
    %c0_8 = arith.constant 0 : index
    %c0_9 = arith.constant 0 : index
    %5 = vector.load %arg4[%c0_6, %c0_7, %c0_8, %c0_9] : memref<1x1x8x1xf32, #tpu.memory_space<vmem>>, vector<1x1x8x1xf32>
    %6 = vector.shape_cast %5 : vector<1x1x8x1xf32> to vector<8x1xf32>
    %7 = vector.broadcast %6 : vector<8x1xf32> to vector<8x2048xf32>
    %8 = arith.addf %4, %7 : vector<8x2048xf32>
    %c0_10 = arith.constant 0 : index
    %c0_11 = arith.constant 0 : index
    %c0_12 = arith.constant 0 : index
    %9 = vector.load %arg5[%c0_10, %c0_11, %c0_12] : memref<1x8x2048xf32, #tpu.memory_space<vmem>>, vector<1x8x2048xf32>
    %10 = vector.shape_cast %9 : vector<1x8x2048xf32> to vector<8x2048xf32>
    %11 = vector.shape_cast %8 : vector<8x2048xf32> to vector<1x8x2048xf32>
    tpu.vector_store %arg5[%c0_10, %c0_11, %c0_12], %11 {strides = array<i32>} : memref<1x8x2048xf32, #tpu.memory_space<vmem>>, vector<1x8x2048xf32>,
    return
  }
  func.func @transform_0(%arg0: i32, %arg1: i32) -> (i32, i32, i32) {
    %c0_i32 = arith.constant 0 : i32
    %c0_i32_0 = arith.constant 0 : i32
    return %arg0, %c0_i32, %arg1 : i32, i32, i32
  }
  func.func @transform_1(%arg0: i32, %arg1: i32) -> (i32, i32, i32, i32) {
    %c0_i32 = arith.constant 0 : i32
    %c0_i32_0 = arith.constant 0 : i32
    %c0_i32_1 = arith.constant 0 : i32
    %c0_i32_2 = arith.constant 0 : i32
    return %arg0, %c0_i32, %c0_i32_0, %c0_i32_1 : i32, i32, i32, i32
  }
  func.func @transform_2(%arg0: i32, %arg1: i32) -> (i32, i32, i32, i32) {
    %c0_i32 = arith.constant 0 : i32
    %c0_i32_0 = arith.constant 0 : i32
    %c0_i32_1 = arith.constant 0 : i32
    %c0_i32_2 = arith.constant 0 : i32
    return %arg0, %c0_i32, %c0_i32_0, %c0_i32_1 : i32, i32, i32, i32
  }
  func.func @transform_3(%arg0: i32, %arg1: i32) -> (i32, i32, i32) {
    %c0_i32 = arith.constant 0 : i32
    %c0_i32_0 = arith.constant 0 : i32
    return %arg0, %c0_i32, %arg1 : i32, i32, i32
  }
}

module attributes {stable_mosaic.version = 11 : i64} {
  func.func @kernel(%arg0: i32, %arg1: i32, %arg2: memref<1x2x2048xf32, #tpu.memory_space<vmem>>, %arg3: memref<1x1x5x2xf32, #tpu.memory_space<vmem>>, %arg4: memref<1x1x5x1xf32, #tpu.memory_space<vmem>>, %arg5: memref<1x5x2048xf32, #tpu.memory_space<vmem>>) attributes {dimension_semantics = [#tpu.dimension_semantics<parallel>, #tpu.dimension_semantics<parallel>], iteration_bounds = array<i64: 1, 4>, scalar_prefetch = 0 : i64, scratch_operands = 0 : i64, tpu.core_type = #tpu.core_type<tc>, window_params = [{transform_indices = @transform_0, window_bounds = array<i64: 1, 2, 2048>}, {transform_indices = @transform_1, window_bounds = array<i64: 1, 1, 5, 2>}, {transform_indices = @transform_2, window_bounds = array<i64: 1, 1, 5, 1>}, {transform_indices = @transform_3, window_bounds = array<i64: 1, 5, 2048>}]} {
    %c0 = arith.constant 0 : index
    %c0_0 = arith.constant 0 : index
    %c0_1 = arith.constant 0 : index
    %0 = vector.load %arg2[%c0, %c0_0, %c0_1] : memref<1x2x2048xf32, #tpu.memory_space<vmem>>, vector<1x2x2048xf32>
    %1 = vector.shape_cast %0 : vector<1x2x2048xf32> to vector<2x2048xf32>
    %c0_2 = arith.constant 0 : index
    %c0_3 = arith.constant 0 : index
    %c0_4 = arith.constant 0 : index
    %c0_5 = arith.constant 0 : index
    %2 = vector.load %arg3[%c0_2, %c0_3, %c0_4, %c0_5] : memref<1x1x5x2xf32, #tpu.memory_space<vmem>>, vector<1x1x5x2xf32>
    %3 = vector.shape_cast %2 : vector<1x1x5x2xf32> to vector<5x2xf32>
    %cst = arith.constant dense<0.000000e+00> : vector<5x2048xf32>
    %4 = tpu.matmul %3, %1, %cst {dimension_numbers = #tpu.dot_dimension_numbers<[1], [0], [0], [1], [0, 0, 1, 1], [], []>} : vector<5x2xf32>, vector<2x2048xf32>, vector<5x2048xf32> -> vector<5x2048xf32>
    %c0_6 = arith.constant 0 : index
    %c0_7 = arith.constant 0 : index
    %c0_8 = arith.constant 0 : index
    %c0_9 = arith.constant 0 : index
    %5 = vector.load %arg4[%c0_6, %c0_7, %c0_8, %c0_9] : memref<1x1x5x1xf32, #tpu.memory_space<vmem>>, vector<1x1x5x1xf32>
    %6 = vector.shape_cast %5 : vector<1x1x5x1xf32> to vector<5x1xf32>
    %7 = vector.broadcast %6 : vector<5x1xf32> to vector<5x2048xf32>
    %8 = arith.addf %4, %7 : vector<5x2048xf32>
    %c0_10 = arith.constant 0 : index
    %c0_11 = arith.constant 0 : index
    %c0_12 = arith.constant 0 : index
    %9 = vector.load %arg5[%c0_10, %c0_11, %c0_12] : memref<1x5x2048xf32, #tpu.memory_space<vmem>>, vector<1x5x2048xf32>
    %10 = vector.shape_cast %9 : vector<1x5x2048xf32> to vector<5x2048xf32>
    %11 = vector.shape_cast %8 : vector<5x2048xf32> to vector<1x5x2048xf32>
    tpu.vector_store %arg5[%c0_10, %c0_11, %c0_12], %11 {strides = array<i32>} : memref<1x5x2048xf32, #tpu.memory_space<vmem>>, vector<1x5x2048xf32>,
    return
  }
  func.func @transform_0(%arg0: i32, %arg1: i32) -> (i32, i32, i32) {
    %c0_i32 = arith.constant 0 : i32
    %c0_i32_0 = arith.constant 0 : i32
    return %arg0, %c0_i32, %arg1 : i32, i32, i32
  }
  func.func @transform_1(%arg0: i32, %arg1: i32) -> (i32, i32, i32, i32) {
    %c0_i32 = arith.constant 0 : i32
    %c0_i32_0 = arith.constant 0 : i32
    %c0_i32_1 = arith.constant 0 : i32
    %c0_i32_2 = arith.constant 0 : i32
    return %arg0, %c0_i32, %c0_i32_0, %c0_i32_1 : i32, i32, i32, i32
  }
  func.func @transform_2(%arg0: i32, %arg1: i32) -> (i32, i32, i32, i32) {
    %c0_i32 = arith.constant 0 : i32
    %c0_i32_0 = arith.constant 0 : i32
    %c0_i32_1 = arith.constant 0 : i32
    %c0_i32_2 = arith.constant 0 : i32
    return %arg0, %c0_i32, %c0_i32_0, %c0_i32_1 : i32, i32, i32, i32
  }
  func.func @transform_3(%arg0: i32, %arg1: i32) -> (i32, i32, i32) {
    %c0_i32 = arith.constant 0 : i32
    %c0_i32_0 = arith.constant 0 : i32
    return %arg0, %c0_i32, %arg1 : i32, i32, i32
  }
}

</mosaic_0001>

<bundles_post_ra>
// kernel: my_vit_forward.7
= control target key start
LH: loop header
LB: loop body
LE: loop exit
PB: predicated region body
PF: predicated region fallthrough
CT: control target
= control target key end

     0   :  { %s1363_s12 = smov 0   ;;  %s1365_s13 = smov 0   ;;  %s1571_s0 = inlined_call_operand.vmem [shape: f32[4,288,32], index: 0, kind: input, shape index: {}]   ;;  %s1572_s1 = inlined_call_operand.vmem [shape: f32[4,3,64,96], index: 1, kind: input, shape index: {}]   ;;  %s1573_s2 = inlined_call_operand.vmem [shape: f32[4,3,64,1], index: 2, kind: input, shape index: {}]   ;;  %s1574_s3 = inlined_call_operand.vmem [shape: f32[4,192,32], index: 3, kind: output, shape index: {}]  }
   0x1   :  { %s1367_s14 = smov 0  }
   0x2 LB: > { %s25_s15 = sadd.s32 1, %s1336_s13  ;;  %p974_p0 = scmp.ge.s32.totalorder %s1340_s14, 1  ;;  %s1340_s14 = sphi %s1367_s14, %s13_s14   ;;  %s1336_s13 = sphi %s1365_s13, %s1576_s13   ;;  %s1332_s12 = sphi %s1363_s12, %s1575_s12  }
   0x3   : > { %p27_p1 = scmp.ge.s32.totalorder %s25_s15, 4  ;;  %p176_p2 = scmp.lt.s32.totalorder %s1340_s14, 5 }
   0x5   : > { %s1578_s15 = smov (%p27_p1, %s25_s15), 0  ;;  %p177_p3 = pnand %p974_p0, %p176_p2 }
   0x6   : > { %p216_p4 = scmp.lt.s32.totalorder (!%p177_p3), %s1332_s12, 3  ;;  %v1342_v0 = vmov (!%p177_p3), 0   ;;  %vm310_vm0 = vcmask (!%p177_p3), 785408   ;;  %vm440_vm1 = vcmask (!%p177_p3), 261120  }
   0x7   : > { %180 = sbr.rel (%p177_p3) target bundleno = 290 (0x122), region = 32  ;;  %1317 = vset.pattern.permute.xlu1 (!%p177_p3), %v1342_v0  ;;  %1316 = vset.pattern.permute.xlu0 (!%p177_p3), %v1342_v0 }
   0xe   : > { %s1580_s12 = smov (!%p216_p4, %s1332_s12), 3 }
   0xf   : > { %s1289_s16 = smul.u32 288, %s1580_s12 }
  0x10   : > { %s1392_s20 = smul.u32 192, %s1580_s12 }
  0x11   : > { %s1384_s19 = scalar_lea.vmem %s1571_s0, %s1289_s16 }
  0x12   : > { %v242_v1 = vld [vmem:[%s1384_s19] sm:$0xff]  ;;  %v243_v2 = vld [vmem:[%s1384_s19 + $0x8] sm:$0xff]  ;;  %v244_v6 = vld [vmem:[%s1384_s19 + $0x10] sm:$0xff]  ;;  %s1404_s23 = scalar_lea.vmem %s1572_s1, %s1392_s20  ;;  %s1426_s26 = scalar_lea.vmem %s1573_s2, %s1392_s20 }
  0x13   : > { %v449_v3 = vld [vmem:[%s1384_s19 + $0x60] sm:$0xff]  ;;  %v1205_v4 = vpack.c.bf16 %v243_v2, %v242_v1  ;;  %v450_v5 = vld [vmem:[%s1384_s19 + $0x68] sm:$0xff]  ;;  %v245_v7 = vld [vmem:[%s1384_s19 + $0x18] sm:$0xff]  ;;  %s1512_s29 = scalar_lea.vmem %s1574_s3, %s1392_s20 }
  0x14   : > { %v1229_v8 = vpack.c.bf16 %v450_v5, %v449_v3  ;;  %v1209_v9 = vpack.c.bf16 %v245_v7, %v244_v6  ;;  %v451_v10 = vld [vmem:[%s1384_s19 + $0x70] sm:$0xff]  ;;  %v452_v11 = vld [vmem:[%s1384_s19 + $0x78] sm:$0xff]  ;;  %v246_v12 = vld [vmem:[%s1384_s19 + $0x20] sm:$0xff] }
  0x15   : > { %1206 = vmatprep.subr.bf16.mxu0 %v1205_v4  ;;  %v1233_v13 = vpack.c.bf16 %v452_v11, %v451_v10  ;;  %v247_v14 = vld [vmem:[%s1384_s19 + $0x28] sm:$0xff]  ;;  %v453_v15 = vld [vmem:[%s1384_s19 + $0x80] sm:$0xff]  ;;  %v248_v19 = vld [vmem:[%s1384_s19 + $0x30] sm:$0xff] }
  0x16   : > { %v454_v16 = vld [vmem:[%s1384_s19 + $0x88] sm:$0xff]  ;;  %1230 = vmatprep.subr.bf16.mxu1 %v1229_v8  ;;  %1208 = vmatpush3.bf16.msra.mxu0 %v1205_v4  ;;  %v1213_v17 = vpack.c.bf16 %v247_v14, %v246_v12  ;;  %v249_v20 = vld [vmem:[%s1384_s19 + $0x38] sm:$0xff]  ;;  %v455_v21 = vld [vmem:[%s1384_s19 + $0x90] sm:$0xff] }
  0x17   : > { %1232 = vmatpush3.bf16.msra.mxu1 %v1229_v8  ;;  %1210 = vmatprep.subr.bf16.mxu0 %v1209_v9  ;;  %v1237_v18 = vpack.c.bf16 %v454_v16, %v453_v15  ;;  %v456_v22 = vld [vmem:[%s1384_s19 + $0x98] sm:$0xff]  ;;  %v254_v23 = vld [vmem:[%s1404_s23] sm:$0xff]  ;;  %v1217_v25 = vpack.c.bf16 %v249_v20, %v248_v19  ;;  %v251_v28 = vld [vmem:[%s1384_s19 + $0x48] sm:$0xff] }
  0x18   : > { %1234 = vmatprep.subr.bf16.mxu1 %v1233_v13  ;;  %v987_v24 = vld [vmem:[%s1404_s23 + $0x40] sm:$0xff]  ;;  %v1241_v26 = vpack.c.bf16 %v456_v22, %v455_v21  ;;  %1121 = vmatprep.mubr.msk.f32.mxu0 %vm310_vm0, %v254_v23  ;;  %v458_v30 = vld [vmem:[%s1384_s19 + $0xa8] sm:$0xff]  ;;  %v252_v33 = vld [vmem:[%s1384_s19 + $0x50] sm:$0xff] }
  0x19   : > { %v250_v27 = vld [vmem:[%s1384_s19 + $0x40] sm:$0xff]  ;;  %1157 = vmatprep.mubr.msk.f32.mxu1 %vm310_vm0, %v987_v24  ;;  %v253_v34 = vld [vmem:[%s1384_s19 + $0x58] sm:$0xff]  ;;  %v459_v35 = vld [vmem:[%s1384_s19 + $0xb0] sm:$0xff] }
  0x1a   : > { %1212 = vmatpush3.bf16.msra.mxu0 %v1209_v9  ;;  %v457_v29 = vld [vmem:[%s1384_s19 + $0xa0] sm:$0xff]  ;;  %v1221_v31 = vpack.c.bf16 %v251_v28, %v250_v27  ;;  %v460_v36 = vld [vmem:[%s1384_s19 + $0xb8] sm:$0xff]  ;;  %v1225_v37 = vpack.c.bf16 %v253_v34, %v252_v33  ;;  %v657_v40 = vld [vmem:[%s1384_s19 + $0xc8] sm:$0xff] }
  0x1b   : > { %1236 = vmatpush3.bf16.msra.mxu1 %v1233_v13  ;;  %1214 = vmatprep.subr.bf16.mxu0 %v1213_v17  ;;  %v1245_v32 = vpack.c.bf16 %v458_v30, %v457_v29  ;;  %v1249_v38 = vpack.c.bf16 %v460_v36, %v459_v35  ;;  %v656_v39 = vld [vmem:[%s1384_s19 + $0xc0] sm:$0xff]  ;;  %v264_v41 = vld [vmem:[%s1426_s26 + $0x10] sm:$0xff]  ;;  %v265_v43 = vld [vmem:[%s1426_s26 + $0x18] sm:$0xff] }
  0x1c   : > { %1238 = vmatprep.subr.bf16.mxu1 %v1237_v18  ;;  %282 = vperm.xlu1 %1317, %v264_v41   ;;  %v262_v42 = vld [vmem:[%s1426_s26] sm:$0xff]  ;;  %v1253_v44 = vpack.c.bf16 %v657_v40, %v656_v39  ;;  %v263_v45 = vld [vmem:[%s1426_s26 + $0x8] sm:$0xff]  ;;  %v658_v46 = vld [vmem:[%s1384_s19 + $0xd0] sm:$0xff] }
  0x1d   : > { %272 = vperm.xlu0 %1316, %v262_v42   ;;  %v659_v47 = vld [vmem:[%s1384_s19 + $0xd8] sm:$0xff]  ;;  %v255_v48 = vld [vmem:[%s1404_s23 + $0x8] sm:$0xff]  ;;  %v256_v51 = vld [vmem:[%s1404_s23 + $0x10] sm:$0xff] }
  0x1e   : > { %1216 = vmatpush3.bf16.msra.mxu0 %v1213_v17  ;;  %v267_v49 = vld [vmem:[%s1426_s26 + $0x28] sm:$0xff]  ;;  %v1257_v52 = vpack.c.bf16 %v659_v47, %v658_v46  ;;  %v989_v53 = vld [vmem:[%s1404_s23 + $0x50] sm:$0xff]  ;;  %v660_v54 = vld [vmem:[%s1384_s19 + $0xe0] sm:$0xff] }
  0x1f   : > { %1240 = vmatpush3.bf16.msra.mxu1 %v1237_v18  ;;  %1218 = vmatprep.subr.bf16.mxu0 %v1217_v25  ;;  %v988_v50 = vld [vmem:[%s1404_s23 + $0x48] sm:$0xff]  ;;  %v257_v56 = vld [vmem:[%s1404_s23 + $0x18] sm:$0xff]  ;;  %v258_v58 = vld [vmem:[%s1404_s23 + $0x20] sm:$0xff] }
  0x20   : > { %1242 = vmatprep.subr.bf16.mxu1 %v1241_v26  ;;  %287 = vperm.xlu1 %1317, %v265_v43   ;;  %v661_v55 = vld [vmem:[%s1384_s19 + $0xe8] sm:$0xff]  ;;  %v990_v57 = vld [vmem:[%s1404_s23 + $0x58] sm:$0xff]  ;;  %v991_v60 = vld [vmem:[%s1404_s23 + $0x60] sm:$0xff] }
  0x21   : > { %277 = vperm.xlu0 %1316, %v263_v45   ;;  %v1261_v59 = vpack.c.bf16 %v661_v55, %v660_v54  ;;  %v662_v61 = vld [vmem:[%s1384_s19 + $0xf0] sm:$0xff]  ;;  %v663_v62 = vld [vmem:[%s1384_s19 + $0xf8] sm:$0xff]  ;;  %v259_v63 = vld [vmem:[%s1404_s23 + $0x28] sm:$0xff] }
  0x22   : > { %1220 = vmatpush3.bf16.msra.mxu0 %v1217_v25  ;;  %v992_v0 = vld [vmem:[%s1404_s23 + $0x68] sm:$0xff]  ;;  %v260_v1 = vld [vmem:[%s1404_s23 + $0x30] sm:$0xff]  ;;  %v1265_v2 = vpack.c.bf16 %v663_v62, %v662_v61  ;;  %v664_v3 = vld [vmem:[%s1384_s19 + $0x100] sm:$0xff] }
  0x23   : > { %1244 = vmatpush3.bf16.msra.mxu1 %v1241_v26  ;;  %1222 = vmatprep.subr.bf16.mxu0 %v1221_v31  ;;  %v665_v4 = vld [vmem:[%s1384_s19 + $0x108] sm:$0xff]  ;;  %v993_v5 = vld [vmem:[%s1404_s23 + $0x70] sm:$0xff]  ;;  %v261_v6 = vld [vmem:[%s1404_s23 + $0x38] sm:$0xff] }
  0x24   : > { %1246 = vmatprep.subr.bf16.mxu1 %v1245_v32  ;;  %297 = vperm.xlu1 %1317, %v267_v49   ;;  %v994_v7 = vld [vmem:[%s1404_s23 + $0x78] sm:$0xff]  ;;  %v1269_v8 = vpack.c.bf16 %v665_v4, %v664_v3  ;;  %v666_v9 = vld [vmem:[%s1384_s19 + $0x110] sm:$0xff]  ;;  %v1011_v11 = vld [vmem:[%s1404_s23 + $0x80] sm:$0xff] }
  0x25   : > { %v667_v10 = vld [vmem:[%s1384_s19 + $0x118] sm:$0xff]  ;;  %v1015_v12 = vld [vmem:[%s1404_s23 + $0xa0] sm:$0xff]  ;;  %v268_v16 = vld [vmem:[%s1426_s26 + $0x30] sm:$0xff] }
  0x26   : > { %1224 = vmatpush3.bf16.msra.mxu0 %v1221_v31  ;;  %v266_v13 = vld [vmem:[%s1426_s26 + $0x20] sm:$0xff]  ;;  %v1273_v14 = vpack.c.bf16 %v667_v10, %v666_v9  ;;  %v269_v15 = vld [vmem:[%s1426_s26 + $0x38] sm:$0xff]  ;;  %v996_v17 = vld [vmem:[%s1426_s26 + $0x48] sm:$0xff] }
  0x27   : > { %1248 = vmatpush3.bf16.msra.mxu1 %v1245_v32  ;;  %1226 = vmatprep.subr.bf16.mxu0 %v1225_v37  ;;  %v1012_v18 = vld [vmem:[%s1404_s23 + $0x88] sm:$0xff]  ;;  %v995_v19 = vld [vmem:[%s1426_s26 + $0x40] sm:$0xff]  ;;  %v1013_v21 = vld [vmem:[%s1404_s23 + $0x90] sm:$0xff] }
  0x28   : > { %1250 = vmatprep.subr.bf16.mxu1 %v1249_v38  ;;  %292 = vperm.xlu0 %1316, %v266_v13   ;;  %v1016_v20 = vld [vmem:[%s1404_s23 + $0xa8] sm:$0xff]  ;;  %v1017_v22 = vld [vmem:[%s1404_s23 + $0xb0] sm:$0xff]  ;;  %v998_v23 = vld [vmem:[%s1426_s26 + $0x58] sm:$0xff] }
  0x29   : > { %307 = vperm.xlu1 %1317, %v269_v15   ;;  %v1014_v24 = vld [vmem:[%s1404_s23 + $0x98] sm:$0xff]  ;;  %v997_v25 = vld [vmem:[%s1426_s26 + $0x50] sm:$0xff]  ;;  %v1000_v27 = vld [vmem:[%s1426_s26 + $0x68] sm:$0xff] }
  0x2a   : > { %1228 = vmatpush3.bf16.msra.mxu0 %v1225_v37  ;;  %v1018_v26 = vld [vmem:[%s1404_s23 + $0xb8] sm:$0xff]  ;;  %v999_v28 = vld [vmem:[%s1426_s26 + $0x60] sm:$0xff]  ;;  %v1001_v30 = vld [vmem:[%s1426_s26 + $0x70] sm:$0xff] }
  0x2b   : > { %1252 = vmatpush3.bf16.msra.mxu1 %v1249_v38  ;;  %1254 = vmatprep.subr.bf16.mxu0 %v1253_v44  ;;  %v1002_v29 = vld [vmem:[%s1426_s26 + $0x78] sm:$0xff]  ;;  %v1020_v31 = vld [vmem:[%s1426_s26 + $0x88] sm:$0xff]  ;;  %v1019_v32 = vld [vmem:[%s1426_s26 + $0x80] sm:$0xff] }
  0x2c   : > { %1277 = vmatprep.subr.bf16.mxu1 %v1253_v44  ;;  %302 = vperm.xlu0 %1316, %v268_v16   ;;  %v1022_v33 = vld [vmem:[%s1426_s26 + $0x98] sm:$0xff]  ;;  %v1021_v34 = vld [vmem:[%s1426_s26 + $0x90] sm:$0xff]  ;;  %v1024_v35 = vld [vmem:[%s1426_s26 + $0xa8] sm:$0xff] }
  0x2d   : > { %1122 = vmatmul.mubr.msk.f32.vlgmr.msra.gmra.mrb[0].mxu0 %vm310_vm0, %v255_v48  ;;  %486 = vperm.xlu1 %1317, %v996_v17   ;;  %v1023_v36 = vld [vmem:[%s1426_s26 + $0xa0] sm:$0xff]  ;;  %v1026_v37 = vld [vmem:[%s1426_s26 + $0xb8] sm:$0xff]  ;;  %v1025_v38 = vld [vmem:[%s1426_s26 + $0xb0] sm:$0xff] }
  0x2e   : > { %1158 = vmatmul.mubr.msk.f32.vlgmr.msra.gmra.mrb[0].mxu1 %vm310_vm0, %v988_v50  ;;  %1256 = vmatpush3.bf16.msra.mxu0 %v1253_v44 }
  0x2f   : > { %1283 = vmatpush3.bf16.msra.mxu1 %v1253_v44  ;;  %1124 = vmatprep.mubr.msk.f32.mxu0 %vm310_vm0, %v256_v51 }
  0x30   : > { %1160 = vmatprep.mubr.msk.f32.mxu1 %vm310_vm0, %v989_v53  ;;  %1258 = vmatprep.subr.bf16.mxu0 %v1257_v52 }
  0x31   : > { %1125 = vmatmul.mubr.msk.f32.gmra.mrb[2].mxu0 %vm310_vm0, %v257_v56  ;;  %1278 = vmatprep.subr.bf16.mxu1 %v1257_v52 }
  0x32   : > { %1161 = vmatmul.mubr.msk.f32.gmra.mrb[2].mxu1 %vm310_vm0, %v990_v57  ;;  %1260 = vmatpush3.bf16.msra.mxu0 %v1257_v52 }
  0x33   : > { %1284 = vmatpush3.bf16.msra.mxu1 %v1257_v52  ;;  %1127 = vmatprep.mubr.msk.f32.mxu0 %vm310_vm0, %v258_v58 }
  0x34   : > { %1163 = vmatprep.mubr.msk.f32.mxu1 %vm310_vm0, %v991_v60  ;;  %1262 = vmatprep.subr.bf16.mxu0 %v1261_v59 }
  0x35   : > { %1128 = vmatmul.mubr.msk.f32.gmra.mrb[4].mxu0 %vm310_vm0, %v259_v63  ;;  %1279 = vmatprep.subr.bf16.mxu1 %v1261_v59 }
  0x36   : > { %1164 = vmatmul.mubr.msk.f32.gmra.mrb[4].mxu1 %vm310_vm0, %v992_v0  ;;  %1264 = vmatpush3.bf16.msra.mxu0 %v1261_v59 }
  0x37   : > { %1285 = vmatpush3.bf16.msra.mxu1 %v1261_v59  ;;  %1130 = vmatprep.mubr.msk.f32.mxu0 %vm310_vm0, %v260_v1 }
  0x38   : > { %1166 = vmatprep.mubr.msk.f32.mxu1 %vm310_vm0, %v993_v5  ;;  %1266 = vmatprep.subr.bf16.mxu0 %v1265_v2 }
  0x39   : > { %1131 = vmatmul.mubr.msk.f32.gmra.mrb[6].mxu0 %vm310_vm0, %v261_v6  ;;  %1280 = vmatprep.subr.bf16.mxu1 %v1265_v2 }
  0x3a   : > { %1167 = vmatmul.mubr.msk.f32.gmra.mrb[6].mxu1 %vm310_vm0, %v994_v7  ;;  %1268 = vmatpush3.bf16.msra.mxu0 %v1265_v2 }
  0x3b   : > { %1286 = vmatpush3.bf16.msra.mxu1 %v1265_v2  ;;  %1270 = vmatprep.subr.bf16.mxu0 %v1269_v8 }
  0x3c   : > { %1281 = vmatprep.subr.bf16.mxu1 %v1269_v8  ;;  %1193 = vmatprep.mubr.msk.f32.mxu0 %vm310_vm0, %v1011_v11 }
  0x3d   : > { %1199 = vmatprep.mubr.msk.f32.mxu1 %vm310_vm0, %v1015_v12  ;;  %481 = vperm.xlu0 %1316, %v995_v19  }
  0x3e   : > { %1272 = vmatpush3.bf16.msra.mxu0 %v1269_v8  ;;  %496 = vperm.xlu1 %1317, %v998_v23  }
  0x3f   : > { %1287 = vmatpush3.bf16.msra.mxu1 %v1269_v8  ;;  %1274 = vmatprep.subr.bf16.mxu0 %v1273_v14 }
  0x40   : > { %1282 = vmatprep.subr.bf16.mxu1 %v1273_v14 }
  0x41   : > { %491 = vperm.xlu0 %1316, %v997_v25  }
  0x42   : > { %1276 = vmatpush3.bf16.msra.mxu0 %v1273_v14  ;;  %506 = vperm.xlu1 %1317, %v1000_v27  }
  0x43   : > { %1288 = vmatpush3.bf16.msra.mxu1 %v1273_v14 }
  0x45   : > { %1194 = vmatmul.mubr.msk.f32.vlgmr.msra.gmra.mrb[8].mxu0 %vm310_vm0, %v1012_v18  ;;  %501 = vperm.xlu0 %1316, %v999_v28  }
  0x46   : > { %1200 = vmatmul.mubr.msk.f32.vlgmr.msra.gmra.mrb[8].mxu1 %vm310_vm0, %v1016_v20  ;;  %1196 = vmatprep.mubr.msk.f32.mxu0 %vm310_vm0, %v1013_v21 }
  0x47   : > { %1202 = vmatprep.mubr.msk.f32.mxu1 %vm310_vm0, %v1017_v22  ;;  %516 = vperm.xlu1 %1317, %v1002_v29  }
  0x49   : > { %1197 = vmatmul.mubr.msk.f32.gmra.mrb[10].mxu0 %vm310_vm0, %v1014_v24  ;;  %511 = vperm.xlu0 %1316, %v1001_v30  }
  0x4a   : > { %1203 = vmatmul.mubr.msk.f32.gmra.mrb[10].mxu1 %vm310_vm0, %v1018_v26 }
  0x4b   : > { %693 = vperm.xlu1 %1317, %v1020_v31  }
  0x4d   : > { %688 = vperm.xlu0 %1316, %v1019_v32  }
  0x4f   : > { %703 = vperm.xlu1 %1317, %v1022_v33  }
  0x51   : > { %698 = vperm.xlu0 %1316, %v1021_v34  }
  0x53   : > { %713 = vperm.xlu1 %1317, %v1024_v35  }
  0x55   : > { %708 = vperm.xlu0 %1316, %v1023_v36  }
  0x57   : > { %723 = vperm.xlu1 %1317, %v1026_v37  }
  0x59   : > { %718 = vperm.xlu0 %1316, %v1025_v38  }
  0x9b   : > { %v283_v39 = vpop.permute.xlu1 %282 }
  0x9c   : > { %v273_v40 = vpop.permute.xlu0 %272 }
  0x9f   : > { %v288_v41 = vpop.permute.xlu1 %287 }
  0xa0   : > { %v278_v42 = vpop.permute.xlu0 %277 }
  0xa3   : > { %v298_v43 = vpop.permute.xlu1 %297 }
  0xa7   : > { %v293_v44 = vpop.permute.xlu0 %292 }
  0xa8   : > { %v308_v45 = vpop.permute.xlu1 %307 }
  0xab   : > { %v303_v46 = vpop.permute.xlu0 %302 }
  0xac   : > { %v487_v47 = vpop.permute.xlu1 %486 }
  0xbc   : > { %v482_v48 = vpop.permute.xlu0 %481 }
  0xbd   : > { %v497_v49 = vpop.permute.xlu1 %496 }
  0xc0   : > { %v492_v50 = vpop.permute.xlu0 %491 }
  0xc1   : > { %v507_v51 = vpop.permute.xlu1 %506 }
  0xc4   : > { %v502_v52 = vpop.permute.xlu0 %501 }
  0xc6   : > { %v517_v61 = vpop.permute.xlu1 %516 }
  0xc8   : > { %v512_v2 = vpop.permute.xlu0 %511 }
  0xca   : > { %v694_v11 = vpop.permute.xlu1 %693 }
  0xcc   : > { %v689_v16 = vpop.permute.xlu0 %688 }
  0xce   : > { %v704_v25 = vpop.permute.xlu1 %703 }
  0xd0   : > { %v699_v26 = vpop.permute.xlu0 %698 }
  0xd2   : > { %v714_v27 = vpop.permute.xlu1 %713 }
  0xd4   : > { %v709_v28 = vpop.permute.xlu0 %708 }
  0xd6   : > { %v724_v37 = vpop.permute.xlu1 %723 }
 0x100   : > { %v1123_v53 = vpop.f32.mrb[0].mxu0 }
 0x101   : > { %v407_v54 = vadd.f32 %v1123_v53, %v278_v42  ;;  %v1159_v55 = vpop.f32.mrb[0].mxu1  ;;  %v401_v56 = vpop.f32.mrb[1].mxu0 }
 0x102   : > { %v615_v57 = vadd.f32 %v1159_v55, %v487_v47  ;;  %v402_v58 = vadd.f32 %v401_v56, %v273_v40  ;;  %v609_v59 = vpop.f32.mrb[1].mxu1  ;;  %v719_v42 = vpop.permute.xlu0 %718 }
 0x103   : > { %442 = vst.msk [vmem:[%s1512_s29 + $0x8] sm:$0xff] %vm440_vm1, %v407_v54  ;;  %v610_v60 = vadd.f32 %v609_v59, %v482_v48 }
 0x104   : > { %649 = vst.msk [vmem:[%s1512_s29 + $0x48] sm:$0xff] %vm440_vm1, %v615_v57  ;;  %441 = vst.msk [vmem:[%s1512_s29] sm:$0xff] %vm440_vm1, %v402_v58  ;;  %v1126_v62 = vpop.f32.mrb[2].mxu0 }
 0x105   : > { %648 = vst.msk [vmem:[%s1512_s29 + $0x40] sm:$0xff] %vm440_vm1, %v610_v60  ;;  %v417_v63 = vadd.f32 %v1126_v62, %v288_v41  ;;  %v1162_v0 = vpop.f32.mrb[2].mxu1  ;;  %v411_v1 = vpop.f32.mrb[3].mxu0 }
 0x106   : > { %v625_v3 = vadd.f32 %v1162_v0, %v497_v49  ;;  %v412_v4 = vadd.f32 %v411_v1, %v283_v39  ;;  %v619_v5 = vpop.f32.mrb[3].mxu1 }
 0x107   : > { %444 = vst.msk [vmem:[%s1512_s29 + $0x18] sm:$0xff] %vm440_vm1, %v417_v63  ;;  %v620_v6 = vadd.f32 %v619_v5, %v492_v50 }
 0x108   : > { %651 = vst.msk [vmem:[%s1512_s29 + $0x58] sm:$0xff] %vm440_vm1, %v625_v3  ;;  %443 = vst.msk [vmem:[%s1512_s29 + $0x10] sm:$0xff] %vm440_vm1, %v412_v4  ;;  %v1129_v7 = vpop.f32.mrb[4].mxu0 }
 0x109   : > { %650 = vst.msk [vmem:[%s1512_s29 + $0x50] sm:$0xff] %vm440_vm1, %v620_v6  ;;  %v427_v8 = vadd.f32 %v1129_v7, %v298_v43  ;;  %v1165_v9 = vpop.f32.mrb[4].mxu1  ;;  %v421_v10 = vpop.f32.mrb[5].mxu0 }
 0x10a   : > { %v635_v12 = vadd.f32 %v1165_v9, %v507_v51  ;;  %v422_v13 = vadd.f32 %v421_v10, %v293_v44  ;;  %v629_v14 = vpop.f32.mrb[5].mxu1 }
 0x10b   : > { %446 = vst.msk [vmem:[%s1512_s29 + $0x28] sm:$0xff] %vm440_vm1, %v427_v8  ;;  %v630_v15 = vadd.f32 %v629_v14, %v502_v52 }
 0x10c   : > { %653 = vst.msk [vmem:[%s1512_s29 + $0x68] sm:$0xff] %vm440_vm1, %v635_v12  ;;  %445 = vst.msk [vmem:[%s1512_s29 + $0x20] sm:$0xff] %vm440_vm1, %v422_v13  ;;  %v1132_v17 = vpop.f32.mrb[6].mxu0 }
 0x10d   : > { %652 = vst.msk [vmem:[%s1512_s29 + $0x60] sm:$0xff] %vm440_vm1, %v630_v15  ;;  %v437_v18 = vadd.f32 %v1132_v17, %v308_v45  ;;  %v1168_v19 = vpop.f32.mrb[6].mxu1  ;;  %v431_v20 = vpop.f32.mrb[7].mxu0 }
 0x10e   : > { %v645_v21 = vadd.f32 %v1168_v19, %v517_v61  ;;  %v432_v22 = vadd.f32 %v431_v20, %v303_v46  ;;  %v639_v23 = vpop.f32.mrb[7].mxu1 }
 0x10f   : > { %448 = vst.msk [vmem:[%s1512_s29 + $0x38] sm:$0xff] %vm440_vm1, %v437_v18  ;;  %v640_v24 = vadd.f32 %v639_v23, %v512_v2 }
 0x110   : > { %655 = vst.msk [vmem:[%s1512_s29 + $0x78] sm:$0xff] %vm440_vm1, %v645_v21  ;;  %447 = vst.msk [vmem:[%s1512_s29 + $0x30] sm:$0xff] %vm440_vm1, %v432_v22 }
 0x111   : > { %654 = vst.msk [vmem:[%s1512_s29 + $0x70] sm:$0xff] %vm440_vm1, %v640_v24 }
 0x118   : > { %v1195_v29 = vpop.f32.mrb[8].mxu0 }
 0x119   : > { %v822_v30 = vadd.f32 %v1195_v29, %v694_v11  ;;  %v1201_v31 = vpop.f32.mrb[8].mxu1  ;;  %v816_v32 = vpop.f32.mrb[9].mxu0 }
 0x11a   : > { %v842_v33 = vadd.f32 %v1201_v31, %v714_v27  ;;  %v817_v34 = vadd.f32 %v816_v32, %v689_v16  ;;  %v836_v35 = vpop.f32.mrb[9].mxu1 }
 0x11b   : > { %856 = vst.msk [vmem:[%s1512_s29 + $0x88] sm:$0xff] %vm440_vm1, %v822_v30  ;;  %v837_v36 = vadd.f32 %v836_v35, %v709_v28 }
 0x11c   : > { %860 = vst.msk [vmem:[%s1512_s29 + $0xa8] sm:$0xff] %vm440_vm1, %v842_v33  ;;  %855 = vst.msk [vmem:[%s1512_s29 + $0x80] sm:$0xff] %vm440_vm1, %v817_v34  ;;  %v1198_v38 = vpop.f32.mrb[10].mxu0 }
 0x11d   : > { %859 = vst.msk [vmem:[%s1512_s29 + $0xa0] sm:$0xff] %vm440_vm1, %v837_v36  ;;  %v832_v39 = vadd.f32 %v1198_v38, %v704_v25  ;;  %v1204_v40 = vpop.f32.mrb[10].mxu1  ;;  %v826_v41 = vpop.f32.mrb[11].mxu0 }
 0x11e   : > { %v852_v43 = vadd.f32 %v1204_v40, %v724_v37  ;;  %v827_v44 = vadd.f32 %v826_v41, %v699_v26  ;;  %v846_v45 = vpop.f32.mrb[11].mxu1 }
 0x11f   : > { %858 = vst.msk [vmem:[%s1512_s29 + $0x98] sm:$0xff] %vm440_vm1, %v832_v39  ;;  %v847_v46 = vadd.f32 %v846_v45, %v719_v42 }
 0x120   : > { %862 = vst.msk [vmem:[%s1512_s29 + $0xb8] sm:$0xff] %vm440_vm1, %v852_v43  ;;  %857 = vst.msk [vmem:[%s1512_s29 + $0x90] sm:$0xff] %vm440_vm1, %v827_v44 }
 0x121   : > { %861 = vst.msk [vmem:[%s1512_s29 + $0xb0] sm:$0xff] %vm440_vm1, %v847_v46 }
 0x122 PF: > { %s13_s14 = sadd.s32 1, %s1340_s14   ;;  %s1575_s12 = smov %s1336_s13 }
 0x123   : > { %p10_p5 = scmp.ge.s32.totalorder %s13_s14, 6   ;;  %s1576_s13 = smov %s1578_s15 }
 0x125   :  { %12 = sbr.rel (!%p10_p5) target bundleno = 2 (0x2), region = 72 }

// kernel: my_vit_forward.6
= control target key start
LH: loop header
LB: loop body
LE: loop exit
PB: predicated region body
PF: predicated region fallthrough
CT: control target
= control target key end

     0   :  { %s5733_s24 = smov 0   ;;  %s7093_s0 = inlined_call_operand.vmem [shape: f32[32,48], index: 0, kind: input, shape index: {}]   ;;  %s7094_s1 = inlined_call_operand.vmem [shape: f32[48,96], index: 1, kind: input, shape index: {}]   ;;  %s7095_s2 = inlined_call_operand.vmem [shape: f32[1,96], index: 2, kind: input, shape index: {}]   ;;  %s7096_s3 = inlined_call_operand.vmem [shape: f32[1,96], index: 3, kind: input, shape index: {}]   ;;  %s7097_s4 = inlined_call_operand.vmem [shape: f32[17,96], index: 4, kind: input, shape index: {}]   ;;  %s7098_s5 = inlined_call_operand.vmem [shape: f32[12,1,96], index: 5, kind: input, shape index: {}]   ;;  %s7099_s6 = inlined_call_operand.vmem [shape: f32[12,1,96], index: 6, kind: input, shape index: {}]   ;;  %s7100_s7 = inlined_call_operand.vmem [shape: f32[12,96,288], index: 7, kind: input, shape index: {}]   ;;  %s7101_s8 = inlined_call_operand.vmem [shape: f32[12,1,288], index: 8, kind: input, shape index: {}]   ;;  %s7102_s9 = inlined_call_operand.vmem [shape: f32[12,96,96], index: 9, kind: input, shape index: {}]   ;;  %s7103_s10 = inlined_call_operand.vmem [shape: f32[12,1,96], index: 10, kind: input, shape index: {}]   ;;  %s7104_s11 = inlined_call_operand.vmem [shape: f32[12,1,96], index: 11, kind: input, shape index: {}]   ;;  %s7105_s12 = inlined_call_operand.vmem [shape: f32[12,1,96], index: 12, kind: input, shape index: {}]   ;;  %s7106_s13 = inlined_call_operand.vmem [shape: f32[12,96,384], index: 13, kind: input, shape index: {}]   ;;  %s7107_s14 = inlined_call_operand.vmem [shape: f32[12,1,384], index: 14, kind: input, shape index: {}]   ;;  %s7108_s15 = inlined_call_operand.vmem [shape: f32[12,384,96], index: 15, kind: input, shape index: {}]   ;;  %s7109_s16 = inlined_call_operand.vmem [shape: f32[12,1,96], index: 16, kind: input, shape index: {}]   ;;  %s7110_s17 = inlined_call_operand.vmem [shape: f32[12,34,96], index: 17, kind: output, shape index: {}]  }
   0x1   :  { %7115 = sst [smem:[#allocation5_spill]] %s7093_s0 }
   0x2   :  { %7116 = sst [smem:[#allocation6_spill]] %s7094_s1 }
   0x3   :  { %7117 = sst [smem:[#allocation7_spill]] %s7095_s2 }
   0x4   :  { %7118 = sst [smem:[#allocation8_spill]] %s7096_s3 }
   0x5   :  { %7119 = sst [smem:[#allocation9_spill]] %s7097_s4 }
   0x6   :  { %7120 = sst [smem:[#allocation10_spill]] %s7098_s5 }
   0x7   :  { %7121 = sst [smem:[#allocation11_spill]] %s7100_s7 }
   0x8   :  { %7122 = sst [smem:[#allocation12_spill]] %s7101_s8 }
   0x9   :  { %7123 = sst [smem:[#allocation13_spill]] %s7104_s11 }
   0xa LB: > { %7124 = sst [smem:[#allocation4_spill]] %s5624_s24  ;;  %s4329_s25 = sadd.s32 4294967295, %s5624_s24   ;;  %s5624_s24 = sphi %s5733_s24, %s27_s24  }
   0xb   : > { %p4333_p0 = scmp.ge.s32.totalorder %s5624_s24, 1  ;;  %p583_p1 = scmp.lt.s32.totalorder %s5624_s24, 13 }
   0xd   : > { %p584_p2 = pnand %p4333_p0, %p583_p1 }
   0xe   : > { %p676_p3 = scmp.lt.s32.totalorder (!%p584_p2), %s4329_s25, 11  ;;  %s7127_s7 = sld [smem:[#allocation11_spill]] (!%p584_p2) }
   0xf   : > { %587 = sbr.rel (%p584_p2) target bundleno = 2974 (0xb9e), region = 88  ;;  %s7128_s8 = sld [smem:[#allocation12_spill]] (!%p584_p2) }
  0x10   : > { %p4339_p4 = scmp.ne.s32.totalorder (!%p584_p2), %s4329_s25, 0 }
  0x16   : > { %s5741_s26 = scalar_select %p676_p3, %s4329_s25, 11 }
  0x17   : > { %s7129_s27 = sld [smem:[#allocation6_spill]] (!%p4339_p4)  ;;  %s7130_s18 = sld [smem:[#allocation5_spill]] (!%p4339_p4)  ;;  %vm748_vm0 = vcmask (!%p4339_p4), 392192   ;;  %vm851_vm1 = vcmask (!%p4339_p4), 778240   ;;  %vm855_vm2 = vcmask (!%p4339_p4), 785408  }
  0x18   : > { %s5337_s19 = smul.u32 288, %s5741_s26  ;;  %s7131_s21 = sld [smem:[#allocation8_spill]] (!%p4339_p4) }
  0x19   : > { %s5338_s22 = smul.u32 3, %s5741_s26 }
  0x1a   : > { %s5764_s4 = scalar_lea.vmem %s7127_s7, %s5337_s19  ;;  %s5339_s29 = smul.u32 96, %s5741_s26 }
  0x1b   : > { %s5770_s0 = scalar_lea.vmem %s7128_s8, %s5338_s22  ;;  %s5784_s2 = scalar_lea.vmem %s7106_s13, %s5337_s19 }
  0x1c   : > { %s5779_s23 = scalar_lea.vmem %s7102_s9, %s5339_s29  ;;  %s5789_s3 = scalar_lea.vmem %s7107_s14, %s5338_s22 }
  0x1d   : > { %s5340_s5 = smul.u32 384, %s5741_s26  ;;  %v735_v0 = vld [vmem:[%s7129_s27] sm:$0xff] (!%p4339_p4)  ;;  %v736_v1 = vld [vmem:[%s7129_s27 + $0x8] sm:$0xff] (!%p4339_p4)  ;;  %v737_v2 = vld [vmem:[%s7129_s27 + $0x10] sm:$0xff] (!%p4339_p4)  ;;  %s7132_s7 = sld [smem:[#allocation9_spill]] (!%p4339_p4) }
  0x1e   : > { %s5341_s30 = smul.u32 40, %s5741_s26  ;;  %v5105_v3 = vpack.c.bf16 (!%p4339_p4), %v736_v1, %v735_v0  ;;  %v738_v4 = vld [vmem:[%s7129_s27 + $0x18] sm:$0xff] (!%p4339_p4)  ;;  %v739_v6 = vld [vmem:[%s7129_s27 + $0x20] sm:$0xff] (!%p4339_p4)  ;;  %v740_v7 = vld [vmem:[%s7129_s27 + $0x28] sm:$0xff] (!%p4339_p4)  ;;  %s7133_s8 = sld [smem:[#allocation7_spill]] (!%p4339_p4) }
  0x1f   : > { %s5800_s29 = scalar_lea.vmem %s7108_s15, %s5340_s5  ;;  %730 = sbr.rel (%p4339_p4) target bundleno = 262 (0x106), region = 92  ;;  %v5109_v5 = vpack.c.bf16 (!%p4339_p4), %v738_v4, %v737_v2  ;;  %v731_v8 = vld [vmem:[%s7130_s18] sm:$0xff] (!%p4339_p4)  ;;  %v733_v9 = vld [vmem:[%s7130_s18 + $0x10] sm:$0xff] (!%p4339_p4)  ;;  %v5113_v10 = vpack.c.bf16 (!%p4339_p4), %v740_v7, %v739_v6  ;;  %v732_v11 = vld [vmem:[%s7130_s18 + $0x8] sm:$0xff] (!%p4339_p4) }
  0x20   : > { %s5805_s19 = scalar_lea.vmem %s7110_s17, %s5341_s30  ;;  %5106 = vmatprep.subr.bf16.mxu0 (!%p4339_p4), %v5105_v3  ;;  %5331 = vmatprep.subr.bf16.mxu1 (!%p4339_p4), %v5105_v3  ;;  %v734_v12 = vld [vmem:[%s7130_s18 + $0x18] sm:$0xff] (!%p4339_p4)  ;;  %v846_v13 = vld [vmem:[%s7131_s21] sm:$0x1] (!%p4339_p4) }
  0x21   : > { %5108 = vmatpush3.bf16.msra.mxu0 (!%p4339_p4), %v5105_v3  ;;  %5334 = vmatpush3.bf16.msra.mxu1 (!%p4339_p4), %v5105_v3 }
  0x22   : > { %5110 = vmatprep.subr.bf16.mxu0 (!%p4339_p4), %v5109_v5  ;;  %5332 = vmatprep.subr.bf16.mxu1 (!%p4339_p4), %v5109_v5 }
  0x23   : > { %4695 = vmatprep.mubr.msk.f32.mxu0 (!%p4339_p4), %vm748_vm0, %v731_v8  ;;  %4698 = vmatprep.mubr.msk.f32.mxu1 (!%p4339_p4), %vm748_vm0, %v733_v9  ;;  %v847_v14 = vld [vmem:[%s7132_s7] sm:$0x1] (!%p4339_p4)  ;;  %v850_v18 = vld [vmem:[%s7132_s7 + $0x9] sm:$0xff] (!%p4339_p4)  ;;  %v849_v23 = vld [vmem:[%s7132_s7 + $0x1] sm:$0xff] (!%p4339_p4) }
  0x24   : > { %v848_v15 = vadd.f32 (!%p4339_p4), %v847_v14, %v846_v13  ;;  %v4340_v16 = vld [vmem:[%s7133_s8] ss:$0 sm:$0xff] (!%p4339_p4) }
  0x25   : > { %5112 = vmatpush3.bf16.msra.mxu0 (!%p4339_p4), %v5109_v5  ;;  %5335 = vmatpush3.bf16.msra.mxu1 (!%p4339_p4), %v5109_v5 }
  0x26   : > { %5114 = vmatprep.subr.bf16.mxu0 %v5113_v10  ;;  %5333 = vmatprep.subr.bf16.mxu1 %v5113_v10  ;;  %852 = vst.msk [vmem:[#allocation2] sm:$0x1] %vm851_vm1, %v848_v15  ;;  %858 = vst.msk [vmem:[#allocation2 + $0x11] sm:$0x1] %vm851_vm1, %v848_v15 }
  0x29   : > { %5116 = vmatpush3.bf16.msra.mxu0 %v5113_v10  ;;  %5336 = vmatpush3.bf16.msra.mxu1 %v5113_v10 }
  0x2c   : > { %4696 = vmatmul.mubr.msk.f32.vlgmr.msra.gmra.mrb[0].mxu0 %vm748_vm0, %v732_v11  ;;  %4699 = vmatmul.mubr.msk.f32.vlgmr.msra.gmra.mrb[0].mxu1 %vm748_vm0, %v734_v12 }
  0xff   : > { %v4697_v17 = vpop.f32.mrb[0].mxu0  ;;  %v4700_v19 = vpop.f32.mrb[0].mxu1 }
 0x100   : > { %v833_v20 = vadd.f32 %v4697_v17, %v4340_v16  ;;  %v843_v21 = vadd.f32 %v4700_v19, %v4340_v16  ;;  %v827_v22 = vpop.f32.mrb[1].mxu0  ;;  %v837_v24 = vpop.f32.mrb[1].mxu1 }
 0x101   : > { %v828_v25 = vadd.f32 %v4340_v16, %v827_v22  ;;  %v838_v26 = vadd.f32 %v4340_v16, %v837_v24 }
 0x102   : > { %v854_v27 = vadd.f32 %v850_v18, %v833_v20  ;;  %v860_v28 = vadd.f32 %v850_v18, %v843_v21 }
 0x103   : > { %v853_v29 = vadd.f32 %v849_v23, %v828_v25  ;;  %v859_v30 = vadd.f32 %v849_v23, %v838_v26 }
 0x104   : > { %857 = vst.msk [vmem:[#allocation2 + $0x9] sm:$0xff] %vm855_vm2, %v854_v27  ;;  %862 = vst.msk [vmem:[#allocation2 + $0x1a] sm:$0xff] %vm855_vm2, %v860_v28 }
 0x105   : > { %856 = vst.msk [vmem:[#allocation2 + $0x1] sm:$0xff] %vm855_vm2, %v853_v29  ;;  %861 = vst.msk [vmem:[#allocation2 + $0x12] sm:$0xff] %vm855_vm2, %v859_v30 }
 0x106 PF: > { %vm870_vm3 = vcmask 785408   ;;  %vm883_vm4 = vcmask 779264   ;;  %v961_v41 = vld [vmem:[%s5764_s4 + $0x8] sm:$0xff]  ;;  %v964_v42 = vld [vmem:[%s5764_s4 + $0x20] sm:$0xff]  ;;  %v5626_v45 = vmov 0.0|0.0   ;;  %v963_v46 = vld [vmem:[%s5764_s4 + $0x18] sm:$0xff]  ;;  %s7136_s24 = scalar_lea.vmem %s7099_s6, %s5741_s26 }
 0x107   : > { %v960_v43 = vld [vmem:[%s5764_s4] sm:$0xff]  ;;  %v5117_v44 = vpack.c.bf16 %v964_v42, %v961_v41  ;;  %5141 = vmatprep.subr.bf16.mxu1 %v5626_v45  ;;  %v962_v47 = vld [vmem:[%s5764_s4 + $0x10] sm:$0xff]  ;;  %v965_v48 = vld [vmem:[%s5764_s4 + $0x28] sm:$0xff]  ;;  %vm5628_vm5 = vmmov 0   ;;  %s7134_s21 = sld [smem:[#allocation10_spill]]  ;;  %s5630_s8 = smov 32  }
 0x108   : > { %v5119_v49 = vpack.c.bf16 %v963_v46, %v960_v43  ;;  %v5142_v50 = vpack.c.bf16 %v965_v48, %v962_v47  ;;  %v967_v12 = vld [vmem:[%s5764_s4 + $0x38] sm:$0xff]  ;;  %v970_v13 = vld [vmem:[%s5764_s4 + $0x50] sm:$0xff]  ;;  %v969_v16 = vld [vmem:[%s5764_s4 + $0x48] sm:$0xff]  ;;  %vm2253_vm6 = vcmask 1046528   ;;  %s5631_s11 = smov 112   ;;  %s5632_s1 = smov 104  }
 0x109   : > { %5118 = vmatprep.subr.bf16.mxu0 %v5117_v44  ;;  %v5121_v14 = vpack.c.bf16 %v970_v13, %v967_v12  ;;  %v966_v15 = vld [vmem:[%s5764_s4 + $0x30] sm:$0xff]  ;;  %v968_v17 = vld [vmem:[%s5764_s4 + $0x40] sm:$0xff]  ;;  %v971_v19 = vld [vmem:[%s5764_s4 + $0x58] sm:$0xff]  ;;  %s5633_s5 = smov 80   ;;  %s5634_s25 = smov 88   ;;  %vm1222_vm7 = vcmask 195584  }
 0x10a   : > { %5120 = vmatpush1.bf16.msra.mxu0 %v5119_v49  ;;  %5143 = vmatpush3.bf16.msra.mxu1 %v5142_v50  ;;  %v5123_v18 = vpack.c.bf16 %v969_v16, %v966_v15  ;;  %v5145_v20 = vpack.c.bf16 %v971_v19, %v968_v17  ;;  %v973_v21 = vld [vmem:[%s5764_s4 + $0x68] sm:$0xff]  ;;  %v976_v22 = vld [vmem:[%s5764_s4 + $0x80] sm:$0xff]  ;;  %v975_v25 = vld [vmem:[%s5764_s4 + $0x78] sm:$0xff]  ;;  %s5636_s30 = smov 64   ;;  %s5639_s28 = smov 120   ;;  %vm1478_vm9 = vcmask 64512  }
 0x10b   : > { %v867_v39 = vld [vmem:[#allocation2 + $0x20] sm:$0x3]  ;;  %5144 = vmatprep.subr.bf16.mxu1 %v5626_v45  ;;  %5122 = vmatprep.subr.bf16.mxu0 %v5121_v14  ;;  %v5125_v23 = vpack.c.bf16 %v976_v22, %v973_v21  ;;  %v974_v26 = vld [vmem:[%s5764_s4 + $0x70] sm:$0xff]  ;;  %v977_v28 = vld [vmem:[%s5764_s4 + $0x88] sm:$0xff]  ;;  %vm1373_vm10 = vcmask 1040384   ;;  %vm1881_vm11 = vcmask 130048  }
 0x10c   : > { %v863_v31 = vld [vmem:[#allocation2] sm:$0xff]  ;;  %v865_v32 = vld [vmem:[#allocation2 + $0x10] sm:$0xff]  ;;  %v864_v33 = vld [vmem:[#allocation2 + $0x8] sm:$0xff]  ;;  %v884_v40 = vsel %vm883_vm4, %v867_v39, 0.0  ;;  %v5148_v29 = vpack.c.bf16 %v977_v28, %v974_v26  ;;  %vm1318_vm12 = vcmask 138240   ;;  %vm1325_vm13 = vcmask 131072  }
 0x10d   : > { %v871_v34 = vsel %vm870_vm3, %v863_v31, 0.0  ;;  %v877_v35 = vsel %vm870_vm3, %v865_v32, 0.0  ;;  %v866_v36 = vld [vmem:[#allocation2 + $0x18] sm:$0xff]  ;;  %v874_v37 = vsel %vm870_vm3, %v864_v33, 0.0  ;;  %v972_v24 = vld [vmem:[%s5764_s4 + $0x60] sm:$0xff]  ;;  %v986_v44 = vld [vmem:[%s5764_s4 + $0xd0] sm:$0xff]  ;;  %s7135_s20 = scalar_lea.vmem %s7134_s21, %s5741_s26 }
 0x10e   : > { %872 = vadd.xlane.f32.xlu0 %v871_v34  ;;  %878 = vadd.xlane.f32.xlu1 %v877_v35  ;;  %v880_v38 = vsel %vm870_vm3, %v866_v36, 0.0  ;;  %v5127_v27 = vpack.c.bf16 %v975_v25, %v972_v24  ;;  %v979_v30 = vld [vmem:[%s5764_s4 + $0x98] sm:$0xff]  ;;  %v981_v34 = vld [vmem:[%s5764_s4 + $0xa8] sm:$0xff]  ;;  %v980_v35 = vld [vmem:[%s5764_s4 + $0xa0] sm:$0xff]  ;;  %s5637_s21 = smov 40   ;;  %vm1458_vm14 = vcmask 188416  }
 0x10f   : > { %5124 = vmatpush1.bf16.msra.mxu0 %v5123_v18  ;;  %5146 = vmatpush3.bf16.msra.mxu1 %v5145_v20  ;;  %v984_v42 = vld [vmem:[%s5764_s4 + $0xc0] sm:$0xff]  ;;  %v987_v43 = vld [vmem:[%s5764_s4 + $0xd8] sm:$0xff]  ;;  %v989_v47 = vld [vmem:[%s5764_s4 + $0xe8] sm:$0xff]  ;;  %s5640_s22 = smov 24   ;;  %vm1721_vm15 = vcmask 392384   ;;  %vm1724_vm0 = vcmask 385216  }
 0x110   : > { %5147 = vmatprep.subr.bf16.mxu1 %v5626_v45  ;;  %5126 = vmatprep.subr.bf16.mxu0 %v5125_v23  ;;  %v5135_v46 = vpack.c.bf16 %v987_v43, %v984_v42  ;;  %v991_v48 = vld [vmem:[%s5764_s4 + $0xf8] sm:$0xff]  ;;  %v994_v49 = vld [vmem:[%s5764_s4 + $0x110] sm:$0xff]  ;;  %v5154_v50 = vpack.c.bf16 %v989_v47, %v986_v44  ;;  %v4345_v16 = vld [vmem:[%s7135_s20] ss:$0 sm:$0xff]  ;;  %s5638_s20 = smov 16   ;;  %vm1990_vm1 = vcmask 589184  }
 0x111   : > { %v4346_v18 = vld [vmem:[%s7136_s24] ss:$0 sm:$0xff]  ;;  %vm6161_vm8 = vmpackc.low %vm1222_vm7, %vm1222_vm7  ;;  %s5641_s24 = smov 48   ;;  %vm1993_vm2 = vcmask 582016  }
 0x112   : > { %875 = vadd.xlane.f32.xlu0 %v874_v37  ;;  %881 = vadd.xlane.f32.xlu1 %v880_v38  ;;  %v983_v37 = vld [vmem:[%s5764_s4 + $0xb8] sm:$0xff] }
 0x113   : > { %5128 = vmatpush1.bf16.msra.mxu0 %v5127_v27  ;;  %5149 = vmatpush3.bf16.msra.mxu1 %v5148_v29  ;;  %v5151_v38 = vpack.c.bf16 %v983_v37, %v980_v35 }
 0x114   : > { %5150 = vmatprep.subr.bf16.mxu1 %v5626_v45 }
 0x116   : > { %885 = vadd.xlane.f32.xlu0 %v884_v40  ;;  %v988_v40 = vld [vmem:[%s5764_s4 + $0xe0] sm:$0xff] }
 0x117   : > { %5152 = vmatpush3.bf16.msra.mxu1 %v5151_v38 }
 0x118   : > { %5153 = vmatprep.subr.bf16.mxu1 %v5626_v45 }
 0x11b   : > { %5155 = vmatpush3.bf16.msra.mxu1 %v5154_v50 }
 0x11c   : > { %5156 = vmatprep.subr.bf16.mxu1 %v5626_v45 }
 0x19b   : > { %v873_v51 = vpop.xlane.xlu0 %872  ;;  %v879_v52 = vpop.xlane.xlu1 %878 }
 0x19c   : > { %v888_v53 = vmul.f32 0.010416667, %v873_v51  ;;  %v890_v54 = vmul.f32 0.010416667, %v879_v52  ;;  %v5137_v51 = vpack.c.bf16 %v994_v49, %v991_v48  ;;  %v990_v52 = vld [vmem:[%s5764_s4 + $0xf0] sm:$0xff] }
 0x19e   : > { %v5869_v55 = vsub.f32 %v863_v31, %v888_v53  ;;  %v5871_v56 = vsub.f32 %v865_v32, %v890_v54  ;;  %v982_v31 = vld [vmem:[%s5764_s4 + $0xb0] sm:$0xff]  ;;  %v993_v53 = vld [vmem:[%s5764_s4 + $0x108] sm:$0xff]  ;;  %v992_v54 = vld [vmem:[%s5764_s4 + $0x100] sm:$0xff] }
 0x19f   : > { %v876_v57 = vpop.xlane.xlu0 %875  ;;  %v882_v58 = vpop.xlane.xlu1 %881  ;;  %v5129_v32 = vpack.c.bf16 %v982_v31, %v979_v30 }
 0x1a0   : > { %v889_v59 = vmul.f32 0.010416667, %v876_v57  ;;  %v891_v60 = vmul.f32 0.010416667, %v882_v58  ;;  %v898_v61 = vmul.f32 %v5869_v55, %v5869_v55  ;;  %v900_v62 = vmul.f32 %v5871_v56, %v5871_v56 }
 0x1a1   : > { %5130 = vmatprep.subr.bf16.mxu0 %v5129_v32  ;;  %v5627_v57 = vmov 0.0   ;;  %v5139_v58 = vpack.c.bf16 %v993_v53, %v990_v52  ;;  %v998_v32 = vlaneseq }
 0x1a2   : > { %v5877_v63 = vsub.f32 %v864_v33, %v889_v59  ;;  %v5879_v0 = vsub.f32 %v866_v36, %v891_v60  ;;  %v903_v1 = vsel %vm870_vm3, %v898_v61, 0.0  ;;  %v909_v4 = vsel %vm870_vm3, %v900_v62, 0.0  ;;  %v978_v33 = vld [vmem:[%s5764_s4 + $0x90] sm:$0xff]  ;;  %1092 = vmatprep.mubr.f32.mxu0 %v5627_v57  ;;  %v995_v59 = vld [vmem:[%s5764_s4 + $0x118] sm:$0xff]  ;;  %4725 = vmatprep.mubr.msk.f32.mxu1 %vm5628_vm5, %v5627_v57 }
 0x1a3   : > { %904 = vadd.xlane.f32.xlu1 %v903_v1  ;;  %v886_v2 = vpop.xlane.xlu0 %885  ;;  %v5131_v36 = vpack.c.bf16 %v981_v34, %v978_v33  ;;  %v5157_v60 = vpack.c.bf16 %v995_v59, %v992_v54  ;;  %v5974_v33 = vshrl.u32 %v998_v32, 7 }
 0x1a4   : > { %v892_v3 = vmul.f32 0.010416667, %v886_v2  ;;  %v899_v5 = vmul.f32 %v5877_v63, %v5877_v63  ;;  %v901_v6 = vmul.f32 %v5879_v0, %v5879_v0 }
 0x1a5   : > { %5132 = vmatpush1.bf16.msra.mxu0 %v5131_v36  ;;  %5158 = vmatpush3.bf16.msra.mxu1 %v5157_v60  ;;  %v1000_v34 = vsub.s32 0, %v5974_v33  ;;  %v1008_v35 = vsub.s32 2, %v5974_v33  ;;  %v996_v36 = vld [vmem:[%s5770_s0] sm:$0x7]  ;;  %v1004_v37 = vsub.s32 1, %v5974_v33  ;;  %s5629_s0 = smov 8  }
 0x1a6   : > { %v5887_v7 = vsub.f32 %v867_v39, %v892_v3  ;;  %v906_v8 = vsel %vm870_vm3, %v899_v5, 0.0  ;;  %v912_v9 = vsel %vm870_vm3, %v901_v6, 0.0  ;;  %v985_v39 = vld [vmem:[%s5764_s4 + $0xc8] sm:$0xff]  ;;  %5159 = vmatprep.subr.bf16.mxu1 %v5626_v45  ;;  %s5635_s4 = smov 56  }
 0x1a7   : > { %910 = vadd.xlane.f32.xlu1 %v909_v4  ;;  %907 = vadd.xlane.f32.xlu0 %v906_v8  ;;  %v5133_v41 = vpack.c.bf16 %v988_v40, %v985_v39  ;;  %v5982_v38 = vrot.slane %v996_v36, %v1000_v34  ;;  %v1009_v39 = vrot.slane %v996_v36, %v1008_v35 }
 0x1a8   : > { %v902_v10 = vmul.f32 %v5887_v7, %v5887_v7  ;;  %v1005_v40 = vrot.slane %v996_v36, %v1004_v37 }
 0x1a9   : > { %5134 = vmatprep.subr.bf16.mxu0 %v5133_v41 }
 0x1aa   : > { %v915_v11 = vsel %vm883_vm4, %v902_v10, 0.0  ;;  %5136 = vmatpush1.bf16.msra.mxu0 %v5135_v46 }
 0x1ab   : > { %913 = vadd.xlane.f32.xlu0 %v912_v9  ;;  %916 = vadd.xlane.f32.xlu1 %v915_v11 }
 0x1ac   : > { %5138 = vmatprep.subr.bf16.mxu0 %v5137_v51 }
 0x1ae   : > { %5140 = vmatpush1.bf16.msra.mxu0 %v5139_v58 }
 0x1af   : > { %5166 = vmatprep.subr.bf16.mxu0 %v5626_v45 }
 0x230   : > { %v905_v61 = vpop.xlane.xlu1 %904 }
 0x231   : > { %v918_v62 = vmul.f32 0.010416667, %v905_v61 }
 0x233   : > { %v923_v1 = vadd.f32 1e-12, %v918_v62 }
 0x234   : > { %v911_v2 = vpop.xlane.xlu1 %910  ;;  %v908_v3 = vpop.xlane.xlu0 %907 }
 0x235   : > { %5467 = vrsqrt.f32 %v923_v1  ;;  %v920_v4 = vmul.f32 0.010416667, %v911_v2  ;;  %v919_v5 = vmul.f32 0.010416667, %v908_v3 }
 0x237   : > { %v925_v6 = vadd.f32 1e-12, %v920_v4  ;;  %v924_v8 = vadd.f32 1e-12, %v919_v5 }
 0x238   : > { %v917_v9 = vpop.xlane.xlu1 %916  ;;  %v914_v10 = vpop.xlane.xlu0 %913 }
 0x239   : > { %5469 = vrsqrt.f32 %v925_v6  ;;  %v922_v11 = vmul.f32 0.010416667, %v917_v9  ;;  %v921_v12 = vmul.f32 0.010416667, %v914_v10 }
 0x23a   : > { %5471 = vrsqrt.f32 %v924_v8 }
 0x23b   : > { %v926_v13 = vadd.f32 1e-12, %v921_v12  ;;  %v927_v14 = vadd.f32 1e-12, %v922_v11 }
 0x23d   : > { %5473 = vrsqrt.f32 %v926_v13 }
 0x23e   : > { %5475 = vrsqrt.f32 %v927_v14 }
 0x23f   : > { %v5468_v15 = vpop.eup %5467 }
 0x240   : > { %v933_v17 = vmul.f32 %v5468_v15, %v5869_v55 }
 0x242   : > { %v944_v19 = vmul.f32 %v4345_v16, %v933_v17 }
 0x243   : > { %v5470_v20 = vpop.eup %5469 }
 0x244   : > { %v5472_v21 = vpop.eup %5471  ;;  %v955_v22 = vadd.f32 %v4346_v18, %v944_v19  ;;  %v935_v24 = vmul.f32 %v5470_v20, %v5871_v56 }
 0x245   : > { %v934_v23 = vmul.f32 %v5472_v21, %v5877_v63 }
 0x246   : > { %4347 = vmatmul.mubr.msk.f32.vlgmr.msra.gmra.mrb[0].mxu0 %vm870_vm3, %v955_v22  ;;  %4726 = vmatmul.mubr.msk.f32.vlgmr.msra.gmra.mrb[0].mxu1 %vm870_vm3, %v955_v22  ;;  %v946_v27 = vmul.f32 %v4345_v16, %v935_v24 }
 0x247   : > { %1098 = vmatprep.mubr.f32.mxu0 %v5627_v57  ;;  %4728 = vmatprep.mubr.msk.f32.mxu1 %vm5628_vm5, %v5627_v57  ;;  %v945_v55 = vmul.f32 %v4345_v16, %v934_v23  ;;  %v5474_v25 = vpop.eup %5473 }
 0x248   : > { %v936_v28 = vmul.f32 %v5474_v25, %v5879_v0  ;;  %v5476_v29 = vpop.eup %5475  ;;  %v957_v56 = vadd.f32 %v4346_v18, %v946_v27 }
 0x249   : > { %v956_v26 = vadd.f32 %v4346_v18, %v945_v55  ;;  %v937_v30 = vmul.f32 %v5476_v29, %v5887_v7 }
 0x24a   : > { %v947_v63 = vmul.f32 %v4345_v16, %v936_v28 }
 0x24b   : > { %4348 = vmatmul.mubr.msk.f32.gmra.mrb[2].mxu0 %vm870_vm3, %v956_v26  ;;  %4729 = vmatmul.mubr.msk.f32.gmra.mrb[2].mxu1 %vm870_vm3, %v956_v26  ;;  %v948_v31 = vmul.f32 %v4345_v16, %v937_v30 }
 0x24c   : > { %1104 = vmatprep.mubr.f32.mxu0 %v5627_v57  ;;  %4731 = vmatprep.mubr.msk.f32.mxu1 %vm5628_vm5, %v5627_v57  ;;  %v958_v0 = vadd.f32 %v4346_v18, %v947_v63 }
 0x24d   : > { %v959_v7 = vadd.f32 %v4346_v18, %v948_v31 }
 0x24f   : > { %4349 = vmatmul.mubr.msk.f32.gmra.mrb[4].mxu0 %vm870_vm3, %v957_v56  ;;  %4732 = vmatmul.mubr.msk.f32.gmra.mrb[4].mxu1 %vm870_vm3, %v957_v56 }
 0x250   : > { %1110 = vmatprep.mubr.f32.mxu0 %v5627_v57  ;;  %4734 = vmatprep.mubr.msk.f32.mxu1 %vm5628_vm5, %v5627_v57 }
 0x253   : > { %4350 = vmatmul.mubr.msk.f32.gmra.mrb[6].mxu0 %vm870_vm3, %v958_v0  ;;  %4735 = vmatmul.mubr.msk.f32.gmra.mrb[6].mxu1 %vm870_vm3, %v958_v0 }
 0x254   : > { %1116 = vmatprep.mubr.f32.mxu0 %v5627_v57  ;;  %4737 = vmatprep.mubr.msk.f32.mxu1 %vm5628_vm5, %v5627_v57 }
 0x257   : > { %4351 = vmatmul.mubr.msk.f32.gmra.mrb[8].mxu0 %vm870_vm3, %v959_v7  ;;  %4738 = vmatmul.mubr.msk.f32.gmra.mrb[8].mxu1 %vm870_vm3, %v959_v7 }
 0x258   : > { %4746 = vmatprep.mubr.msk.f32.mxu1 %vm5628_vm5, %v5627_v57  ;;  %4776 = vmatprep.mubr.msk.f32.mxu0 %vm5628_vm5, %v5627_v57 }
 0x319   : > { %v1094_v41 = vpop.f32.mrb[0].mxu0  ;;  %v1189_v42 = vpop.f32.mrb[0].mxu1 }
 0x31a   : > { %v5989_v43 = vadd.f32 %v1094_v41, %v5982_v38  ;;  %v5991_v44 = vadd.f32 %v1189_v42, %v1009_v39  ;;  %v1096_v46 = vpop.f32.mrb[1].mxu0  ;;  %v4727_v47 = vpop.f32.mrb[1].mxu1 }
 0x31b   : > { %v5993_v48 = vadd.f32 %v1096_v46, %v1005_v40 }
 0x31d   : > { %v5372_v49 = vpack.i.bf16 %v5993_v48, %v5989_v43  ;;  %v5427_v50 = vpack.i.bf16 %v5991_v44, %v5993_v48 }
 0x31e   : > { %v1100_v51 = vpop.f32.mrb[2].mxu0  ;;  %v1194_v52 = vpop.f32.mrb[2].mxu1 }
 0x31f   : > { %v6000_v53 = vadd.f32 %v1100_v51, %v5982_v38  ;;  %v6002_v54 = vadd.f32 %v1194_v52, %v1009_v39  ;;  %v1102_v58 = vpop.f32.mrb[3].mxu0  ;;  %v4730_v59 = vpop.f32.mrb[3].mxu1  ;;  %5373 = vrot.lane.b32.xlu1 %v5372_v49, %s5629_s0 }
 0x320   : > { %v6005_v60 = vadd.f32 %v1102_v58, %v1005_v40 }
 0x321   : > { %v5437_v61 = vpack.i.bf16 %v6002_v54, %v5991_v44  ;;  %v5367_v62 = vpack.i.bf16 %v6000_v53, %v5989_v43 }
 0x322   : > { %v1106_v1 = vpop.f32.mrb[4].mxu0  ;;  %v1199_v2 = vpop.f32.mrb[4].mxu1  ;;  %v6013_v3 = vpack.i.bf16 %v6005_v60, %v5993_v48  ;;  %v5432_v8 = vpack.i.bf16 %v6002_v54, %v6005_v60  ;;  %v5377_v16 = vpack.i.bf16 %v6005_v60, %v6000_v53 }
 0x323   : > { %v6016_v4 = vadd.f32 %v1106_v1, %v5982_v38  ;;  %v1108_v5 = vpop.f32.mrb[5].mxu0  ;;  %v4733_v6 = vpop.f32.mrb[5].mxu1  ;;  %5368 = vrot.lane.b32.xlu0 %v5367_v62, %s5630_s8  ;;  %v6021_v9 = vadd.f32 %v1199_v2, %v1009_v39 }
 0x324   : > { %v6025_v10 = vadd.f32 %v1108_v5, %v1005_v40 }
 0x325   : > { %1220 = vrot.lane.b32.xlu1 %v6016_v4, %s5630_s8  ;;  %v2907_v18 = vrot.slane %v6021_v9, 1  ;;  %v2254_v42 = vrot.slane %v6016_v4, 1 }
 0x326   : > { %v1112_v11 = vpop.f32.mrb[6].mxu0  ;;  %v1204_v12 = vpop.f32.mrb[6].mxu1  ;;  %v2395_v20 = vrot.slane %v6025_v10, 1 }
 0x327   : > { %v1205_v13 = vadd.f32 %v1204_v12, %v1009_v39  ;;  %1474 = vrot.lane.b32.xlu0 %v6016_v4, %s5629_s0  ;;  %v1114_v14 = vpop.f32.mrb[7].mxu0  ;;  %v4736_v15 = vpop.f32.mrb[7].mxu1 }
 0x328   : > { %v1115_v17 = vadd.f32 %v1114_v14, %v1005_v40 }
 0x329   : > { %v2908_v19 = vrot.slane %v1205_v13, 1  ;;  %5378 = vrot.lane.b32.xlu1 %v5377_v16, %s5629_s0 }
 0x32a   : > { %v2396_v21 = vrot.slane %v1115_v17, 1  ;;  %v1118_v22 = vpop.f32.mrb[8].mxu0  ;;  %v1209_v23 = vpop.f32.mrb[8].mxu1 }
 0x32b   : > { %v1210_v24 = vadd.f32 %v1209_v23, %v1009_v39  ;;  %5383 = vrot.lane.b32.xlu0 %v6013_v3, %s5631_s11  ;;  %v1120_v55 = vpop.f32.mrb[9].mxu0  ;;  %v4739_v25 = vpop.f32.mrb[9].mxu1  ;;  %v6037_v26 = vsel %vm2253_vm6, %v2907_v18, %v2908_v19  ;;  %v1119_v32 = vadd.f32 %v1118_v22, %v5982_v38  ;;  %v1113_v39 = vadd.f32 %v1112_v11, %v5982_v38 }
 0x32c   : > { %v6040_v27 = vsel %vm2253_vm6, %v2395_v20, %v2396_v21  ;;  %v1121_v28 = vadd.f32 %v1120_v55, %v1005_v40 }
 0x32d   : > { %v6042_v29 = vrot.slane %v1210_v24, 1  ;;  %1476 = vrot.lane.b32.xlu1 %v6025_v10, %s5629_s0  ;;  %v5452_v56 = vpack.i.bf16 %v6037_v26, %v6040_v27  ;;  %v6076_v40 = vrot.slane %v1119_v32, 1  ;;  %v2255_v41 = vrot.slane %v1113_v39, 1 }
 0x32e   : > { %v6048_v63 = vrot.slane %v1121_v28, 1 }
 0x32f   : > { %1462 = vrot.lane.b32.xlu0 %v6000_v53, %s5632_s1  ;;  %v6054_v30 = vsel %vm2253_vm6, %v2908_v19, %v6042_v29  ;;  %v6084_v46 = vsel %vm2253_vm6, %v2255_v41, %v6076_v40  ;;  %v6089_v38 = vsel %vm2253_vm6, %v2254_v42, %v2255_v41 }
 0x330   : > { %v6058_v0 = vsel %vm2253_vm6, %v2396_v21, %v6048_v63  ;;  %v5462_v31 = vpack.i.bf16 %v6054_v30, %v6037_v26  ;;  %v5392_v47 = vpack.i.bf16 %v6084_v46, %v6089_v38  ;;  %v5397_v51 = vpack.i.bf16 %v6040_v27, %v6089_v38 }
 0x331   : > { %1460 = vrot.lane.b32.xlu1 %v5989_v43, %s5632_s1  ;;  %v6066_v7 = vpack.i.bf16 %v6058_v0, %v6040_v27  ;;  %v5457_v36 = vpack.i.bf16 %v6054_v30, %v6058_v0  ;;  %v5402_v49 = vpack.i.bf16 %v6058_v0, %v6084_v46  ;;  %vm2246_vm6 = vcmask 785984  }
 0x333   : > { %1736 = vrot.lane.b32.xlu0 %v6025_v10, %s5631_s11 }
 0x335   : > { %1464 = vrot.lane.b32.xlu1 %v6016_v4, %s5632_s1 }
 0x337   : > { %1726 = vrot.lane.b32.xlu0 %v5989_v43, %s5633_s5 }
 0x339   : > { %5388 = vrot.lane.b32.xlu1 %v6013_v3, %s5634_s25 }
 0x33b   : > { %1730 = vrot.lane.b32.xlu0 %v6016_v4, %s5633_s5 }
 0x33d   : > { %1728 = vrot.lane.b32.xlu1 %v6000_v53, %s5633_s5 }
 0x33f   : > { %5393 = vrot.lane.b32.xlu0 %v5392_v47, %s5630_s8 }
 0x341   : > { %2005 = vrot.lane.b32.xlu1 %v6025_v10, %s5634_s25 }
 0x343   : > { %1997 = vrot.lane.b32.xlu0 %v6000_v53, %s5635_s4 }
 0x345   : > { %1995 = vrot.lane.b32.xlu1 %v5989_v43, %s5635_s4 }
 0x347   : > { %2263 = vrot.lane.b32.xlu0 %v6076_v40, %s5630_s8 }
 0x349   : > { %1999 = vrot.lane.b32.xlu1 %v6016_v4, %s5635_s4 }
 0x34b   : > { %5403 = vrot.lane.b32.xlu0 %v5402_v49, %s5629_s0 }
 0x34d   : > { %5398 = vrot.lane.b32.xlu1 %v5397_v51, %s5629_s0 }
 0x34f   : > { %2518 = vrot.lane.b32.xlu0 %v6048_v63, %s5629_s0 }
 0x351   : > { %2516 = vrot.lane.b32.xlu1 %v6076_v40, %s5629_s0  ;;  %s5642_s0 = smov 72  }
 0x353   : > { %2502 = vrot.lane.b32.xlu0 %v6089_v38, %s5632_s1 }
 0x355   : > { %5408 = vrot.lane.b32.xlu1 %v6066_v7, %s5631_s11 }
 0x357   : > { %2506 = vrot.lane.b32.xlu0 %v6076_v40, %s5632_s1 }
 0x359   : > { %2504 = vrot.lane.b32.xlu1 %v6084_v46, %s5632_s1 }
 0x35b   : > { %5413 = vrot.lane.b32.xlu0 %v6066_v7, %s5634_s25 }
 0x35d   : > { %2775 = vrot.lane.b32.xlu1 %v6048_v63, %s5631_s11  ;;  %s7139_s11 = scalar_lea.vmem %s7103_s10, %s5741_s26 }
 0x35f   : > { %2767 = vrot.lane.b32.xlu0 %v6084_v46, %s5633_s5 }
 0x361   : > { %2765 = vrot.lane.b32.xlu1 %v6089_v38, %s5633_s5 }
 0x363   : > { %3045 = vrot.lane.b32.xlu0 %v6048_v63, %s5634_s25 }
 0x365   : > { %2769 = vrot.lane.b32.xlu1 %v6076_v40, %s5633_s5  ;;  %s7140_s5 = sld [smem:[#allocation13_spill]] }
 0x367   : > { %3037 = vrot.lane.b32.xlu0 %v6084_v46, %s5635_s4 }
 0x369   : > { %3035 = vrot.lane.b32.xlu1 %v6089_v38, %s5635_s4 }
 0x36b   : > { %1360 = vrot.lane.b32.xlu0 %v6025_v10, %s5636_s30  ;;  %s7141_s25 = scalar_lea.vmem %s7140_s5, %s5741_s26 }
 0x36d   : > { %3039 = vrot.lane.b32.xlu1 %v6076_v40, %s5635_s4 }
 0x36f   : > { %5423 = vrot.lane.b32.xlu0 %v6013_v3, %s5637_s21 }
 0x371   : > { %5418 = vrot.lane.b32.xlu1 %v6013_v3, %s5636_s30 }
 0x373   : > { %5428 = vrot.lane.b32.xlu0 %v5427_v50, %s5638_s20 }
 0x375   : > { %1614 = vrot.lane.b32.xlu1 %v6025_v10, %s5637_s21 }
 0x377   : > { %1879 = vrot.lane.b32.xlu0 %v6021_v9, %s5638_s20 }
 0x379   : > { %5433 = vrot.lane.b32.xlu1 %v5432_v8, %s5638_s20 }
 0x37b   : > { %5438 = vrot.lane.b32.xlu0 %v5437_v61, %s5639_s28 }
 0x37d   : > { %1877 = vrot.lane.b32.xlu1 %v6025_v10, %s5638_s20 }
 0x381   : > { %2139 = vrot.lane.b32.xlu1 %v6021_v9, %s5639_s28 }
 0x391   : > { %v5374_v48 = vpop.permute.xlu1 %5373 }
 0x392   : > { %v5376_v61 = vunpack.i.h.bf16 %v5374_v48  ;;  %v5375_v62 = vunpack.i.l.bf16 %v5374_v48 }
 0x394   : > { %v1479_v6 = vsel %vm1478_vm9, %v5375_v62, %v5376_v61 }
 0x395   : > { %v5369_v50 = vpop.permute.xlu0 %5368 }
 0x396   : > { %v5371_v52 = vunpack.i.h.bf16 %v5369_v50  ;;  %v5370_v58 = vunpack.i.l.bf16 %v5369_v50 }
 0x397   : > { %v1221_v59 = vpop.permute.xlu1 %1220 }
 0x398   : > { %v5160_v44 = vpack.c.bf16 %v5371_v52, %v5370_v58 }
 0x399   : > { %v1475_v54 = vpop.permute.xlu0 %1474 }
 0x39a   : > { %5162 = vmatpush3.bf16.xpose.msk.msra.mxu1 %vm6161_vm8, %v5160_v44 }
 0x39b   : > { %v5379_v1 = vpop.permute.xlu1 %5378  ;;  %4744 = vmatprep.subr.mxu1 %v5627_v57 }
 0x39c   : > { %v5381_v2 = vunpack.i.h.bf16 %v5379_v1  ;;  %v5380_v3 = vunpack.i.l.bf16 %v5379_v1 }
 0x39d   : > { %v5384_v5 = vpop.permute.xlu0 %5383 }
 0x39e   : > { %v1480_v8 = vsel %vm1478_vm9, %v5380_v3, %v5381_v2  ;;  %v5386_v14 = vunpack.i.h.bf16 %v5384_v5  ;;  %v5385_v15 = vunpack.i.l.bf16 %v5384_v5 }
 0x39f   : > { %v5167_v9 = vpack.c.bf16 %v1480_v8, %v1479_v6  ;;  %v1477_v10 = vpop.permute.xlu1 %1476 }
 0x3a0   : > { %v1481_v17 = vsel %vm1478_vm9, %v1475_v54, %v1477_v10 }
 0x3a1   : > { %5169 = vmatpush3.bf16.xpose.msk.msra.mxu0 %vm6161_vm8, %v5167_v9  ;;  %v1463_v11 = vpop.permute.xlu0 %1462 }
 0x3a2   : > { %4745 = vmatpush3.xpose.msk.msra.mxu1 %vm1222_vm7, %v1221_v59  ;;  %4774 = vmatprep.subr.mxu0 %v5627_v57 }
 0x3a3   : > { %v1461_v12 = vpop.permute.xlu1 %1460  ;;  %5163 = vmatprep.subr.bf16.mxu1 %v5626_v45 }
 0x3a5   : > { %v1737_v13 = vpop.permute.xlu0 %1736  ;;  %4747 = vmatmul.mubr.msk.f32.vlgmr.msra.gmra.mrb[10].mxu1 %vm1222_vm7, %v5989_v43  ;;  %v5174_v43 = vpack.c.bf16 %v5386_v14, %v5385_v15 }
 0x3a6   : > { %4749 = vmatprep.mubr.msk.f32.mxu1 %vm5628_vm5, %v5627_v57 }
 0x3a7   : > { %v1465_v16 = vpop.permute.xlu1 %1464 }
 0x3a9   : > { %4775 = vmatpush3.xpose.msk.msra.mxu0 %vm1222_vm7, %v1481_v17  ;;  %v1727_v18 = vpop.permute.xlu0 %1726  ;;  %4750 = vmatmul.mubr.msk.f32.gmra.mrb[12].mxu1 %vm1222_vm7, %v6000_v53 }
 0x3aa   : > { %4752 = vmatprep.mubr.msk.f32.mxu1 %vm5628_vm5, %v5627_v57  ;;  %5173 = vmatprep.subr.bf16.mxu0 %v5626_v45 }
 0x3ab   : > { %v5389_v19 = vpop.permute.xlu1 %5388 }
 0x3ac   : > { %4777 = vmatmul.mubr.msk.f32.vlgmr.msra.gmra.mrb[10].mxu0 %vm1222_vm7, %v1461_v12  ;;  %v5391_v22 = vunpack.i.h.bf16 %v5389_v19 }
 0x3ad   : > { %v1731_v20 = vpop.permute.xlu0 %1730  ;;  %4753 = vmatmul.mubr.msk.f32.gmra.mrb[14].mxu1 %vm1222_vm7, %v6016_v4  ;;  %5176 = vmatpush3.bf16.xpose.msk.msra.mxu0 %vm6161_vm8, %v5174_v43  ;;  %v5390_v4 = vunpack.i.l.bf16 %v5389_v19 }
 0x3ae   : > { %4779 = vmatprep.mubr.msk.f32.mxu0 %vm5628_vm5, %v5627_v57  ;;  %4804 = vmatprep.subr.mxu0 %v5627_v57 }
 0x3af   : > { %v1729_v53 = vpop.permute.xlu1 %1728  ;;  %4761 = vmatprep.mubr.msk.f32.mxu1 %vm5628_vm5, %v5627_v57  ;;  %v5181_v55 = vpack.c.bf16 %v5391_v22, %v5390_v4 }
 0x3b0   : > { %4780 = vmatmul.mubr.msk.f32.gmra.mrb[12].mxu0 %vm1222_vm7, %v1463_v11 }
 0x3b1   : > { %v5394_v21 = vpop.permute.xlu0 %5393  ;;  %4782 = vmatprep.mubr.msk.f32.mxu0 %vm5628_vm5, %v5627_v57 }
 0x3b2   : > { %v5396_v41 = vunpack.i.h.bf16 %v5394_v21  ;;  %v5395_v42 = vunpack.i.l.bf16 %v5394_v21 }
 0x3b3   : > { %v2006_v23 = vpop.permute.xlu1 %2005 }
 0x3b4   : > { %4783 = vmatmul.mubr.msk.f32.gmra.mrb[14].mxu0 %vm1222_vm7, %v1465_v16  ;;  %v5188_v51 = vpack.c.bf16 %v5396_v41, %v5395_v42 }
 0x3b5   : > { %v1998_v24 = vpop.permute.xlu0 %1997  ;;  %4805 = vmatpush3.xpose.msk.msra.mxu0 %vm1222_vm7, %v1737_v13  ;;  %4806 = vmatprep.mubr.msk.f32.mxu0 %vm5628_vm5, %v5627_v57 }
 0x3b6   : > { %5180 = vmatprep.subr.bf16.mxu0 %v5626_v45 }
 0x3b7   : > { %v1996_v25 = vpop.permute.xlu1 %1995 }
 0x3b8   : > { %4807 = vmatmul.mubr.msk.f32.vlgmr.msra.gmra.mrb[16].mxu0 %vm1222_vm7, %v1727_v18 }
 0x3b9   : > { %v2264_v28 = vpop.permute.xlu0 %2263  ;;  %5183 = vmatpush3.bf16.xpose.msk.msra.mxu0 %vm6161_vm8, %v5181_v55  ;;  %4809 = vmatprep.mubr.msk.f32.mxu0 %vm5628_vm5, %v5627_v57 }
 0x3ba   : > { %4834 = vmatprep.subr.mxu0 %v5627_v57 }
 0x3bb   : > { %v2000_v32 = vpop.permute.xlu1 %1999 }
 0x3bc   : > { %4810 = vmatmul.mubr.msk.f32.gmra.mrb[18].mxu0 %vm1222_vm7, %v1729_v53 }
 0x3bd   : > { %v5404_v39 = vpop.permute.xlu0 %5403  ;;  %4812 = vmatprep.mubr.msk.f32.mxu0 %vm5628_vm5, %v5627_v57 }
 0x3be   : > { %v5406_v54 = vunpack.i.h.bf16 %v5404_v39  ;;  %v5405_v61 = vunpack.i.l.bf16 %v5404_v39 }
 0x3bf   : > { %v5399_v47 = vpop.permute.xlu1 %5398 }
 0x3c0   : > { %4813 = vmatmul.mubr.msk.f32.gmra.mrb[20].mxu0 %vm1222_vm7, %v1731_v20  ;;  %v5401_v58 = vunpack.i.h.bf16 %v5399_v47  ;;  %v5400_v59 = vunpack.i.l.bf16 %v5399_v47  ;;  %v2521_v3 = vsel %vm1478_vm9, %v5405_v61, %v5406_v54 }
 0x3c1   : > { %v2519_v49 = vpop.permute.xlu0 %2518  ;;  %4835 = vmatpush3.xpose.msk.msra.mxu0 %vm1222_vm7, %v2006_v23  ;;  %4836 = vmatprep.mubr.msk.f32.mxu0 %vm5628_vm5, %v5627_v57 }
 0x3c2   : > { %5187 = vmatprep.subr.bf16.mxu0 %v5626_v45  ;;  %v2520_v1 = vsel %vm1478_vm9, %v5400_v59, %v5401_v58 }
 0x3c3   : > { %v2517_v48 = vpop.permute.xlu1 %2516  ;;  %v5195_v5 = vpack.c.bf16 %v2521_v3, %v2520_v1 }
 0x3c4   : > { %4837 = vmatmul.mubr.msk.f32.vlgmr.msra.gmra.mrb[22].mxu0 %vm1222_vm7, %v1996_v25  ;;  %v2522_v13 = vsel %vm1478_vm9, %v2517_v48, %v2519_v49 }
 0x3c5   : > { %v2503_v50 = vpop.permute.xlu0 %2502  ;;  %5190 = vmatpush3.bf16.xpose.msk.msra.mxu0 %vm6161_vm8, %v5188_v51  ;;  %4839 = vmatprep.mubr.msk.f32.mxu0 %vm5628_vm5, %v5627_v57 }
 0x3c6   : > { %4864 = vmatprep.subr.mxu0 %v5627_v57 }
 0x3c7   : > { %v5409_v52 = vpop.permute.xlu1 %5408 }
 0x3c8   : > { %4840 = vmatmul.mubr.msk.f32.gmra.mrb[24].mxu0 %vm1222_vm7, %v1998_v24  ;;  %v5411_v11 = vunpack.i.h.bf16 %v5409_v52  ;;  %v5410_v12 = vunpack.i.l.bf16 %v5409_v52 }
 0x3c9   : > { %v2507_v44 = vpop.permute.xlu0 %2506  ;;  %4842 = vmatprep.mubr.msk.f32.mxu0 %vm5628_vm5, %v5627_v57 }
 0x3cb   : > { %v2505_v62 = vpop.permute.xlu1 %2504 }
 0x3cc   : > { %4843 = vmatmul.mubr.msk.f32.gmra.mrb[26].mxu0 %vm1222_vm7, %v2000_v32 }
 0x3cd   : > { %v5414_v2 = vpop.permute.xlu0 %5413  ;;  %4865 = vmatpush3.xpose.msk.msra.mxu0 %vm1222_vm7, %v2264_v28  ;;  %4866 = vmatprep.mubr.msk.f32.mxu0 %vm5628_vm5, %v5627_v57 }
 0x3ce   : > { %5194 = vmatprep.subr.bf16.mxu0 %v5626_v45  ;;  %v5416_v18 = vunpack.i.h.bf16 %v5414_v2  ;;  %v5415_v43 = vunpack.i.l.bf16 %v5414_v2 }
 0x3cf   : > { %v2776_v6 = vpop.permute.xlu1 %2775 }
 0x3d0   : > { %4867 = vmatmul.mubr.msk.f32.vlgmr.msra.gmra.mrb[28].mxu0 %vm1222_vm7, %v6089_v38  ;;  %v5209_v22 = vpack.c.bf16 %v5416_v18, %v5415_v43 }
 0x3d1   : > { %v2768_v8 = vpop.permute.xlu0 %2767  ;;  %5197 = vmatpush3.bf16.xpose.msk.msra.mxu0 %vm6161_vm8, %v5195_v5  ;;  %4869 = vmatprep.mubr.msk.f32.mxu0 %vm5628_vm5, %v5627_v57 }
 0x3d2   : > { %4894 = vmatprep.subr.mxu0 %v5627_v57 }
 0x3d3   : > { %v2766_v9 = vpop.permute.xlu1 %2765 }
 0x3d4   : > { %4870 = vmatmul.mubr.msk.f32.gmra.mrb[30].mxu0 %vm1222_vm7, %v6084_v46  ;;  %v5202_v46 = vpack.c.bf16 %v5411_v11, %v5410_v12 }
 0x3d5   : > { %v3046_v10 = vpop.permute.xlu0 %3045  ;;  %4872 = vmatprep.mubr.msk.f32.mxu0 %vm5628_vm5, %v5627_v57 }
 0x3d7   : > { %v2770_v38 = vpop.permute.xlu1 %2769 }
 0x3d8   : > { %4873 = vmatmul.mubr.msk.f32.gmra.mrb[32].mxu0 %vm1222_vm7, %v6076_v40 }
 0x3d9   : > { %v3038_v14 = vpop.permute.xlu0 %3037  ;;  %4895 = vmatpush3.xpose.msk.msra.mxu0 %vm1222_vm7, %v2522_v13  ;;  %4896 = vmatprep.mubr.msk.f32.mxu0 %vm5628_vm5, %v5627_v57 }
 0x3da   : > { %5201 = vmatprep.subr.bf16.mxu0 %v5626_v45 }
 0x3db   : > { %v3036_v15 = vpop.permute.xlu1 %3035 }
 0x3dc   : > { %4897 = vmatmul.mubr.msk.f32.vlgmr.msra.gmra.mrb[34].mxu0 %vm1222_vm7, %v2503_v50 }
 0x3dd   : > { %v1361_v16 = vpop.permute.xlu0 %1360  ;;  %5204 = vmatpush3.bf16.xpose.msk.msra.mxu0 %vm6161_vm8, %v5202_v46  ;;  %4899 = vmatprep.mubr.msk.f32.mxu0 %vm5628_vm5, %v5627_v57 }
 0x3de   : > { %4924 = vmatprep.subr.mxu0 %v5627_v57 }
 0x3df   : > { %v3040_v40 = vpop.permute.xlu1 %3039 }
 0x3e0   : > { %4900 = vmatmul.mubr.msk.f32.gmra.mrb[36].mxu0 %vm1222_vm7, %v2505_v62 }
 0x3e1   : > { %v6259_v17 = vpop.permute.xlu0 %5423  ;;  %4902 = vmatprep.mubr.msk.f32.mxu0 %vm5628_vm5, %v5627_v57 }
 0x3e3   : > { %v5419_v19 = vpop.permute.xlu1 %5418 }
 0x3e4   : > { %v5421_v20 = vunpack.i.h.bf16 %v5419_v19  ;;  %v5420_v53 = vunpack.i.l.bf16 %v5419_v19  ;;  %4903 = vmatmul.mubr.msk.f32.gmra.mrb[38].mxu0 %vm1222_vm7, %v2507_v44 }
 0x3e5   : > { %4925 = vmatpush3.xpose.msk.msra.mxu0 %vm1222_vm7, %v2776_v6  ;;  %4926 = vmatprep.mubr.msk.f32.mxu0 %vm5628_vm5, %v5627_v57  ;;  %v5429_v4 = vpop.permute.xlu0 %5428 }
 0x3e6   : > { %v5164_v21 = vpack.c.bf16 %v5421_v20, %v5420_v53  ;;  %5208 = vmatprep.subr.bf16.mxu0 %v5626_v45  ;;  %v5431_v24 = vunpack.i.h.bf16 %v5429_v4  ;;  %v5430_v55 = vunpack.i.l.bf16 %v5429_v4 }
 0x3e7   : > { %v6268_v23 = vpop.permute.xlu1 %1614 }
 0x3e8   : > { %5165 = vmatpush3.bf16.msra.mxu1 %v5164_v21  ;;  %4927 = vmatmul.mubr.msk.f32.vlgmr.msra.gmra.mrb[40].mxu0 %vm1222_vm7, %v2766_v9  ;;  %v6283_v60 = vsel %vm1881_vm11, %v5430_v55, %v5431_v24 }
 0x3e9   : > { %5211 = vmatpush3.bf16.xpose.msk.msra.mxu0 %vm6161_vm8, %v5209_v22  ;;  %4759 = vmatprep.subr.mxu1 %v5627_v57  ;;  %v1880_v41 = vpop.permute.xlu0 %1879 }
 0x3ea   : > { %4929 = vmatprep.mubr.msk.f32.mxu0 %vm5628_vm5, %v5627_v57  ;;  %4954 = vmatprep.subr.mxu0 %v5627_v57 }
 0x3eb   : > { %v5434_v25 = vpop.permute.xlu1 %5433 }
 0x3ec   : > { %v5436_v28 = vunpack.i.h.bf16 %v5434_v25  ;;  %v5435_v32 = vunpack.i.l.bf16 %v5434_v25  ;;  %4760 = vmatpush3.msk.msra.mxu1 %vm1373_vm10, %v1361_v16  ;;  %4930 = vmatmul.mubr.msk.f32.gmra.mrb[42].mxu0 %vm1222_vm7, %v2768_v8 }
 0x3ed   : > { %4932 = vmatprep.mubr.msk.f32.mxu0 %vm5628_vm5, %v5627_v57  ;;  %5170 = vmatprep.subr.bf16.mxu1 %v5626_v45 }
 0x3ee   : > { %v6286_v39 = vsel %vm1881_vm11, %v5435_v32, %v5436_v28 }
 0x3ef   : > { %v5178_v42 = vpack.c.bf16 %v6286_v39, %v6283_v60  ;;  %v1878_v47 = vpop.permute.xlu1 %1877 }
 0x3f0   : > { %v6291_v49 = vsel %vm1881_vm11, %v1878_v47, %v1880_v41  ;;  %4933 = vmatmul.mubr.msk.f32.gmra.mrb[44].mxu0 %vm1222_vm7, %v2770_v38 }
 0x3f1   : > { %4955 = vmatpush3.xpose.msk.msra.mxu0 %vm1222_vm7, %v3046_v10  ;;  %4956 = vmatprep.mubr.msk.f32.mxu0 %vm5628_vm5, %v5627_v57 }
 0x3f2   : > { %5215 = vmatprep.subr.bf16.mxu0 %v5626_v45 }
 0x3f4   : > { %4957 = vmatmul.mubr.msk.f32.vlgmr.msra.gmra.mrb[46].mxu0 %vm1222_vm7, %v3036_v15 }
 0x3f5   : > { %4959 = vmatprep.mubr.msk.f32.mxu0 %vm5628_vm5, %v5627_v57 }
 0x3f8   : > { %4960 = vmatmul.mubr.msk.f32.gmra.mrb[48].mxu0 %vm1222_vm7, %v3038_v14 }
 0x3f9   : > { %4962 = vmatprep.mubr.msk.f32.mxu0 %vm5628_vm5, %v5627_v57 }
 0x3fc   : > { %4963 = vmatmul.mubr.msk.f32.gmra.mrb[50].mxu0 %vm1222_vm7, %v3040_v40 }
 0x3fd   : > { %5004 = vmatprep.mubr.msk.f32.mxu0 %vm5628_vm5, %v5627_v57 }
 0x478   : > { %v1301_v51 = vpop.f32.mrb[10].mxu1 }
 0x479   : > { %v6307_v48 = vmul.f32 0.20412415, %v1301_v51  ;;  %v4748_v50 = vpop.f32.mrb[11].mxu1 }
 0x47b   : > { %v1319_v52 = vsel %vm1318_vm12, %v6307_v48, -inf }
 0x47c   : > { %1320 = vmax.xlane.f32.xlu0 %v1319_v52  ;;  %v1306_v58 = vpop.f32.mrb[12].mxu1 }
 0x47d   : > { %v6311_v59 = vmul.f32 0.20412415, %v1306_v58  ;;  %v4751_v44 = vpop.f32.mrb[13].mxu1 }
 0x47f   : > { %v1560_v54 = vpop.f32.mrb[10].mxu0  ;;  %v1322_v61 = vsel %vm1318_vm12, %v6311_v59, -inf }
 0x480   : > { %v6315_v62 = vmul.f32 0.20412415, %v1560_v54  ;;  %v4778_v1 = vpop.f32.mrb[11].mxu0  ;;  %1323 = vmax.xlane.f32.xlu1 %v1322_v61  ;;  %v1311_v2 = vpop.f32.mrb[14].mxu1 }
 0x481   : > { %v4754_v3 = vpop.f32.mrb[15].mxu1  ;;  %v6321_v10 = vmul.f32 0.20412415, %v1311_v2 }
 0x482   : > { %v1577_v5 = vsel %vm1318_vm12, %v6315_v62, -inf }
 0x483   : > { %v1565_v6 = vpop.f32.mrb[12].mxu0  ;;  %1578 = vmax.xlane.f32.xlu0 %v1577_v5  ;;  %v1326_v13 = vsel %vm1325_vm13, %v6321_v10, -inf }
 0x484   : > { %v6319_v8 = vmul.f32 0.20412415, %v1565_v6  ;;  %v4781_v9 = vpop.f32.mrb[13].mxu0 }
 0x486   : > { %v1580_v11 = vsel %vm1318_vm12, %v6319_v8, -inf }
 0x487   : > { %v1570_v12 = vpop.f32.mrb[14].mxu0  ;;  %1581 = vmax.xlane.f32.xlu0 %v1580_v11 }
 0x488   : > { %v4784_v38 = vpop.f32.mrb[15].mxu0  ;;  %v6333_v50 = vmul.f32 0.20412415, %v1570_v12 }
 0x48a   : > { %v1583_v61 = vsel %vm1325_vm13, %v6333_v50, -inf }
 0x48b   : > { %v1816_v14 = vpop.f32.mrb[16].mxu0  ;;  %1327 = vmax.xlane.f32.xlu0 %v1326_v13 }
 0x48c   : > { %v4808_v46 = vpop.f32.mrb[17].mxu0 }
 0x48f   : > { %v1821_v15 = vpop.f32.mrb[18].mxu0 }
 0x490   : > { %v4811_v16 = vpop.f32.mrb[19].mxu0  ;;  %v6335_v44 = vmul.f32 0.20412415, %v1821_v15 }
 0x491   : > { %2404 = vrot.lane.b32.xlu1 %v6048_v63, %s5636_s30 }
 0x492   : > { %v1836_v5 = vsel %vm1318_vm12, %v6335_v44, -inf }
 0x493   : > { %v1826_v40 = vpop.f32.mrb[20].mxu0 }
 0x494   : > { %v4814_v18 = vpop.f32.mrb[21].mxu0  ;;  %v6345_v6 = vmul.f32 0.20412415, %v1826_v40 }
 0x495   : > { %5448 = vrot.lane.b32.xlu1 %v6066_v7, %s5637_s21 }
 0x496   : > { %v1839_v15 = vsel %vm1325_vm13, %v6345_v6, -inf }
 0x497   : > { %v2085_v43 = vpop.f32.mrb[22].mxu0 }
 0x498   : > { %v4838_v19 = vpop.f32.mrb[23].mxu0  ;;  %v6341_v2 = vmul.f32 0.20412415, %v2085_v43 }
 0x49a   : > { %v2102_v13 = vsel %vm1318_vm12, %v6341_v2, -inf }
 0x49b   : > { %v2090_v20 = vpop.f32.mrb[24].mxu0 }
 0x49c   : > { %v4841_v53 = vpop.f32.mrb[25].mxu0 }
 0x49f   : > { %v2095_v21 = vpop.f32.mrb[26].mxu0 }
 0x4a0   : > { %v4844_v22 = vpop.f32.mrb[27].mxu0  ;;  %v6349_v12 = vmul.f32 0.20412415, %v2095_v21 }
 0x4a1   : > { %5443 = vrot.lane.b32.xlu0 %v6066_v7, %s5636_s30  ;;  %v6339_v7 = vmul.f32 0.20412415, %v1816_v14  ;;  %v6353_v14 = vmul.f32 0.20412415, %v2090_v20 }
 0x4a2   : > { %v2108_v18 = vsel %vm1325_vm13, %v6349_v12, -inf }
 0x4a3   : > { %v2343_v4 = vpop.f32.mrb[28].mxu0  ;;  %v1833_v11 = vsel %vm1318_vm12, %v6339_v7, -inf  ;;  %v2105_v53 = vsel %vm1318_vm12, %v6353_v14, -inf }
 0x4a4   : > { %v4868_v24 = vpop.f32.mrb[29].mxu0  ;;  %v6361_v43 = vmul.f32 0.20412415, %v2343_v4 }
 0x4a7   : > { %v2348_v55 = vpop.f32.mrb[30].mxu0 }
 0x4a8   : > { %v4871_v25 = vpop.f32.mrb[31].mxu0  ;;  %v6357_v16 = vmul.f32 0.20412415, %v2348_v55 }
 0x4a9   : > { %v2360_v25 = vsel %vm1318_vm12, %v6361_v43, -inf }
 0x4aa   : > { %v2363_v22 = vsel %vm1318_vm12, %v6357_v16, -inf }
 0x4ab   : > { %v2353_v28 = vpop.f32.mrb[32].mxu0 }
 0x4ac   : > { %v4874_v32 = vpop.f32.mrb[33].mxu0  ;;  %v6369_v24 = vmul.f32 0.20412415, %v2353_v28 }
 0x4af   : > { %v2601_v41 = vpop.f32.mrb[34].mxu0 }
 0x4b0   : > { %v4898_v47 = vpop.f32.mrb[35].mxu0  ;;  %v6365_v20 = vmul.f32 0.20412415, %v2601_v41 }
 0x4b2   : > { %v2618_v41 = vsel %vm1318_vm12, %v6365_v20, -inf }
 0x4b3   : > { %v2606_v51 = vpop.f32.mrb[36].mxu0 }
 0x4b4   : > { %v4901_v52 = vpop.f32.mrb[37].mxu0  ;;  %v6377_v47 = vmul.f32 0.20412415, %v2606_v51 }
 0x4b7   : > { %v2611_v58 = vpop.f32.mrb[38].mxu0 }
 0x4b8   : > { %v4904_v54 = vpop.f32.mrb[39].mxu0  ;;  %v6373_v4 = vmul.f32 0.20412415, %v2611_v58 }
 0x4b9   : > { %1584 = vmax.xlane.f32.xlu1 %v1583_v61  ;;  %v2366_v54 = vsel %vm1325_vm13, %v6369_v24, -inf }
 0x4ba   : > { %v2624_v58 = vsel %vm1325_vm13, %v6373_v4, -inf }
 0x4bb   : > { %v2855_v1 = vpop.f32.mrb[40].mxu0 }
 0x4bc   : > { %v4928_v3 = vpop.f32.mrb[41].mxu0 }
 0x4bd   : > { %1837 = vmax.xlane.f32.xlu1 %v1836_v5  ;;  %v6385_v3 = vmul.f32 0.20412415, %v2855_v1  ;;  %v2621_v5 = vsel %vm1318_vm12, %v6377_v47, -inf }
 0x4bf   : > { %v2860_v9 = vpop.f32.mrb[42].mxu0 }
 0x4c0   : > { %v4931_v38 = vpop.f32.mrb[43].mxu0  ;;  %1834 = vmax.xlane.f32.xlu0 %v1833_v11  ;;  %v6381_v28 = vmul.f32 0.20412415, %v2860_v9 }
 0x4c1   : > { %2103 = vmax.xlane.f32.xlu1 %v2102_v13  ;;  %v2872_v38 = vsel %vm1318_vm12, %v6385_v3, -inf }
 0x4c2   : > { %v2875_v51 = vsel %vm1318_vm12, %v6381_v28, -inf }
 0x4c3   : > { %v2865_v46 = vpop.f32.mrb[44].mxu0 }
 0x4c4   : > { %v4934_v40 = vpop.f32.mrb[45].mxu0  ;;  %1840 = vmax.xlane.f32.xlu0 %v1839_v15  ;;  %v6393_v9 = vmul.f32 0.20412415, %v2865_v46 }
 0x4c5   : > { %2109 = vmax.xlane.f32.xlu1 %v2108_v18 }
 0x4c6   : > { %v2878_v15 = vsel %vm1325_vm13, %v6393_v9, -inf }
 0x4c7   : > { %v3125_v19 = vpop.f32.mrb[46].mxu0 }
 0x4c8   : > { %v4958_v21 = vpop.f32.mrb[47].mxu0  ;;  %2106 = vmax.xlane.f32.xlu0 %v2105_v53  ;;  %v6389_v11 = vmul.f32 0.20412415, %v3125_v19  ;;  %v6409_v19 = vpop.permute.xlu0 %5438 }
 0x4c9   : > { %2364 = vmax.xlane.f32.xlu1 %v2363_v22  ;;  %v6411_v53 = vpop.permute.xlu1 %2139 }
 0x4ca   : > { %v3142_v1 = vsel %vm1318_vm12, %v6389_v11, -inf }
 0x4cb   : > { %v3130_v55 = vpop.f32.mrb[48].mxu0 }
 0x4cc   : > { %v4961_v32 = vpop.f32.mrb[49].mxu0  ;;  %2361 = vmax.xlane.f32.xlu0 %v2360_v25  ;;  %v6397_v13 = vmul.f32 0.20412415, %v3130_v55 }
 0x4cd   : > { %2619 = vmax.xlane.f32.xlu1 %v2618_v41 }
 0x4ce   : > { %v3145_v46 = vsel %vm1318_vm12, %v6397_v13, -inf }
 0x4cf   : > { %v3135_v52 = vpop.f32.mrb[50].mxu0 }
 0x4d0   : > { %v4964_v61 = vpop.f32.mrb[51].mxu0  ;;  %2367 = vmax.xlane.f32.xlu0 %v2366_v54  ;;  %v6403_v40 = vmul.f32 0.20412415, %v3135_v52 }
 0x4d1   : > { %2625 = vmax.xlane.f32.xlu1 %v2624_v58 }
 0x4d2   : > { %v3148_v18 = vsel %vm1325_vm13, %v6403_v40, -inf }
 0x4d4   : > { %2622 = vmax.xlane.f32.xlu0 %v2621_v5 }
 0x4d5   : > { %2876 = vmax.xlane.f32.xlu1 %v2875_v51 }
 0x4d8   : > { %2873 = vmax.xlane.f32.xlu0 %v2872_v38 }
 0x4d9   : > { %3143 = vmax.xlane.f32.xlu1 %v3142_v1 }
 0x4dc   : > { %2879 = vmax.xlane.f32.xlu0 %v2878_v15 }
 0x4dd   : > { %3146 = vmax.xlane.f32.xlu1 %v3145_v46 }
 0x4e1   : > { %3149 = vmax.xlane.f32.xlu1 %v3148_v18 }
 0x509   : > { %v1321_v21 = vpop.xlane.xlu0 %1320 }
 0x50a   : > { %v1329_v22 = vsub.f32 %v6307_v48, %v1321_v21 }
 0x50c   : > { %v1332_v55 = vmul.f32 1.442695, %v1329_v22 }
 0x50d   : > { %v1324_v25 = vpop.xlane.xlu1 %1323 }
 0x50e   : > { %5477 = vpow2.f32 %v1332_v55  ;;  %v1330_v32 = vsub.f32 %v6311_v59, %v1324_v25 }
 0x510   : > { %v1334_v41 = vmul.f32 1.442695, %v1330_v32  ;;  %v1579_v52 = vpop.xlane.xlu0 %1578 }
 0x511   : > { %v1586_v54 = vsub.f32 %v6315_v62, %v1579_v52  ;;  %v6446_v25 = vpop.permute.xlu1 %2404 }
 0x512   : > { %5479 = vpow2.f32 %v1334_v41 }
 0x513   : > { %v1589_v61 = vmul.f32 1.442695, %v1586_v54 }
 0x514   : > { %v1582_v58 = vpop.xlane.xlu0 %1581 }
 0x515   : > { %5481 = vpow2.f32 %v1589_v61  ;;  %v1587_v5 = vsub.f32 %v6319_v8, %v1582_v58  ;;  %v6448_v32 = vpop.permute.xlu1 %5448 }
 0x517   : > { %v1591_v51 = vmul.f32 1.442695, %v1587_v5 }
 0x518   : > { %v6417_v38 = vpop.eup %5477  ;;  %v1328_v1 = vpop.xlane.xlu0 %1327 }
 0x519   : > { %5483 = vpow2.f32 %v1591_v51  ;;  %v1331_v48 = vsub.f32 %v6321_v10, %v1328_v1  ;;  %v1338_v59 = vsel %vm1318_vm12, %v6417_v38, 0.0 }
 0x51a   : > { %1339 = vadd.xlane.f32.xlu0 %v1338_v59 }
 0x51b   : > { %v1336_v15 = vmul.f32 1.442695, %v1331_v48 }
 0x51c   : > { %v6422_v46 = vpop.eup %5479  ;;  %v6451_v54 = vpop.permute.xlu0 %5443 }
 0x51d   : > { %5485 = vpow2.f32 %v1336_v15  ;;  %v1341_v62 = vsel %vm1318_vm12, %v6422_v46, 0.0 }
 0x51e   : > { %1342 = vadd.xlane.f32.xlu0 %v1341_v62 }
 0x51f   : > { %v6426_v8 = vpop.eup %5481 }
 0x520   : > { %v1595_v18 = vsel %vm1318_vm12, %v6426_v8, 0.0 }
 0x521   : > { %1596 = vadd.xlane.f32.xlu1 %v1595_v18 }
 0x523   : > { %v6430_v21 = vpop.eup %5483 }
 0x524   : > { %v1598_v10 = vsel %vm1318_vm12, %v6430_v21, 0.0 }
 0x525   : > { %1599 = vadd.xlane.f32.xlu0 %v1598_v10 }
 0x527   : > { %v6434_v22 = vpop.eup %5485 }
 0x528   : > { %v1344_v55 = vsel %vm1325_vm13, %v6434_v22, 0.0 }
 0x529   : > { %1345 = vadd.xlane.f32.xlu0 %v1344_v55 }
 0x532   : > { %5453 = vrot.lane.b32.xlu1 %v5452_v56, %s5638_s20 }
 0x536   : > { %5458 = vrot.lane.b32.xlu1 %v5457_v36, %s5638_s20 }
 0x546   : > { %v1585_v41 = vpop.xlane.xlu1 %1584 }
 0x547   : > { %v1588_v52 = vsub.f32 %v6333_v50, %v1585_v41 }
 0x549   : > { %v1593_v61 = vmul.f32 1.442695, %v1588_v52 }
 0x54a   : > { %v1838_v58 = vpop.xlane.xlu1 %1837 }
 0x54b   : > { %5487 = vpow2.f32 %v1593_v61  ;;  %v1843_v27 = vsub.f32 %v6335_v44, %v1838_v58 }
 0x54d   : > { %v1847_v56 = vmul.f32 1.442695, %v1843_v27  ;;  %v1835_v5 = vpop.xlane.xlu0 %1834 }
 0x54e   : > { %v1842_v51 = vsub.f32 %v6339_v7, %v1835_v5  ;;  %v2104_v0 = vpop.xlane.xlu1 %2103 }
 0x54f   : > { %5489 = vpow2.f32 %v1847_v56  ;;  %v2111_v36 = vsub.f32 %v6341_v2, %v2104_v0 }
 0x550   : > { %v1845_v1 = vmul.f32 1.442695, %v1842_v51 }
 0x551   : > { %v2114_v48 = vmul.f32 1.442695, %v2111_v36  ;;  %v1841_v5 = vpop.xlane.xlu0 %1840 }
 0x552   : > { %5491 = vpow2.f32 %v1845_v1  ;;  %v2110_v59 = vpop.xlane.xlu1 %2109  ;;  %v1844_v1 = vsub.f32 %v6345_v6, %v1841_v5 }
 0x553   : > { %5493 = vpow2.f32 %v2114_v48  ;;  %v2113_v50 = vsub.f32 %v6349_v12, %v2110_v59 }
 0x554   : > { %v1849_v59 = vmul.f32 1.442695, %v1844_v1 }
 0x555   : > { %v6457_v15 = vpop.eup %5487  ;;  %v2118_v62 = vmul.f32 1.442695, %v2113_v50  ;;  %v2107_v51 = vpop.xlane.xlu0 %2106 }
 0x556   : > { %v2365_v18 = vpop.xlane.xlu1 %2364  ;;  %v1601_v44 = vsel %vm1325_vm13, %v6457_v15, 0.0  ;;  %v2112_v50 = vsub.f32 %v6353_v14, %v2107_v51 }
 0x557   : > { %5495 = vpow2.f32 %v2118_v62  ;;  %v2370_v7 = vsub.f32 %v6357_v16, %v2365_v18  ;;  %1602 = vadd.xlane.f32.xlu0 %v1601_v44 }
 0x558   : > { %v2116_v18 = vmul.f32 1.442695, %v2112_v50 }
 0x559   : > { %v6462_v10 = vpop.eup %5489  ;;  %v2374_v2 = vmul.f32 1.442695, %v2370_v7  ;;  %v2362_v36 = vpop.xlane.xlu0 %2361 }
 0x55a   : > { %v1854_v55 = vsel %vm1318_vm12, %v6462_v10, 0.0  ;;  %v2620_v0 = vpop.xlane.xlu1 %2619  ;;  %v2369_v44 = vsub.f32 %v6361_v43, %v2362_v36 }
 0x55b   : > { %5497 = vpow2.f32 %v2374_v2  ;;  %1855 = vadd.xlane.f32.xlu1 %v1854_v55  ;;  %v2627_v2 = vsub.f32 %v6365_v20, %v2620_v0 }
 0x55c   : > { %v6466_v12 = vpop.eup %5491  ;;  %5499 = vpow2.f32 %v1849_v59 }
 0x55d   : > { %v6468_v41 = vpop.eup %5493  ;;  %v1851_v52 = vsel %vm1318_vm12, %v6466_v12, 0.0  ;;  %v2368_v62 = vpop.xlane.xlu0 %2367  ;;  %5501 = vpow2.f32 %v2116_v18 }
 0x55e   : > { %1852 = vadd.xlane.f32.xlu0 %v1851_v52  ;;  %v2120_v16 = vsel %vm1318_vm12, %v6468_v41, 0.0  ;;  %v2626_v48 = vpop.xlane.xlu1 %2625  ;;  %v2372_v52 = vmul.f32 1.442695, %v2369_v44 }
 0x55f   : > { %2121 = vadd.xlane.f32.xlu1 %v2120_v16  ;;  %v2630_v16 = vmul.f32 1.442695, %v2627_v2  ;;  %v2629_v6 = vsub.f32 %v6373_v4, %v2626_v48 }
 0x560   : > { %5503 = vpow2.f32 %v2372_v52 }
 0x561   : > { %v6474_v61 = vpop.eup %5495  ;;  %v2623_v55 = vpop.xlane.xlu0 %2622  ;;  %5505 = vpow2.f32 %v2630_v16  ;;  %v2634_v5 = vmul.f32 1.442695, %v2629_v6 }
 0x562   : > { %v2126_v58 = vsel %vm1325_vm13, %v6474_v61, 0.0  ;;  %v2877_v7 = vpop.xlane.xlu1 %2876  ;;  %v2628_v14 = vsub.f32 %v6377_v47, %v2623_v55 }
 0x563   : > { %2127 = vadd.xlane.f32.xlu1 %v2126_v58  ;;  %v2882_v47 = vsub.f32 %v6381_v28, %v2877_v7 }
 0x564   : > { %v2632_v20 = vmul.f32 1.442695, %v2628_v14 }
 0x565   : > { %v6478_v27 = vpop.eup %5497  ;;  %v2874_v51 = vpop.xlane.xlu0 %2873  ;;  %v2886_v18 = vmul.f32 1.442695, %v2882_v47 }
 0x566   : > { %v2381_v56 = vsel %vm1318_vm12, %v6478_v27, 0.0  ;;  %v3144_v58 = vpop.xlane.xlu1 %3143  ;;  %v6494_v36 = vpop.eup %5499  ;;  %v2881_v0 = vsub.f32 %v6385_v3, %v2874_v51 }
 0x567   : > { %2382 = vadd.xlane.f32.xlu1 %v2381_v56  ;;  %v3151_v43 = vsub.f32 %v6389_v11, %v3144_v58  ;;  %v1857_v4 = vsel %vm1325_vm13, %v6494_v36, 0.0  ;;  %v6499_v1 = vpop.eup %5501 }
 0x568   : > { %v2884_v48 = vmul.f32 1.442695, %v2881_v0  ;;  %v2123_v59 = vsel %vm1318_vm12, %v6499_v1, 0.0 }
 0x569   : > { %v2880_v11 = vpop.xlane.xlu0 %2879 }
 0x56a   : > { %v6504_v50 = vpop.eup %5503  ;;  %v2883_v44 = vsub.f32 %v6393_v9, %v2880_v11 }
 0x56b   : > { %v6506_v3 = vpop.eup %5505  ;;  %v2378_v2 = vsel %vm1318_vm12, %v6504_v50, 0.0 }
 0x56c   : > { %v2636_v7 = vsel %vm1318_vm12, %v6506_v3, 0.0  ;;  %v2888_v52 = vmul.f32 1.442695, %v2883_v44  ;;  %v5425_v44 = vunpack.i.l.bf16 %v6259_v17 }
 0x574   : > { %2655 = vrot.lane.b32.xlu0 %v6048_v63, %s5637_s21  ;;  %s7142_s21 = scalar_lea.vmem %s7105_s12, %s5741_s26 }
 0x578   : > { %2920 = vrot.lane.b32.xlu1 %v6048_v63, %s5638_s20  ;;  %v2371_v63 = vsub.f32 %v6369_v24, %v2368_v62  ;;  %v3154_v24 = vmul.f32 1.442695, %v3151_v43  ;;  %v3147_v62 = vpop.xlane.xlu1 %3146 }
 0x57a   : > { %v2376_v56 = vmul.f32 1.442695, %v2371_v63  ;;  %v3152_v63 = vsub.f32 %v6397_v13, %v3147_v62 }
 0x57c   : > { %5507 = vpow2.f32 %v2376_v56  ;;  %v3150_v16 = vpop.xlane.xlu1 %3149  ;;  %v3156_v14 = vmul.f32 1.442695, %v3152_v63 }
 0x57d   : > { %5509 = vpow2.f32 %v2634_v5  ;;  %v3153_v5 = vsub.f32 %v6403_v40, %v3150_v16 }
 0x57e   : > { %5511 = vpow2.f32 %v2632_v20 }
 0x57f   : > { %5513 = vpow2.f32 %v3154_v24  ;;  %v3158_v20 = vmul.f32 1.442695, %v3153_v5 }
 0x580   : > { %5515 = vpow2.f32 %v2884_v48 }
 0x581   : > { %5517 = vpow2.f32 %v2886_v18  ;;  %v5426_v18 = vunpack.i.h.bf16 %v6259_v17 }
 0x582   : > { %5519 = vpow2.f32 %v2888_v52 }
 0x583   : > { %5521 = vpow2.f32 %v3156_v14 }
 0x586   : > { %v6511_v28 = vpop.eup %5507 }
 0x587   : > { %v6515_v55 = vpop.eup %5509  ;;  %v2384_v9 = vsel %vm1325_vm13, %v6511_v28, 0.0 }
 0x588   : > { %v6520_v6 = vpop.eup %5511  ;;  %v2642_v58 = vsel %vm1325_vm13, %v6515_v55, 0.0 }
 0x589   : > { %v6524_v56 = vpop.eup %5513  ;;  %v2639_v13 = vsel %vm1318_vm12, %v6520_v6, 0.0 }
 0x58a   : > { %v6529_v51 = vpop.eup %5515  ;;  %v3160_v43 = vsel %vm1318_vm12, %v6524_v56, 0.0 }
 0x58b   : > { %v2890_v0 = vsel %vm1318_vm12, %v6529_v51, 0.0  ;;  %v6535_v24 = vpop.eup %5517 }
 0x58c   : > { %v2893_v40 = vsel %vm1318_vm12, %v6535_v24, 0.0  ;;  %v6539_v47 = vpop.eup %5519 }
 0x58d   : > { %v6543_v62 = vpop.eup %5521 }
 0x58e   : > { %v3163_v63 = vsel %vm1318_vm12, %v6543_v62, 0.0 }
 0x593   : > { %1858 = vadd.xlane.f32.xlu0 %v1857_v4 }
 0x597   : > { %2124 = vadd.xlane.f32.xlu0 %v2123_v59  ;;  %v2896_v59 = vsel %vm1325_vm13, %v6539_v47, 0.0 }
 0x59b   : > { %2379 = vadd.xlane.f32.xlu0 %v2378_v2 }
 0x59c   : > { %2637 = vadd.xlane.f32.xlu1 %v2636_v7 }
 0x59f   : > { %2385 = vadd.xlane.f32.xlu0 %v2384_v9 }
 0x5a0   : > { %2643 = vadd.xlane.f32.xlu1 %v2642_v58  ;;  %v5171_v58 = vpack.c.bf16 %v5426_v18, %v5425_v44 }
 0x5a3   : > { %2640 = vadd.xlane.f32.xlu0 %v2639_v13 }
 0x5a4   : > { %3161 = vadd.xlane.f32.xlu1 %v3160_v43 }
 0x5a7   : > { %2891 = vadd.xlane.f32.xlu0 %v2890_v0  ;;  %v1340_v4 = vpop.xlane.xlu0 %1339 }
 0x5a8   : > { %5523 = vrcp.f32 %v1340_v4 }
 0x5a9   : > { %5525 = vpow2.f32 %v3158_v20 }
 0x5ab   : > { %2894 = vadd.xlane.f32.xlu0 %v2893_v40  ;;  %v1343_v48 = vpop.xlane.xlu0 %1342 }
 0x5ac   : > { %5527 = vrcp.f32 %v1343_v48 }
 0x5ae   : > { %v1597_v11 = vpop.xlane.xlu1 %1596 }
 0x5af   : > { %2897 = vadd.xlane.f32.xlu0 %v2896_v59 }
 0x5b2   : > { %v5524_v2 = vpop.eup %5523  ;;  %v5454_v7 = vpop.permute.xlu1 %5453 }
 0x5b3   : > { %v1600_v52 = vpop.xlane.xlu0 %1599  ;;  %v6549_v16 = vpop.eup %5525  ;;  %v1348_v9 = vmul.f32 %v5524_v2, %v6417_v38  ;;  %3164 = vadd.xlane.f32.xlu0 %v3163_v63  ;;  %v5456_v14 = vunpack.i.h.bf16 %v5454_v7  ;;  %v5455_v5 = vunpack.i.l.bf16 %v5454_v7 }
 0x5b4   : > { %v3166_v20 = vsel %vm1325_vm13, %v6549_v16, 0.0 }
 0x5b5   : > { %5463 = vrot.lane.b32.xlu1 %v5462_v31, %s5639_s28  ;;  %4762 = vmatmul.mubr.msk.f32.vlgmr.msra.gmra.mrb[16].mxu1 %vm1318_vm12, %v1348_v9  ;;  %v6564_v30 = vsel %vm1881_vm11, %v5455_v5, %v5456_v14  ;;  %v5446_v5 = vunpack.i.h.bf16 %v6451_v54 }
 0x5b6   : > { %v5528_v17 = vpop.eup %5527  ;;  %5172 = vmatpush3.bf16.msra.mxu1 %v5171_v58  ;;  %v5459_v13 = vpop.permute.xlu1 %5458  ;;  %4764 = vmatprep.mubr.msk.f32.mxu1 %vm5628_vm5, %v5627_v57 }
 0x5b7   : > { %v1346_v43 = vpop.xlane.xlu0 %1345  ;;  %v5461_v38 = vunpack.i.h.bf16 %v5459_v13  ;;  %v5460_v0 = vunpack.i.l.bf16 %v5459_v13  ;;  %3167 = vadd.xlane.f32.xlu0 %v3166_v20  ;;  %4789 = vmatprep.subr.mxu1 %v5627_v57  ;;  %v1350_v26 = vmul.f32 %v5528_v17, %v6422_v46  ;;  %v5445_v17 = vunpack.i.l.bf16 %v6451_v54 }
 0x5b8   : > { %5529 = vrcp.f32 %v1346_v43 }
 0x5b9   : > { %5531 = vrcp.f32 %v1597_v11  ;;  %v6567_v31 = vsel %vm1881_vm11, %v5460_v0, %v5461_v38  ;;  %3179 = vrot.lane.b32.xlu1 %v6042_v29, %s5639_s28  ;;  %4765 = vmatmul.mubr.msk.f32.gmra.mrb[18].mxu1 %vm1318_vm12, %v1350_v26  ;;  %v5192_v0 = vpack.c.bf16 %v5446_v5, %v5445_v17 }
 0x5ba   : > { %v5206_v4 = vpack.c.bf16 %v6567_v31, %v6564_v30  ;;  %4790 = vmatpush3.msk.msra.mxu1 %vm1373_vm10, %v6268_v23  ;;  %4767 = vmatprep.mubr.msk.f32.mxu1 %vm5628_vm5, %v5627_v57  ;;  %5533 = vrcp.f32 %v1600_v52 }
 0x5bb   : > { %5177 = vmatprep.subr.bf16.mxu1 %v5626_v45 }
 0x5c2   : > { %v5530_v46 = vpop.eup %5529 }
 0x5c3   : > { %v1352_v40 = vmul.f32 %v5530_v46, %v6434_v22  ;;  %v5532_v48 = vpop.eup %5531 }
 0x5c4   : > { %v1605_v11 = vmul.f32 %v5532_v48, %v6426_v8  ;;  %v5534_v59 = vpop.eup %5533 }
 0x5c5   : > { %4768 = vmatmul.mubr.msk.f32.gmra.mrb[20].mxu1 %vm1318_vm12, %v1352_v40  ;;  %v1607_v23 = vmul.f32 %v5534_v59, %v6430_v21  ;;  %v5451_v59 = vunpack.i.h.bf16 %v6448_v32 }
 0x5c6   : > { %4791 = vmatprep.mubr.msk.f32.mxu1 %vm5628_vm5, %v5627_v57 }
 0x5c9   : > { %4792 = vmatmul.mubr.msk.f32.vlgmr.msra.gmra.mrb[22].mxu1 %vm1318_vm12, %v1605_v11 }
 0x5ca   : > { %5179 = vmatpush3.bf16.msra.mxu1 %v5178_v42  ;;  %4794 = vmatprep.mubr.msk.f32.mxu1 %vm5628_vm5, %v5627_v57 }
 0x5cb   : > { %4819 = vmatprep.subr.mxu1 %v5627_v57 }
 0x5cd   : > { %4795 = vmatmul.mubr.msk.f32.gmra.mrb[24].mxu1 %vm1318_vm12, %v1607_v23  ;;  %2922 = vrot.lane.b32.xlu0 %v6042_v29, %s5638_s20  ;;  %v5441_v29 = vunpack.i.h.bf16 %v6409_v19  ;;  %s7143_s20 = scalar_lea.vmem %s7109_s16, %s5741_s26 }
 0x5ce   : > { %4820 = vmatpush3.msk.msra.mxu1 %vm1373_vm10, %v6291_v49  ;;  %4797 = vmatprep.mubr.msk.f32.mxu1 %vm5628_vm5, %v5627_v57  ;;  %v5440_v49 = vunpack.i.l.bf16 %v6409_v19 }
 0x5cf   : > { %5184 = vmatprep.subr.bf16.mxu1 %v5626_v45 }
 0x5d0   : > { %v5185_v2 = vpack.c.bf16 %v5441_v29, %v5440_v49 }
 0x5e4   : > { %v1603_v60 = vpop.xlane.xlu0 %1602 }
 0x5e5   : > { %5535 = vrcp.f32 %v1603_v60 }
 0x5e8   : > { %v1856_v39 = vpop.xlane.xlu1 %1855 }
 0x5eb   : > { %v1853_v42 = vpop.xlane.xlu0 %1852 }
 0x5ec   : > { %5537 = vrcp.f32 %v1853_v42 }
 0x5ed   : > { %5539 = vrcp.f32 %v1856_v39 }
 0x5ef   : > { %v5536_v8 = vpop.eup %5535  ;;  %v2656_v19 = vpop.permute.xlu0 %2655 }
 0x5f0   : > { %v1609_v21 = vmul.f32 %v5536_v8, %v6457_v15 }
 0x5f2   : > { %4798 = vmatmul.mubr.msk.f32.gmra.mrb[26].mxu1 %vm1318_vm12, %v1609_v21 }
 0x5f3   : > { %4821 = vmatprep.mubr.msk.f32.mxu1 %vm5628_vm5, %v5627_v57 }
 0x5f6   : > { %v5538_v22 = vpop.eup %5537 }
 0x5f7   : > { %v1861_v18 = vmul.f32 %v5538_v22, %v6466_v12  ;;  %v5540_v44 = vpop.eup %5539  ;;  %v2122_v12 = vpop.xlane.xlu1 %2121 }
 0x5f8   : > { %v1863_v15 = vmul.f32 %v5540_v44, %v6462_v10 }
 0x5f9   : > { %4822 = vmatmul.mubr.msk.f32.vlgmr.msra.gmra.mrb[28].mxu1 %vm1318_vm12, %v1861_v18 }
 0x5fa   : > { %5186 = vmatpush3.bf16.msra.mxu1 %v5185_v2  ;;  %4824 = vmatprep.mubr.msk.f32.mxu1 %vm5628_vm5, %v5627_v57 }
 0x5fb   : > { %4849 = vmatprep.subr.mxu1 %v5627_v57  ;;  %v2128_v63 = vpop.xlane.xlu1 %2127 }
 0x5fd   : > { %4825 = vmatmul.mubr.msk.f32.gmra.mrb[30].mxu1 %vm1318_vm12, %v1863_v15 }
 0x5fe   : > { %4850 = vmatpush3.msk.msra.mxu1 %vm1373_vm10, %v6411_v53  ;;  %4827 = vmatprep.mubr.msk.f32.mxu1 %vm5628_vm5, %v5627_v57 }
 0x5ff   : > { %5191 = vmatprep.subr.bf16.mxu1 %v5626_v45  ;;  %v2383_v13 = vpop.xlane.xlu1 %2382 }
 0x603   : > { %v2921_v54 = vpop.permute.xlu1 %2920 }
 0x620   : > { %v1859_v7 = vpop.xlane.xlu0 %1858 }
 0x621   : > { %5541 = vrcp.f32 %v1859_v7 }
 0x622   : > { %5543 = vrcp.f32 %v2122_v12 }
 0x624   : > { %v2125_v52 = vpop.xlane.xlu0 %2124 }
 0x625   : > { %5545 = vrcp.f32 %v2125_v52 }
 0x626   : > { %5547 = vrcp.f32 %v2128_v63 }
 0x628   : > { %v2380_v9 = vpop.xlane.xlu0 %2379 }
 0x629   : > { %5549 = vrcp.f32 %v2380_v9 }
 0x62a   : > { %5551 = vrcp.f32 %v2383_v13 }
 0x62b   : > { %v5542_v10 = vpop.eup %5541 }
 0x62c   : > { %v2386_v58 = vpop.xlane.xlu0 %2385  ;;  %v1865_v14 = vmul.f32 %v5542_v10, %v6494_v36  ;;  %v5544_v53 = vpop.eup %5543 }
 0x62d   : > { %v2130_v43 = vmul.f32 %v5544_v53, %v6468_v41  ;;  %5553 = vrcp.f32 %v2386_v58  ;;  %v2638_v41 = vpop.xlane.xlu1 %2637 }
 0x62e   : > { %4828 = vmatmul.mubr.msk.f32.gmra.mrb[32].mxu1 %vm1318_vm12, %v1865_v14  ;;  %5555 = vrcp.f32 %v2638_v41 }
 0x62f   : > { %4851 = vmatprep.mubr.msk.f32.mxu1 %vm5628_vm5, %v5627_v57  ;;  %v5546_v38 = vpop.eup %5545 }
 0x630   : > { %v2641_v20 = vpop.xlane.xlu0 %2640  ;;  %v2132_v26 = vmul.f32 %v5546_v38, %v6499_v1  ;;  %v5548_v46 = vpop.eup %5547  ;;  %v5450_v1 = vunpack.i.l.bf16 %v6448_v32  ;;  %v3294_v38 = vld [vmem:[%s5779_s23] sm:$0xff] }
 0x631   : > { %v2134_v48 = vmul.f32 %v5548_v46, %v6474_v61  ;;  %5557 = vrcp.f32 %v2641_v20  ;;  %v2644_v61 = vpop.xlane.xlu1 %2643  ;;  %v3297_v46 = vld [vmem:[%s5779_s23 + $0x18] sm:$0xff] }
 0x632   : > { %4852 = vmatmul.mubr.msk.f32.vlgmr.msra.gmra.mrb[34].mxu1 %vm1318_vm12, %v2130_v43  ;;  %v5199_v39 = vpack.c.bf16 %v5451_v59, %v5450_v1  ;;  %5559 = vrcp.f32 %v2644_v61  ;;  %v3301_v61 = vld [vmem:[%s5779_s23 + $0x38] sm:$0xff] }
 0x633   : > { %5193 = vmatpush3.bf16.msra.mxu1 %v5192_v0  ;;  %4854 = vmatprep.mubr.msk.f32.mxu1 %vm5628_vm5, %v5627_v57  ;;  %v5550_v11 = vpop.eup %5549  ;;  %v3295_v0 = vld [vmem:[%s5779_s23 + $0x8] sm:$0xff] }
 0x634   : > { %v2892_v36 = vpop.xlane.xlu0 %2891  ;;  %4879 = vmatprep.subr.mxu1 %v5627_v57  ;;  %v5552_v60 = vpop.eup %5551 }
 0x635   : > { %v2390_v42 = vmul.f32 %v5552_v60, %v6478_v27  ;;  %5561 = vrcp.f32 %v2892_v36  ;;  %v3162_v49 = vpop.xlane.xlu1 %3161 }
 0x636   : > { %4855 = vmatmul.mubr.msk.f32.gmra.mrb[36].mxu1 %vm1318_vm12, %v2132_v26  ;;  %v5216_v26 = vpack.c.bf16 %v3295_v0, %v3294_v38 }
 0x637   : > { %4880 = vmatpush3.msk.msra.mxu1 %vm1373_vm10, %v6446_v25  ;;  %4857 = vmatprep.mubr.msk.f32.mxu1 %vm5628_vm5, %v5627_v57  ;;  %v2388_v25 = vmul.f32 %v5550_v11, %v6504_v50  ;;  %v5554_v8 = vpop.eup %5553  ;;  %v3299_v11 = vld [vmem:[%s5779_s23 + $0x28] sm:$0xff] }
 0x638   : > { %v2895_v40 = vpop.xlane.xlu0 %2894  ;;  %5198 = vmatprep.subr.bf16.mxu1 %v5626_v45  ;;  %v2392_v50 = vmul.f32 %v5554_v8, %v6511_v28  ;;  %v5556_v21 = vpop.eup %5555  ;;  %5217 = vmatpush3.bf16.msra.mxu0 %v5216_v26  ;;  %v3303_v8 = vld [vmem:[%s5779_s23 + $0x48] sm:$0xff] }
 0x639   : > { %v2646_v27 = vmul.f32 %v5556_v21, %v6506_v3  ;;  %5563 = vrcp.f32 %v2895_v40  ;;  %v5464_v2 = vpop.permute.xlu1 %5463  ;;  %5218 = vmatprep.subr.bf16.mxu0 %v5626_v45  ;;  %v3304_v21 = vld [vmem:[%s5779_s23 + $0x50] sm:$0xff] }
 0x63a   : > { %4858 = vmatmul.mubr.msk.f32.gmra.mrb[38].mxu1 %vm1318_vm12, %v2134_v48  ;;  %v5465_v15 = vunpack.i.l.bf16 %v5464_v2  ;;  %v3298_v48 = vld [vmem:[%s5779_s23 + $0x20] sm:$0xff] }
 0x63b   : > { %4881 = vmatprep.mubr.msk.f32.mxu1 %vm5628_vm5, %v5627_v57  ;;  %v5558_v22 = vpop.eup %5557  ;;  %v5222_v59 = vpack.c.bf16 %v3299_v11, %v3298_v48 }
 0x63c   : > { %v2898_v23 = vpop.xlane.xlu0 %2897  ;;  %v2648_v28 = vmul.f32 %v5558_v22, %v6520_v6  ;;  %v5560_v44 = vpop.eup %5559 }
 0x63d   : > { %5565 = vrcp.f32 %v2898_v23  ;;  %v2650_v30 = vmul.f32 %v5560_v44, %v6515_v55  ;;  %v3180_v52 = vpop.permute.xlu1 %3179 }
 0x63e   : > { %4882 = vmatmul.mubr.msk.f32.vlgmr.msra.gmra.mrb[40].mxu1 %vm1318_vm12, %v2388_v25  ;;  %5567 = vrcp.f32 %v3162_v49 }
 0x63f   : > { %5200 = vmatpush3.bf16.msra.mxu1 %v5199_v39  ;;  %4884 = vmatprep.mubr.msk.f32.mxu1 %vm5628_vm5, %v5627_v57  ;;  %v5562_v31 = vpop.eup %5561  ;;  %v3300_v39 = vld [vmem:[%s5779_s23 + $0x30] sm:$0xff] }
 0x640   : > { %v3165_v32 = vpop.xlane.xlu0 %3164  ;;  %4909 = vmatprep.subr.mxu1 %v5627_v57  ;;  %v2900_v6 = vmul.f32 %v5562_v31, %v6529_v51 }
 0x641   : > { %5569 = vrcp.f32 %v3165_v32  ;;  %v5225_v32 = vpack.c.bf16 %v3301_v61, %v3300_v39 }
 0x642   : > { %4885 = vmatmul.mubr.msk.f32.gmra.mrb[42].mxu1 %vm1318_vm12, %v2390_v42  ;;  %v3302_v42 = vld [vmem:[%s5779_s23 + $0x40] sm:$0xff] }
 0x643   : > { %4910 = vmatpush3.msk.msra.mxu1 %vm1373_vm10, %v2656_v19  ;;  %4887 = vmatprep.mubr.msk.f32.mxu1 %vm5628_vm5, %v5627_v57  ;;  %v5564_v19 = vpop.eup %5563 }
 0x644   : > { %5205 = vmatprep.subr.bf16.mxu1 %v5626_v45  ;;  %v3168_v29 = vpop.xlane.xlu0 %3167  ;;  %v2902_v55 = vmul.f32 %v5564_v19, %v6535_v24 }
 0x645   : > { %5571 = vrcp.f32 %v3168_v29  ;;  %v3305_v29 = vld [vmem:[%s5779_s23 + $0x58] sm:$0xff] }
 0x646   : > { %4888 = vmatmul.mubr.msk.f32.gmra.mrb[44].mxu1 %vm1318_vm12, %v2392_v50  ;;  %v5228_v50 = vpack.c.bf16 %v3303_v8, %v3302_v42 }
 0x647   : > { %4911 = vmatprep.mubr.msk.f32.mxu1 %vm5628_vm5, %v5627_v57  ;;  %v5566_v7 = vpop.eup %5565 }
 0x648   : > { %v2923_v18 = vpop.permute.xlu0 %2922  ;;  %v2904_v51 = vmul.f32 %v5566_v7, %v6539_v47  ;;  %v5568_v63 = vpop.eup %5567 }
 0x649   : > { %v2926_v3 = vsel %vm1881_vm11, %v2921_v54, %v2923_v18  ;;  %v3170_v24 = vmul.f32 %v5568_v63, %v6524_v56  ;;  %v3296_v54 = vld [vmem:[%s5779_s23 + $0x10] sm:$0xff] }
 0x64a   : > { %4912 = vmatmul.mubr.msk.f32.vlgmr.msra.gmra.mrb[46].mxu1 %vm1318_vm12, %v2646_v27  ;;  %v5219_v40 = vpack.c.bf16 %v3297_v46, %v3296_v54  ;;  %v5231_v27 = vpack.c.bf16 %v3305_v29, %v3304_v21  ;;  %v4442_v29 = vld [vmem:[%s7139_s11] ss:$0 sm:$0xff] }
 0x64b   : > { %5207 = vmatpush3.bf16.msra.mxu1 %v5206_v4  ;;  %4914 = vmatprep.mubr.msk.f32.mxu1 %vm5628_vm5, %v5627_v57  ;;  %v5466_v4 = vunpack.i.h.bf16 %v5464_v2  ;;  %v5570_v9 = vpop.eup %5569 }
 0x64c   : > { %4939 = vmatprep.subr.mxu1 %v5627_v57  ;;  %v3172_v10 = vmul.f32 %v5570_v9, %v6543_v62  ;;  %5220 = vmatpush3.bf16.msra.mxu0 %v5219_v40 }
 0x64d   : > { %v5213_v12 = vpack.c.bf16 %v5466_v4, %v5465_v15  ;;  %5221 = vmatprep.subr.bf16.mxu0 %v5626_v45 }
 0x64e   : > { %4915 = vmatmul.mubr.msk.f32.gmra.mrb[48].mxu1 %vm1318_vm12, %v2648_v28 }
 0x64f   : > { %4940 = vmatpush3.msk.msra.mxu1 %vm1373_vm10, %v2926_v3  ;;  %4917 = vmatprep.mubr.msk.f32.mxu1 %vm5628_vm5, %v5627_v57  ;;  %v5572_v58 = vpop.eup %5571 }
 0x650   : > { %5212 = vmatprep.subr.bf16.mxu1 %v5626_v45  ;;  %v3174_v47 = vmul.f32 %v5572_v58, %v6549_v16  ;;  %5223 = vmatpush3.bf16.msra.mxu0 %v5222_v59 }
 0x651   : > { %5224 = vmatprep.subr.bf16.mxu0 %v5626_v45 }
 0x652   : > { %4918 = vmatmul.mubr.msk.f32.gmra.mrb[50].mxu1 %vm1318_vm12, %v2650_v30 }
 0x653   : > { %4941 = vmatprep.mubr.msk.f32.mxu1 %vm5628_vm5, %v5627_v57 }
 0x654   : > { %5226 = vmatpush3.bf16.msra.mxu0 %v5225_v32 }
 0x655   : > { %5227 = vmatprep.subr.bf16.mxu0 %v5626_v45 }
 0x656   : > { %4942 = vmatmul.mubr.msk.f32.vlgmr.msra.gmra.mrb[52].mxu1 %vm1318_vm12, %v2900_v6 }
 0x657   : > { %5214 = vmatpush3.bf16.msra.mxu1 %v5213_v12  ;;  %4944 = vmatprep.mubr.msk.f32.mxu1 %vm5628_vm5, %v5627_v57 }
 0x658   : > { %4969 = vmatprep.subr.mxu1 %v5627_v57  ;;  %5229 = vmatpush3.bf16.msra.mxu0 %v5228_v50 }
 0x659   : > { %5230 = vmatprep.subr.bf16.mxu0 %v5626_v45 }
 0x65a   : > { %4945 = vmatmul.mubr.msk.f32.gmra.mrb[54].mxu1 %vm1318_vm12, %v2902_v55 }
 0x65b   : > { %4970 = vmatpush3.msk.msra.mxu1 %vm1373_vm10, %v3180_v52  ;;  %4947 = vmatprep.mubr.msk.f32.mxu1 %vm5628_vm5, %v5627_v57 }
 0x65c   : > { %5232 = vmatpush3.bf16.msra.mxu0 %v5231_v27  ;;  %v5613_v27 = vld [vmem:[#allocation2] sm:$0xff] }
 0x65d   : > { %5257 = vmatprep.subr.bf16.mxu0 %v5626_v45 }
 0x65e   : > { %4948 = vmatmul.mubr.msk.f32.gmra.mrb[56].mxu1 %vm1318_vm12, %v2904_v51 }
 0x65f   : > { %4971 = vmatprep.mubr.msk.f32.mxu1 %vm5628_vm5, %v5627_v57 }
 0x662   : > { %4972 = vmatmul.mubr.msk.f32.vlgmr.msra.gmra.mrb[58].mxu1 %vm1318_vm12, %v3170_v24 }
 0x663   : > { %4974 = vmatprep.mubr.msk.f32.mxu1 %vm5628_vm5, %v5627_v57 }
 0x666   : > { %4975 = vmatmul.mubr.msk.f32.gmra.mrb[60].mxu1 %vm1318_vm12, %v3172_v10 }
 0x667   : > { %4977 = vmatprep.mubr.msk.f32.mxu1 %vm5628_vm5, %v5627_v57 }
 0x66a   : > { %4978 = vmatmul.mubr.msk.f32.gmra.mrb[62].mxu1 %vm1318_vm12, %v3174_v47 }
 0x66b   : > { %3649 = vmatprep.mubr.f32.mxu1 %v5627_v57 }
 0x688   : > { %v1442_v56 = vpop.f32.mrb[16].mxu1 }
 0x689   : > { %1456 = vst.msk [vmem:[#allocation3] sm:$0xff] %vm1222_vm7, %v1442_v56  ;;  %v4763_v14 = vpop.f32.mrb[17].mxu1 }
 0x68c   : > { %v1447_v53 = vpop.f32.mrb[18].mxu1 }
 0x68d   : > { %1457 = vst.msk [vmem:[#allocation3 + $0x8] sm:$0xff] %vm1222_vm7, %v1447_v53  ;;  %v4766_v62 = vpop.f32.mrb[19].mxu1 }
 0x698   : > { %v1452_v5 = vpop.f32.mrb[20].mxu1 }
 0x699   : > { %1459 = vst.msk [vmem:[#allocation3 + $0x10] sm:$0x1] %vm1458_vm14, %v1452_v5  ;;  %v4769_v16 = vpop.f32.mrb[21].mxu1 }
 0x69c   : > { %v1695_v17 = vpop.f32.mrb[22].mxu1 }
 0x69d   : > { %1712 = vrot.lane.b32.xlu1 %v1695_v17, %s5640_s22  ;;  %v4793_v13 = vpop.f32.mrb[23].mxu1 }
 0x6a0   : > { %v1700_v43 = vpop.f32.mrb[24].mxu1 }
 0x6a1   : > { %1714 = vrot.lane.b32.xlu1 %v1700_v43, %s5640_s22  ;;  %v4796_v20 = vpop.f32.mrb[25].mxu1 }
 0x6c5   : > { %v1705_v36 = vpop.f32.mrb[26].mxu1 }
 0x6c6   : > { %1716 = vrot.lane.b32.xlu0 %v1705_v36, %s5640_s22  ;;  %v4799_v41 = vpop.f32.mrb[27].mxu1 }
 0x6cc   : > { %v1964_v1 = vpop.f32.mrb[28].mxu1 }
 0x6cd   : > { %1981 = vrot.lane.b32.xlu1 %v1964_v1, %s5641_s24  ;;  %v4823_v25 = vpop.f32.mrb[29].mxu1 }
 0x6d0   : > { %v1969_v23 = vpop.f32.mrb[30].mxu1 }
 0x6d1   : > { %1983 = vrot.lane.b32.xlu0 %v1969_v23, %s5641_s24  ;;  %v4826_v60 = vpop.f32.mrb[31].mxu1 }
 0x701   : > { %v1974_v49 = vpop.f32.mrb[32].mxu1 }
 0x702   : > { %1985 = vrot.lane.b32.xlu0 %v1974_v49, %s5641_s24  ;;  %v4829_v22 = vpop.f32.mrb[33].mxu1 }
 0x705   : > { %v2220_v18 = vpop.f32.mrb[34].mxu1 }
 0x706   : > { %2237 = vrot.lane.b32.xlu1 %v2220_v18, %s5642_s0  ;;  %v4853_v28 = vpop.f32.mrb[35].mxu1 }
 0x709   : > { %v2225_v44 = vpop.f32.mrb[36].mxu1 }
 0x70a   : > { %2239 = vrot.lane.b32.xlu1 %v2225_v44, %s5642_s0  ;;  %v4856_v2 = vpop.f32.mrb[37].mxu1  ;;  %v5614_v44 = vld [vmem:[#allocation2 + $0x8] sm:$0xff] }
 0x70d   : > { %v2230_v3 = vpop.f32.mrb[38].mxu1 }
 0x70e   : > { %2241 = vrot.lane.b32.xlu0 %v2230_v3, %s5642_s0  ;;  %v4859_v31 = vpop.f32.mrb[39].mxu1 }
 0x70f   : > { %v1713_v30 = vpop.permute.xlu1 %1712 }
 0x710   : > { %1722 = vst.msk [vmem:[#allocation3] sm:$0xff] %vm1721_vm15, %v1713_v30 }
 0x711   : > { %v2485_v4 = vpop.f32.mrb[40].mxu1 }
 0x712   : > { %2499 = vst.msk [vmem:[#allocation3 + $0x11] sm:$0xff] %vm1222_vm7, %v2485_v4  ;;  %v4883_v6 = vpop.f32.mrb[41].mxu1 }
 0x713   : > { %v1715_v15 = vpop.permute.xlu1 %1714  ;;  %v5615_v6 = vld [vmem:[#allocation2 + $0x10] sm:$0xff] }
 0x714   : > { %1723 = vst.msk [vmem:[#allocation3 + $0x8] sm:$0xff] %vm1721_vm15, %v1715_v15 }
 0x715   : > { %v2490_v19 = vpop.f32.mrb[42].mxu1 }
 0x716   : > { %2500 = vst.msk [vmem:[#allocation3 + $0x19] sm:$0xff] %vm1222_vm7, %v2490_v19  ;;  %v4886_v12 = vpop.f32.mrb[43].mxu1  ;;  %vm2249_vm7 = vcmask 778816  }
 0x719   : > { %v2495_v55 = vpop.f32.mrb[44].mxu1 }
 0x71a   : > { %2501 = vst.msk [vmem:[#allocation3 + $0x21] sm:$0x1] %vm1458_vm14, %v2495_v55  ;;  %v4889_v7 = vpop.f32.mrb[45].mxu1 }
 0x71d   : > { %v2736_v52 = vpop.f32.mrb[46].mxu1 }
 0x71e   : > { %2753 = vrot.lane.b32.xlu1 %v2736_v52, %s5640_s22  ;;  %v4913_v51 = vpop.f32.mrb[47].mxu1  ;;  %v5616_v52 = vld [vmem:[#allocation2 + $0x18] sm:$0xff] }
 0x721   : > { %v2741_v63 = vpop.f32.mrb[48].mxu1 }
 0x722   : > { %2755 = vrot.lane.b32.xlu0 %v2741_v63, %s5640_s22  ;;  %v4916_v24 = vpop.f32.mrb[49].mxu1 }
 0x725   : > { %v2746_v9 = vpop.f32.mrb[50].mxu1 }
 0x726   : > { %v4919_v10 = vpop.f32.mrb[51].mxu1 }
 0x729   : > { %v3006_v58 = vpop.f32.mrb[52].mxu1 }
 0x72a   : > { %3023 = vrot.lane.b32.xlu1 %v3006_v58, %s5641_s24  ;;  %v4943_v47 = vpop.f32.mrb[53].mxu1 }
 0x72b   : > { %v5617_v47 = vld [vmem:[#allocation2 + $0x20] sm:$0x3] }
 0x72d   : > { %v3011_v56 = vpop.f32.mrb[54].mxu1 }
 0x72e   : > { %3025 = vrot.lane.b32.xlu1 %v3011_v56, %s5641_s24  ;;  %v4946_v14 = vpop.f32.mrb[55].mxu1 }
 0x731   : > { %v3016_v53 = vpop.f32.mrb[56].mxu1 }
 0x732   : > { %v4949_v62 = vpop.f32.mrb[57].mxu1 }
 0x735   : > { %v3260_v5 = vpop.f32.mrb[58].mxu1 }
 0x736   : > { %3277 = vrot.lane.b32.xlu1 %v3260_v5, %s5642_s0  ;;  %v4973_v16 = vpop.f32.mrb[59].mxu1  ;;  %v3518_v5 = vld [vmem:[%s5784_s2 + $0x8] sm:$0xff] }
 0x737   : > { %v3521_v16 = vld [vmem:[%s5784_s2 + $0x20] sm:$0xff] }
 0x738   : > { %v1717_v17 = vpop.permute.xlu0 %1716 }
 0x739   : > { %1725 = vst.msk [vmem:[#allocation3 + $0x10] sm:$0x1] %vm1724_vm0, %v1717_v17  ;;  %v3265_v13 = vpop.f32.mrb[60].mxu1  ;;  %v3517_v17 = vld [vmem:[%s5784_s2] sm:$0xff] }
 0x73a   : > { %2757 = vrot.lane.b32.xlu1 %v2746_v9, %s5640_s22  ;;  %3279 = vrot.lane.b32.xlu0 %v3265_v13, %s5642_s0  ;;  %v4976_v43 = vpop.f32.mrb[61].mxu1  ;;  %v5233_v13 = vpack.c.bf16 %v3521_v16, %v3518_v5  ;;  %v3546_v5 = vld [vmem:[%s5784_s2 + $0xe8] sm:$0xff] }
 0x73b   : > { %v3520_v43 = vld [vmem:[%s5784_s2 + $0x18] sm:$0xff] }
 0x73c   : > { %5234 = vmatprep.subr.bf16.mxu1 %v5233_v13  ;;  %v3551_v13 = vld [vmem:[%s5784_s2 + $0x110] sm:$0xff] }
 0x73d   : > { %v3270_v20 = vpop.f32.mrb[62].mxu1 }
 0x73e   : > { %3027 = vrot.lane.b32.xlu0 %v3016_v53, %s5641_s24  ;;  %3281 = vrot.lane.b32.xlu1 %v3270_v20, %s5642_s0  ;;  %v4979_v38 = vpop.f32.mrb[63].mxu1  ;;  %v3519_v20 = vld [vmem:[%s5784_s2 + $0x10] sm:$0xff] }
 0x73f   : > { %v1982_v0 = vpop.permute.xlu1 %1981  ;;  %v3522_v38 = vld [vmem:[%s5784_s2 + $0x28] sm:$0xff] }
 0x740   : > { %1991 = vst.msk [vmem:[#allocation3] sm:$0xff] %vm1990_vm1, %v1982_v0  ;;  %v5235_v0 = vpack.c.bf16 %v3520_v43, %v3517_v17  ;;  %v3548_v17 = vld [vmem:[%s5784_s2 + $0xf8] sm:$0xff] }
 0x741   : > { %v5253_v43 = vpack.c.bf16 %v3551_v13, %v3548_v17 }
 0x742   : > { %5236 = vmatpush1.bf16.msra.mxu1 %v5235_v0  ;;  %v3549_v0 = vld [vmem:[%s5784_s2 + $0x100] sm:$0xff] }
 0x743   : > { %v1984_v54 = vpop.permute.xlu0 %1983 }
 0x744   : > { %1992 = vst.msk [vmem:[#allocation3 + $0x8] sm:$0xff] %vm1990_vm1, %v1984_v54  ;;  %v5258_v54 = vpack.c.bf16 %v3522_v38, %v3519_v20  ;;  %v3547_v20 = vld [vmem:[%s5784_s2 + $0xf0] sm:$0xff]  ;;  %v3550_v38 = vld [vmem:[%s5784_s2 + $0x108] sm:$0xff] }
 0x774   : > { %v1986_v36 = vpop.permute.xlu0 %1985 }
 0x775   : > { %1994 = vst.msk [vmem:[#allocation3 + $0x10] sm:$0x1] %vm1993_vm2, %v1986_v36 }
 0x778   : > { %v2238_v26 = vpop.permute.xlu1 %2237 }
 0x779   : > { %2247 = vst.msk [vmem:[#allocation3] sm:$0xff] %vm2246_vm6, %v2238_v26 }
 0x77c   : > { %v2240_v46 = vpop.permute.xlu1 %2239 }
 0x77d   : > { %2248 = vst.msk [vmem:[#allocation3 + $0x8] sm:$0xff] %vm2246_vm6, %v2240_v46 }
 0x780   : > { %v2242_v41 = vpop.permute.xlu0 %2241  ;;  %v3289_v40 = vld [vmem:[#allocation3] sm:$0xff] }
 0x781   : > { %2250 = vst.msk [vmem:[#allocation3 + $0x10] sm:$0x1] %vm2249_vm7, %v2242_v41  ;;  %5005 = vmatmul.mubr.msk.f32.vlgmr.msra.gmra.mrb[52].mxu0 %vm870_vm3, %v3289_v40 }
 0x782   : > { %5007 = vmatprep.mubr.msk.f32.mxu0 %vm5628_vm5, %v5627_v57  ;;  %5259 = vmatpush3.bf16.msra.mxu0 %v5258_v54  ;;  %v5255_v54 = vpack.c.bf16 %v3550_v38, %v3547_v20 }
 0x783   : > { %5260 = vmatprep.subr.bf16.mxu0 %v5626_v45 }
 0x784   : > { %v3290_v48 = vld [vmem:[#allocation3 + $0x8] sm:$0xff] }
 0x785   : > { %5008 = vmatmul.mubr.msk.f32.gmra.mrb[54].mxu0 %vm870_vm3, %v3290_v48 }
 0x786   : > { %5010 = vmatprep.mubr.msk.f32.mxu0 %vm5628_vm5, %v5627_v57 }
 0x790   : > { %v2754_v11 = vpop.permute.xlu1 %2753 }
 0x791   : > { %2762 = vst.msk [vmem:[#allocation3 + $0x11] sm:$0xff] %vm1721_vm15, %v2754_v11 }
 0x794   : > { %v2756_v59 = vpop.permute.xlu0 %2755 }
 0x795   : > { %2763 = vst.msk [vmem:[#allocation3 + $0x19] sm:$0xff] %vm1721_vm15, %v2756_v59 }
 0x79c   : > { %v3024_v1 = vpop.permute.xlu1 %3023 }
 0x79d   : > { %3032 = vst.msk [vmem:[#allocation3 + $0x11] sm:$0xff] %vm1990_vm1, %v3024_v1 }
 0x7a0   : > { %v3026_v25 = vpop.permute.xlu1 %3025 }
 0x7a1   : > { %3033 = vst.msk [vmem:[#allocation3 + $0x19] sm:$0xff] %vm1990_vm1, %v3026_v25 }
 0x7a8   : > { %v3278_v23 = vpop.permute.xlu1 %3277 }
 0x7a9   : > { %3286 = vst.msk [vmem:[#allocation3 + $0x11] sm:$0xff] %vm2246_vm6, %v3278_v23  ;;  %v3524_v23 = vld [vmem:[%s5784_s2 + $0x38] sm:$0xff] }
 0x7ac   : > { %v2758_v60 = vpop.permute.xlu1 %2757  ;;  %v3280_v39 = vpop.permute.xlu0 %3279 }
 0x7ad   : > { %2764 = vst.msk [vmem:[#allocation3 + $0x21] sm:$0x1] %vm1724_vm0, %v2758_v60  ;;  %v3527_v60 = vld [vmem:[%s5784_s2 + $0x50] sm:$0xff] }
 0x7ae   : > { %3287 = vst.msk [vmem:[#allocation3 + $0x19] sm:$0xff] %vm2246_vm6, %v3280_v39  ;;  %v5237_v39 = vpack.c.bf16 %v3527_v60, %v3524_v23 }
 0x7b0   : > { %v3028_v61 = vpop.permute.xlu0 %3027  ;;  %v3282_v32 = vpop.permute.xlu1 %3281  ;;  %v3291_v42 = vld [vmem:[#allocation3 + $0x10] sm:$0xff]  ;;  %5238 = vmatprep.subr.bf16.mxu1 %v5237_v39 }
 0x7b1   : > { %3034 = vst.msk [vmem:[#allocation3 + $0x21] sm:$0x1] %vm1993_vm2, %v3028_v61  ;;  %5011 = vmatmul.mubr.msk.f32.gmra.mrb[56].mxu0 %vm870_vm3, %v3291_v42  ;;  %v3523_v61 = vld [vmem:[%s5784_s2 + $0x30] sm:$0xff]  ;;  %v3525_v42 = vld [vmem:[%s5784_s2 + $0x40] sm:$0xff] }
 0x7b2   : > { %3288 = vst.msk [vmem:[#allocation3 + $0x21] sm:$0x1] %vm2249_vm7, %v3282_v32  ;;  %5013 = vmatprep.mubr.msk.f32.mxu0 %vm5628_vm5, %v5627_v57  ;;  %v3526_v32 = vld [vmem:[%s5784_s2 + $0x48] sm:$0xff] }
 0x7b5   : > { %v3292_v8 = vld [vmem:[#allocation3 + $0x18] sm:$0xff] }
 0x7b6   : > { %5014 = vmatmul.mubr.msk.f32.gmra.mrb[58].mxu0 %vm870_vm3, %v3292_v8  ;;  %v5239_v8 = vpack.c.bf16 %v3526_v32, %v3523_v61 }
 0x7b7   : > { %5016 = vmatprep.mubr.msk.f32.mxu0 %vm5628_vm5, %v5627_v57 }
 0x7b8   : > { %5240 = vmatpush1.bf16.msra.mxu1 %v5239_v8 }
 0x7b9   : > { %v3293_v50 = vld [vmem:[#allocation3 + $0x20] sm:$0x3] }
 0x7ba   : > { %5017 = vmatmul.mubr.msk.f32.gmra.mrb[60].mxu0 %vm870_vm3, %v3293_v50  ;;  %v3528_v50 = vld [vmem:[%s5784_s2 + $0x58] sm:$0xff] }
 0x7bb   : > { %5043 = vmatprep.mubr.msk.f32.mxu0 %vm5628_vm5, %v5627_v57 }
 0x854   : > { %v3387_v21 = vpop.f32.mrb[52].mxu0 }
 0x855   : > { %v3411_v49 = vadd.f32 %v5613_v27, %v3387_v21  ;;  %v5006_v22 = vpop.f32.mrb[53].mxu0  ;;  %v5261_v21 = vpack.c.bf16 %v3528_v50, %v3525_v42  ;;  %v3533_v27 = vld [vmem:[%s5784_s2 + $0x80] sm:$0xff] }
 0x856   : > { %v3529_v22 = vld [vmem:[%s5784_s2 + $0x60] sm:$0xff] }
 0x857   : > { %v6781_v18 = vadd.f32 %v4442_v29, %v3411_v49  ;;  %5262 = vmatpush3.bf16.msra.mxu0 %v5261_v21 }
 0x858   : > { %v3392_v28 = vpop.f32.mrb[54].mxu0  ;;  %5263 = vmatprep.subr.bf16.mxu0 %v5626_v45 }
 0x859   : > { %v3412_v2 = vadd.f32 %v5614_v44, %v3392_v28  ;;  %v5009_v3 = vpop.f32.mrb[55].mxu0  ;;  %v3430_v30 = vsel %vm870_vm3, %v6781_v18, 0.0  ;;  %v3532_v28 = vld [vmem:[%s5784_s2 + $0x78] sm:$0xff]  ;;  %v3531_v44 = vld [vmem:[%s5784_s2 + $0x70] sm:$0xff] }
 0x85a   : > { %3431 = vadd.xlane.f32.xlu0 %v3430_v30  ;;  %v3534_v3 = vld [vmem:[%s5784_s2 + $0x88] sm:$0xff] }
 0x85b   : > { %v6785_v31 = vadd.f32 %v4442_v29, %v3412_v2  ;;  %v5243_v2 = vpack.c.bf16 %v3532_v28, %v3529_v22  ;;  %v5264_v30 = vpack.c.bf16 %v3534_v3, %v3531_v44  ;;  %v4443_v3 = vld [vmem:[%s7141_s25] ss:$0 sm:$0xff] }
 0x85d   : > { %v3433_v4 = vsel %vm870_vm3, %v6785_v31, 0.0  ;;  %5265 = vmatpush3.bf16.msra.mxu0 %v5264_v30 }
 0x85e   : > { %3434 = vadd.xlane.f32.xlu1 %v3433_v4  ;;  %v3536_v4 = vld [vmem:[%s5784_s2 + $0x98] sm:$0xff]  ;;  %5266 = vmatprep.subr.bf16.mxu0 %v5626_v45 }
 0x884   : > { %v3397_v15 = vpop.f32.mrb[56].mxu0 }
 0x885   : > { %v3413_v19 = vadd.f32 %v5615_v6, %v3397_v15  ;;  %v5012_v12 = vpop.f32.mrb[57].mxu0  ;;  %v3539_v15 = vld [vmem:[%s5784_s2 + $0xb0] sm:$0xff] }
 0x886   : > { %v5245_v6 = vpack.c.bf16 %v3539_v15, %v3536_v4  ;;  %v3538_v12 = vld [vmem:[%s5784_s2 + $0xa8] sm:$0xff]  ;;  %v4444_v4 = vld [vmem:[%s7142_s21] ss:$0 sm:$0xff] }
 0x887   : > { %v6789_v55 = vadd.f32 %v4442_v29, %v3413_v19  ;;  %v3535_v19 = vld [vmem:[%s5784_s2 + $0x90] sm:$0xff]  ;;  %v3937_v15 = vld [vmem:[%s5800_s29 + $0x100] sm:$0xff] }
 0x889   : > { %v3402_v7 = vpop.f32.mrb[58].mxu0  ;;  %v3436_v24 = vsel %vm870_vm3, %v6789_v55, 0.0 }
 0x88a   : > { %v3414_v51 = vadd.f32 %v5616_v52, %v3402_v7  ;;  %v5015_v63 = vpop.f32.mrb[59].mxu0  ;;  %3437 = vadd.xlane.f32.xlu0 %v3436_v24  ;;  %v3537_v7 = vld [vmem:[%s5784_s2 + $0xa0] sm:$0xff]  ;;  %v5247_v52 = vpack.c.bf16 %v3538_v12, %v3535_v19  ;;  %v3542_v24 = vld [vmem:[%s5784_s2 + $0xc8] sm:$0xff] }
 0x88c   : > { %v6793_v9 = vadd.f32 %v4442_v29, %v3414_v51  ;;  %v3540_v51 = vld [vmem:[%s5784_s2 + $0xb8] sm:$0xff] }
 0x88d   : > { %v3407_v10 = vpop.f32.mrb[60].mxu0  ;;  %v5267_v63 = vpack.c.bf16 %v3540_v51, %v3537_v7 }
 0x88e   : > { %v3439_v58 = vsel %vm870_vm3, %v6793_v9, 0.0  ;;  %v3415_v56 = vadd.f32 %v5617_v47, %v3407_v10  ;;  %v5018_v14 = vpop.f32.mrb[61].mxu0  ;;  %v3545_v10 = vld [vmem:[%s5784_s2 + $0xe0] sm:$0xff] }
 0x88f   : > { %3440 = vadd.xlane.f32.xlu0 %v3439_v58  ;;  %5268 = vmatpush3.bf16.msra.mxu0 %v5267_v63  ;;  %v5249_v58 = vpack.c.bf16 %v3545_v10, %v3542_v24  ;;  %v3541_v47 = vld [vmem:[%s5784_s2 + $0xc0] sm:$0xff]  ;;  %v3543_v14 = vld [vmem:[%s5784_s2 + $0xd0] sm:$0xff] }
 0x890   : > { %v6797_v53 = vadd.f32 %v4442_v29, %v3415_v56  ;;  %v3530_v29 = vld [vmem:[%s5784_s2 + $0x68] sm:$0xff]  ;;  %v3544_v56 = vld [vmem:[%s5784_s2 + $0xd8] sm:$0xff]  ;;  %5269 = vmatprep.subr.bf16.mxu0 %v5626_v45  ;;  %v5270_v16 = vpack.c.bf16 %v3546_v5, %v3543_v14 }
 0x891   : > { %v5241_v49 = vpack.c.bf16 %v3533_v27, %v3530_v29 }
 0x892   : > { %v3442_v62 = vsel %vm883_vm4, %v6797_v53, 0.0 }
 0x893   : > { %3443 = vadd.xlane.f32.xlu0 %v3442_v62  ;;  %5242 = vmatprep.subr.bf16.mxu1 %v5241_v49  ;;  %v5251_v62 = vpack.c.bf16 %v3544_v56, %v3541_v47 }
 0x894   : > { %5244 = vmatpush1.bf16.msra.mxu1 %v5243_v2  ;;  %5271 = vmatpush3.bf16.msra.mxu0 %v5270_v16 }
 0x895   : > { %5246 = vmatprep.subr.bf16.mxu1 %v5245_v6  ;;  %5272 = vmatprep.subr.bf16.mxu0 %v5626_v45  ;;  %v3938_v6 = vld [vmem:[%s5800_s29 + $0x108] sm:$0xff] }
 0x896   : > { %v5308_v51 = vpack.c.bf16 %v3938_v6, %v3937_v15  ;;  %v3943_v6 = vld [vmem:[%s5800_s29 + $0x130] sm:$0xff] }
 0x898   : > { %5248 = vmatpush1.bf16.msra.mxu1 %v5247_v52 }
 0x899   : > { %5250 = vmatprep.subr.bf16.mxu1 %v5249_v58 }
 0x89c   : > { %5252 = vmatpush1.bf16.msra.mxu1 %v5251_v62 }
 0x89d   : > { %5254 = vmatprep.subr.bf16.mxu1 %v5253_v43 }
 0x8a0   : > { %5256 = vmatpush1.bf16.msra.mxu1 %v5255_v54 }
 0x8e7   : > { %v3432_v36 = vpop.xlane.xlu0 %3431 }
 0x8e8   : > { %v3445_v26 = vmul.f32 0.010416667, %v3432_v36  ;;  %v3552_v36 = vld [vmem:[%s5784_s2 + $0x118] sm:$0xff] }
 0x8ea   : > { %v6809_v46 = vsub.f32 %v6781_v18, %v3445_v26  ;;  %v5273_v26 = vpack.c.bf16 %v3552_v36, %v3549_v0 }
 0x8eb   : > { %v3435_v41 = vpop.xlane.xlu1 %3434 }
 0x8ec   : > { %v3446_v40 = vmul.f32 0.010416667, %v3435_v41  ;;  %v3455_v48 = vmul.f32 %v6809_v46, %v6809_v46  ;;  %5274 = vmatpush3.bf16.msra.mxu0 %v5273_v26 }
 0x8ed   : > { %5307 = vmatprep.subr.bf16.mxu0 %v5626_v45 }
 0x8ee   : > { %v6814_v11 = vsub.f32 %v6785_v31, %v3446_v40  ;;  %v3460_v59 = vsel %vm870_vm3, %v3455_v48, 0.0 }
 0x8ef   : > { %3461 = vadd.xlane.f32.xlu1 %v3460_v59 }
 0x8f0   : > { %v3456_v1 = vmul.f32 %v6814_v11, %v6814_v11 }
 0x8f2   : > { %v3463_v25 = vsel %vm870_vm3, %v3456_v1, 0.0 }
 0x8f3   : > { %3464 = vadd.xlane.f32.xlu0 %v3463_v25 }
 0x917   : > { %v3438_v41 = vpop.xlane.xlu0 %3437 }
 0x918   : > { %v3447_v40 = vmul.f32 0.010416667, %v3438_v41 }
 0x91a   : > { %v3452_v48 = vsub.f32 %v6789_v55, %v3447_v40 }
 0x91c   : > { %v3441_v59 = vpop.xlane.xlu0 %3440  ;;  %v3457_v25 = vmul.f32 %v3452_v48, %v3452_v48 }
 0x91d   : > { %v3448_v1 = vmul.f32 0.010416667, %v3441_v59  ;;  %v3922_v59 = vld [vmem:[%s5800_s29 + $0x88] sm:$0xff] }
 0x91e   : > { %v3466_v60 = vsel %vm870_vm3, %v3457_v25, 0.0  ;;  %v3905_v25 = vld [vmem:[%s5800_s29] sm:$0xff] }
 0x91f   : > { %v3453_v23 = vsub.f32 %v6793_v9, %v3448_v1  ;;  %3467 = vadd.xlane.f32.xlu1 %v3466_v60 }
 0x920   : > { %v3444_v39 = vpop.xlane.xlu0 %3443 }
 0x921   : > { %v3458_v61 = vmul.f32 %v3453_v23, %v3453_v23  ;;  %v3449_v32 = vmul.f32 0.010416667, %v3444_v39  ;;  %v3939_v39 = vld [vmem:[%s5800_s29 + $0x110] sm:$0xff] }
 0x923   : > { %v3469_v42 = vsel %vm870_vm3, %v3458_v61, 0.0  ;;  %v3454_v8 = vsub.f32 %v6797_v53, %v3449_v32  ;;  %v3940_v61 = vld [vmem:[%s5800_s29 + $0x118] sm:$0xff] }
 0x924   : > { %3470 = vadd.xlane.f32.xlu0 %v3469_v42  ;;  %v5311_v32 = vpack.c.bf16 %v3940_v61, %v3939_v39  ;;  %v3923_v42 = vld [vmem:[%s5800_s29 + $0x90] sm:$0xff] }
 0x925   : > { %v3459_v50 = vmul.f32 %v3454_v8, %v3454_v8  ;;  %v3951_v61 = vld [vmem:[%s5800_s29 + $0x170] sm:$0xff] }
 0x927   : > { %v3472_v21 = vsel %vm883_vm4, %v3459_v50, 0.0 }
 0x928   : > { %3473 = vadd.xlane.f32.xlu1 %v3472_v21  ;;  %v3907_v21 = vld [vmem:[%s5800_s29 + $0x10] sm:$0xff] }
 0x97c   : > { %v3462_v29 = vpop.xlane.xlu1 %3461 }
 0x97d   : > { %v3475_v27 = vmul.f32 0.010416667, %v3462_v29  ;;  %v3908_v29 = vld [vmem:[%s5800_s29 + $0x18] sm:$0xff] }
 0x97f   : > { %v3480_v49 = vadd.f32 1e-12, %v3475_v27  ;;  %v5281_v27 = vpack.c.bf16 %v3908_v29, %v3907_v21  ;;  %v3919_v29 = vld [vmem:[%s5800_s29 + $0x70] sm:$0xff] }
 0x980   : > { %v3465_v22 = vpop.xlane.xlu0 %3464 }
 0x981   : > { %5573 = vrsqrt.f32 %v3480_v49  ;;  %v3476_v28 = vmul.f32 0.010416667, %v3465_v22  ;;  %v3941_v49 = vld [vmem:[%s5800_s29 + $0x120] sm:$0xff]  ;;  %v3942_v22 = vld [vmem:[%s5800_s29 + $0x128] sm:$0xff] }
 0x983   : > { %v3481_v44 = vadd.f32 1e-12, %v3476_v28  ;;  %v5314_v28 = vpack.c.bf16 %v3942_v22, %v3941_v49  ;;  %v3553_v22 = vld [vmem:[%s5789_s3] sm:$0x7] }
 0x985   : > { %5575 = vrsqrt.f32 %v3481_v44  ;;  %v3925_v44 = vld [vmem:[%s5800_s29 + $0xa0] sm:$0xff] }
 0x98b   : > { %v5574_v2 = vpop.eup %5573 }
 0x98c   : > { %v3490_v30 = vmul.f32 %v5574_v2, %v6809_v46  ;;  %v3926_v2 = vld [vmem:[%s5800_s29 + $0xa8] sm:$0xff] }
 0x98e   : > { %v3501_v19 = vmul.f32 %v4443_v3, %v3490_v30  ;;  %v3909_v30 = vld [vmem:[%s5800_s29 + $0x20] sm:$0xff] }
 0x98f   : > { %v5576_v12 = vpop.eup %5575 }
 0x990   : > { %v3512_v7 = vadd.f32 %v4444_v4, %v3501_v19  ;;  %v3491_v52 = vmul.f32 %v5576_v12, %v6814_v11  ;;  %v3944_v19 = vld [vmem:[%s5800_s29 + $0x138] sm:$0xff] }
 0x991   : > { %v5317_v12 = vpack.c.bf16 %v3944_v19, %v3943_v6 }
 0x992   : > { %4445 = vmatmul.mubr.msk.f32.vlgmr.msra.gmra.mrb[64].mxu1 %vm870_vm3, %v3512_v7  ;;  %5044 = vmatmul.mubr.msk.f32.vlgmr.msra.gmra.mrb[62].mxu0 %vm870_vm3, %v3512_v7  ;;  %v3502_v63 = vmul.f32 %v4443_v3, %v3491_v52  ;;  %v3927_v7 = vld [vmem:[%s5800_s29 + $0xb0] sm:$0xff]  ;;  %v3928_v52 = vld [vmem:[%s5800_s29 + $0xb8] sm:$0xff] }
 0x993   : > { %3655 = vmatprep.mubr.f32.mxu1 %v5627_v57  ;;  %5046 = vmatprep.mubr.msk.f32.mxu0 %vm5628_vm5, %v5627_v57 }
 0x994   : > { %v3513_v46 = vadd.f32 %v4444_v4, %v3502_v63  ;;  %5309 = vmatpush3.bf16.msra.mxu0 %v5308_v51  ;;  %v5287_v51 = vpack.c.bf16 %v3928_v52, %v3927_v7  ;;  %v3911_v63 = vld [vmem:[%s5800_s29 + $0x30] sm:$0xff] }
 0x995   : > { %5310 = vmatprep.subr.bf16.mxu0 %v5626_v45 }
 0x996   : > { %4446 = vmatmul.mubr.msk.f32.gmra.mrb[66].mxu1 %vm870_vm3, %v3513_v46  ;;  %5047 = vmatmul.mubr.msk.f32.gmra.mrb[64].mxu0 %vm870_vm3, %v3513_v46  ;;  %v3912_v46 = vld [vmem:[%s5800_s29 + $0x38] sm:$0xff] }
 0x997   : > { %3661 = vmatprep.mubr.f32.mxu1 %v5627_v57  ;;  %5049 = vmatprep.mubr.msk.f32.mxu0 %vm5628_vm5, %v5627_v57 }
 0x998   : > { %5312 = vmatpush3.bf16.msra.mxu0 %v5311_v32  ;;  %v3952_v32 = vld [vmem:[%s5800_s29 + $0x178] sm:$0xff] }
 0x999   : > { %5313 = vmatprep.subr.bf16.mxu0 %v5626_v45 }
 0x99c   : > { %5315 = vmatpush3.bf16.msra.mxu0 %v5314_v28  ;;  %v6955_v28 = vrot.slane %v3553_v22, %v1000_v34 }
 0x99d   : > { %5316 = vmatprep.subr.bf16.mxu0 %v5626_v45 }
 0x9a0   : > { %5318 = vmatpush3.bf16.msra.mxu0 %v5317_v12 }
 0x9a1   : > { %5319 = vmatprep.subr.bf16.mxu0 %v5626_v45 }
 0x9ac   : > { %v3468_v11 = vpop.xlane.xlu1 %3467 }
 0x9ad   : > { %v3477_v24 = vmul.f32 0.010416667, %v3468_v11  ;;  %v5289_v11 = vpack.c.bf16 %v3912_v46, %v3911_v63 }
 0x9af   : > { %v3482_v10 = vadd.f32 1e-12, %v3477_v24  ;;  %v3945_v24 = vld [vmem:[%s5800_s29 + $0x140] sm:$0xff] }
 0x9b1   : > { %v3471_v58 = vpop.xlane.xlu0 %3470  ;;  %5577 = vrsqrt.f32 %v3482_v10  ;;  %v3946_v10 = vld [vmem:[%s5800_s29 + $0x148] sm:$0xff] }
 0x9b2   : > { %v3478_v47 = vmul.f32 0.010416667, %v3471_v58  ;;  %v5320_v58 = vpack.c.bf16 %v3946_v10, %v3945_v24 }
 0x9b4   : > { %v3483_v56 = vadd.f32 1e-12, %v3478_v47  ;;  %v3929_v47 = vld [vmem:[%s5800_s29 + $0xc0] sm:$0xff]  ;;  %5321 = vmatpush3.bf16.msra.mxu0 %v5320_v58 }
 0x9b5   : > { %v3474_v14 = vpop.xlane.xlu1 %3473  ;;  %5322 = vmatprep.subr.bf16.mxu0 %v5626_v45 }
 0x9b6   : > { %5579 = vrsqrt.f32 %v3483_v56  ;;  %v3479_v62 = vmul.f32 0.010416667, %v3474_v14  ;;  %v3930_v56 = vld [vmem:[%s5800_s29 + $0xc8] sm:$0xff] }
 0x9b7   : > { %v5291_v14 = vpack.c.bf16 %v3930_v56, %v3929_v47 }
 0x9b8   : > { %v3484_v5 = vadd.f32 1e-12, %v3479_v62  ;;  %v3913_v62 = vld [vmem:[%s5800_s29 + $0x40] sm:$0xff] }
 0x9ba   : > { %5581 = vrsqrt.f32 %v3484_v5  ;;  %v3914_v5 = vld [vmem:[%s5800_s29 + $0x48] sm:$0xff] }
 0x9bb   : > { %v5578_v16 = vpop.eup %5577 }
 0x9bc   : > { %v3492_v17 = vmul.f32 %v5578_v16, %v3452_v48  ;;  %v3921_v48 = vld [vmem:[%s5800_s29 + $0x80] sm:$0xff]  ;;  %v5293_v16 = vpack.c.bf16 %v3914_v5, %v3913_v62 }
 0x9bd   : > { %v5275_v1 = vpack.c.bf16 %v3922_v59, %v3921_v48  ;;  %v3933_v59 = vld [vmem:[%s5800_s29 + $0xe0] sm:$0xff] }
 0x9be   : > { %v3503_v13 = vmul.f32 %v4443_v3, %v3492_v17  ;;  %v3947_v17 = vld [vmem:[%s5800_s29 + $0x150] sm:$0xff] }
 0x9bf   : > { %5276 = vmatprep.subr.bf16.mxu1 %v5275_v1  ;;  %v3934_v1 = vld [vmem:[%s5800_s29 + $0xe8] sm:$0xff] }
 0x9c0   : > { %v5580_v43 = vpop.eup %5579  ;;  %v3514_v20 = vadd.f32 %v4444_v4, %v3503_v13  ;;  %v3948_v13 = vld [vmem:[%s5800_s29 + $0x158] sm:$0xff] }
 0x9c1   : > { %v3493_v38 = vmul.f32 %v5580_v43, %v3453_v23  ;;  %v3906_v23 = vld [vmem:[%s5800_s29 + $0x8] sm:$0xff]  ;;  %v5323_v43 = vpack.c.bf16 %v3948_v13, %v3947_v17 }
 0x9c2   : > { %4447 = vmatmul.mubr.msk.f32.gmra.mrb[68].mxu1 %vm870_vm3, %v3514_v20  ;;  %5050 = vmatmul.mubr.msk.f32.gmra.mrb[66].mxu0 %vm870_vm3, %v3514_v20  ;;  %v5277_v60 = vpack.c.bf16 %v3906_v23, %v3905_v25  ;;  %v3931_v20 = vld [vmem:[%s5800_s29 + $0xd0] sm:$0xff]  ;;  %v5299_v25 = vpack.c.bf16 %v3934_v1, %v3933_v59  ;;  %v3917_v23 = vld [vmem:[%s5800_s29 + $0x60] sm:$0xff] }
 0x9c3   : > { %v3504_v0 = vmul.f32 %v4443_v3, %v3493_v38  ;;  %3667 = vmatprep.mubr.f32.mxu1 %v5627_v57  ;;  %5052 = vmatprep.mubr.msk.f32.mxu0 %vm5628_vm5, %v5627_v57  ;;  %v3932_v38 = vld [vmem:[%s5800_s29 + $0xd8] sm:$0xff] }
 0x9c4   : > { %v5582_v54 = vpop.eup %5581  ;;  %5278 = vmatpush3.bf16.msra.mxu1 %v5277_v60  ;;  %5324 = vmatpush3.bf16.msra.mxu0 %v5323_v43  ;;  %v3918_v60 = vld [vmem:[%s5800_s29 + $0x68] sm:$0xff] }
 0x9c5   : > { %v3515_v36 = vadd.f32 %v4444_v4, %v3504_v0  ;;  %v3494_v26 = vmul.f32 %v5582_v54, %v3454_v8  ;;  %v3924_v8 = vld [vmem:[%s5800_s29 + $0x98] sm:$0xff]  ;;  %v5295_v0 = vpack.c.bf16 %v3932_v38, %v3931_v20  ;;  %v3915_v54 = vld [vmem:[%s5800_s29 + $0x50] sm:$0xff]  ;;  %5325 = vmatprep.subr.bf16.mxu0 %v5626_v45  ;;  %v5301_v39 = vpack.c.bf16 %v3918_v60, %v3917_v23 }
 0x9c6   : > { %v5279_v50 = vpack.c.bf16 %v3924_v8, %v3923_v42  ;;  %v5329_v42 = vpack.c.bf16 %v3952_v32, %v3951_v61  ;;  %v3935_v8 = vld [vmem:[%s5800_s29 + $0xf0] sm:$0xff] }
 0x9c7   : > { %4448 = vmatmul.mubr.msk.f32.gmra.mrb[70].mxu1 %vm870_vm3, %v3515_v36  ;;  %5053 = vmatmul.mubr.msk.f32.gmra.mrb[68].mxu0 %vm870_vm3, %v3515_v36  ;;  %v3505_v41 = vmul.f32 %v4443_v3, %v3494_v26  ;;  %v5283_v3 = vpack.c.bf16 %v3926_v2, %v3925_v44  ;;  %v3916_v36 = vld [vmem:[%s5800_s29 + $0x58] sm:$0xff]  ;;  %v6963_v44 = vrot.slane %v3553_v22, %v1004_v37 }
 0x9c8   : > { %3673 = vmatprep.mubr.f32.mxu1 %v5627_v57  ;;  %5055 = vmatprep.mubr.msk.f32.mxu0 %vm5628_vm5, %v5627_v57  ;;  %v5297_v26 = vpack.c.bf16 %v3916_v36, %v3915_v54 }
 0x9c9   : > { %v3516_v40 = vadd.f32 %v4444_v4, %v3505_v41  ;;  %5280 = vmatprep.subr.bf16.mxu1 %v5279_v50  ;;  %v3910_v4 = vld [vmem:[%s5800_s29 + $0x28] sm:$0xff]  ;;  %v3949_v41 = vld [vmem:[%s5800_s29 + $0x160] sm:$0xff]  ;;  %v3936_v50 = vld [vmem:[%s5800_s29 + $0xf8] sm:$0xff] }
 0x9ca   : > { %5282 = vmatpush3.bf16.msra.mxu1 %v5281_v27  ;;  %v5285_v15 = vpack.c.bf16 %v3910_v4, %v3909_v30  ;;  %v5303_v21 = vpack.c.bf16 %v3936_v50, %v3935_v8  ;;  %v3920_v27 = vld [vmem:[%s5800_s29 + $0x78] sm:$0xff] }
 0x9cb   : > { %4449 = vmatmul.mubr.msk.f32.gmra.mrb[72].mxu1 %vm870_vm3, %v3516_v40  ;;  %5056 = vmatmul.mubr.msk.f32.gmra.mrb[70].mxu0 %vm870_vm3, %v3516_v40  ;;  %v3950_v40 = vld [vmem:[%s5800_s29 + $0x168] sm:$0xff]  ;;  %v5305_v49 = vpack.c.bf16 %v3920_v27, %v3919_v29 }
 0x9cc   : > { %5090 = vmatprep.mubr.msk.f32.mxu0 %vm5628_vm5, %v5627_v57  ;;  %5284 = vmatprep.subr.bf16.mxu1 %v5283_v3  ;;  %v5326_v48 = vpack.c.bf16 %v3950_v40, %v3949_v41 }
 0x9ce   : > { %5286 = vmatpush3.bf16.msra.mxu1 %v5285_v15  ;;  %5327 = vmatpush3.bf16.msra.mxu0 %v5326_v48 }
 0x9cf   : > { %5288 = vmatprep.subr.bf16.mxu1 %v5287_v51  ;;  %5328 = vmatprep.subr.bf16.mxu0 %v5626_v45  ;;  %v6959_v45 = vrot.slane %v3553_v22, %v1008_v35 }
 0x9d2   : > { %5290 = vmatpush3.bf16.msra.mxu1 %v5289_v11  ;;  %5330 = vmatpush3.bf16.msra.mxu0 %v5329_v42 }
 0x9d3   : > { %5292 = vmatprep.subr.bf16.mxu1 %v5291_v14 }
 0x9d6   : > { %5294 = vmatpush3.bf16.msra.mxu1 %v5293_v16 }
 0x9d7   : > { %5296 = vmatprep.subr.bf16.mxu1 %v5295_v0 }
 0x9da   : > { %5298 = vmatpush3.bf16.msra.mxu1 %v5297_v26 }
 0x9db   : > { %5300 = vmatprep.subr.bf16.mxu1 %v5299_v25 }
 0x9de   : > { %5302 = vmatpush3.bf16.msra.mxu1 %v5301_v39 }
 0x9df   : > { %5304 = vmatprep.subr.bf16.mxu1 %v5303_v21 }
 0x9e2   : > { %5306 = vmatpush3.bf16.msra.mxu1 %v5305_v49 }
 0xa65   : > { %v3651_v2 = vpop.f32.mrb[64].mxu1  ;;  %v3746_v3 = vpop.f32.mrb[62].mxu0 }
 0xa66   : > { %v6966_v30 = vadd.f32 %v3651_v2, %v6955_v28  ;;  %v3747_v4 = vadd.f32 %v3746_v3, %v6959_v45  ;;  %v3653_v15 = vpop.f32.mrb[65].mxu1  ;;  %v5045_v6 = vpop.f32.mrb[63].mxu0 }
 0xa67   : > { %v3654_v34 = vadd.f32 %v3653_v15, %v6963_v44 }
 0xa68   : > { %v3770_v19 = vmul.f32 %v6966_v30, %v6966_v30  ;;  %v3772_v35 = vmul.f32 %v3747_v4, %v3747_v4 }
 0xa69   : > { %v3771_v12 = vmul.f32 %v3654_v34, %v3654_v34  ;;  %v3657_v7 = vpop.f32.mrb[66].mxu1  ;;  %v3751_v33 = vpop.f32.mrb[64].mxu0 }
 0xa6a   : > { %v3785_v37 = vmul.f32 %v3770_v19, %v6966_v30  ;;  %v3787_v52 = vmul.f32 %v3772_v35, %v3747_v4  ;;  %v6974_v51 = vadd.f32 %v3657_v7, %v6955_v28  ;;  %v3752_v63 = vadd.f32 %v3751_v33, %v6959_v45  ;;  %v3659_v46 = vpop.f32.mrb[67].mxu1  ;;  %v5048_v11 = vpop.f32.mrb[65].mxu0 }
 0xa6b   : > { %v3786_v24 = vmul.f32 %v3771_v12, %v3654_v34  ;;  %v3660_v10 = vadd.f32 %v3659_v46, %v6963_v44 }
 0xa6c   : > { %v3800_v58 = vmul.f32 0.044715, %v3785_v37  ;;  %v3802_v47 = vmul.f32 0.044715, %v3787_v52  ;;  %v3773_v56 = vmul.f32 %v6974_v51, %v6974_v51  ;;  %v3775_v14 = vmul.f32 %v3752_v63, %v3752_v63 }
 0xa6d   : > { %v3801_v62 = vmul.f32 0.044715, %v3786_v24  ;;  %v3774_v5 = vmul.f32 %v3660_v10, %v3660_v10 }
 0xa6e   : > { %v3815_v16 = vadd.f32 %v3800_v58, %v6966_v30  ;;  %v3817_v17 = vadd.f32 %v3802_v47, %v3747_v4  ;;  %v3788_v13 = vmul.f32 %v3773_v56, %v6974_v51  ;;  %v3790_v43 = vmul.f32 %v3775_v14, %v3752_v63 }
 0xa6f   : > { %v3816_v20 = vadd.f32 %v3801_v62, %v3654_v34  ;;  %v3789_v38 = vmul.f32 %v3774_v5, %v3660_v10 }
 0xa70   : > { %v3830_v0 = vmul.f32 0.7978846, %v3815_v16  ;;  %v3832_v54 = vmul.f32 0.7978846, %v3817_v17  ;;  %v3803_v36 = vmul.f32 0.044715, %v3788_v13 }
 0xa71   : > { %v3831_v26 = vmul.f32 0.7978846, %v3816_v20  ;;  %v3805_v41 = vmul.f32 0.044715, %v3790_v43  ;;  %v3804_v40 = vmul.f32 0.044715, %v3789_v38 }
 0xa72   : > { %5583 = vtanh.f32 %v3830_v0  ;;  %v3818_v48 = vadd.f32 %v3803_v36, %v6974_v51 }
 0xa73   : > { %5585 = vtanh.f32 %v3832_v54  ;;  %v3820_v59 = vadd.f32 %v3805_v41, %v3752_v63  ;;  %v3819_v1 = vadd.f32 %v3804_v40, %v3660_v10 }
 0xa74   : > { %v3833_v25 = vmul.f32 0.7978846, %v3818_v48  ;;  %5587 = vtanh.f32 %v3831_v26 }
 0xa75   : > { %v3835_v23 = vmul.f32 0.7978846, %v3820_v59  ;;  %v3834_v60 = vmul.f32 0.7978846, %v3819_v1 }
 0xa76   : > { %5589 = vtanh.f32 %v3833_v25 }
 0xa77   : > { %5591 = vtanh.f32 %v3835_v23 }
 0xa78   : > { %5593 = vtanh.f32 %v3834_v60 }
 0xa7c   : > { %v5584_v39 = vpop.eup %5583 }
 0xa7d   : > { %v5586_v61 = vpop.eup %5585  ;;  %v3860_v32 = vadd.f32 1.0, %v5584_v39 }
 0xa7e   : > { %v5588_v42 = vpop.eup %5587  ;;  %v3862_v8 = vadd.f32 1.0, %v5586_v61 }
 0xa7f   : > { %v3861_v50 = vadd.f32 1.0, %v5588_v42  ;;  %v3875_v29 = vmul.f32 0.5, %v3860_v32 }
 0xa80   : > { %v5590_v21 = vpop.eup %5589  ;;  %v3877_v27 = vmul.f32 0.5, %v3862_v8 }
 0xa81   : > { %v5592_v49 = vpop.eup %5591  ;;  %v3876_v22 = vmul.f32 0.5, %v3861_v50  ;;  %v3863_v2 = vadd.f32 1.0, %v5590_v21  ;;  %v3890_v12 = vmul.f32 %v3875_v29, %v6966_v30 }
 0xa82   : > { %v5594_v3 = vpop.eup %5593  ;;  %v3892_v15 = vmul.f32 %v3877_v27, %v3747_v4  ;;  %v3865_v6 = vadd.f32 1.0, %v5592_v49 }
 0xa83   : > { %v3891_v19 = vmul.f32 %v3876_v22, %v3654_v34  ;;  %v3864_v35 = vadd.f32 1.0, %v5594_v3  ;;  %v3878_v33 = vmul.f32 0.5, %v3863_v2 }
 0xa84   : > { %5091 = vmatmul.mubr.f32.vlgmr.msra.gmra.mrb[72].mxu0 %v3892_v15  ;;  %v3880_v7 = vmul.f32 0.5, %v3865_v6 }
 0xa85   : > { %4017 = vmatprep.mubr.f32.mxu1 %v3891_v19  ;;  %5093 = vmatprep.mubr.msk.f32.mxu0 %vm5628_vm5, %v5627_v57  ;;  %v3879_v37 = vmul.f32 0.5, %v3864_v35  ;;  %v3893_v11 = vmul.f32 %v3878_v33, %v6974_v51 }
 0xa86   : > { %4018 = vmatmul.mubr.f32.vlgmr.msra.gmra.mrb[74].mxu1 %v3890_v12  ;;  %v3895_v52 = vmul.f32 %v3880_v7, %v3752_v63 }
 0xa87   : > { %v3894_v46 = vmul.f32 %v3879_v37, %v3660_v10 }
 0xa88   : > { %5094 = vmatmul.mubr.f32.gmra.mrb[74].mxu0 %v3895_v52 }
 0xa89   : > { %4022 = vmatprep.mubr.f32.mxu1 %v3894_v46  ;;  %5096 = vmatprep.mubr.msk.f32.mxu0 %vm5628_vm5, %v5627_v57 }
 0xa8a   : > { %4023 = vmatmul.mubr.f32.gmra.mrb[76].mxu1 %v3893_v11 }
 0xa95   : > { %v3663_v30 = vpop.f32.mrb[68].mxu1  ;;  %v3756_v4 = vpop.f32.mrb[66].mxu0 }
 0xa96   : > { %v6990_v34 = vadd.f32 %v3663_v30, %v6955_v28  ;;  %v6993_v24 = vadd.f32 %v3756_v4, %v6959_v45  ;;  %v3665_v58 = vpop.f32.mrb[69].mxu1  ;;  %v5051_v47 = vpop.f32.mrb[67].mxu0 }
 0xa97   : > { %v6996_v63 = vadd.f32 %v3665_v58, %v6963_v44 }
 0xa98   : > { %v3776_v51 = vmul.f32 %v6990_v34, %v6990_v34  ;;  %v3778_v10 = vmul.f32 %v6993_v24, %v6993_v24 }
 0xa99   : > { %v3777_v56 = vmul.f32 %v6996_v63, %v6996_v63 }
 0xa9a   : > { %v3669_v14 = vpop.f32.mrb[70].mxu1  ;;  %v3761_v62 = vpop.f32.mrb[68].mxu0  ;;  %v3791_v5 = vmul.f32 %v3776_v51, %v6990_v34  ;;  %v3793_v16 = vmul.f32 %v3778_v10, %v6993_v24 }
 0xa9b   : > { %v7007_v17 = vadd.f32 %v3669_v14, %v6955_v28  ;;  %v7010_v13 = vadd.f32 %v3761_v62, %v6959_v45  ;;  %v3671_v43 = vpop.f32.mrb[71].mxu1  ;;  %v5054_v20 = vpop.f32.mrb[69].mxu0  ;;  %v3792_v38 = vmul.f32 %v3777_v56, %v6996_v63 }
 0xa9c   : > { %v7014_v0 = vadd.f32 %v3671_v43, %v6963_v44  ;;  %v3806_v54 = vmul.f32 0.044715, %v3791_v5  ;;  %v3808_v36 = vmul.f32 0.044715, %v3793_v16 }
 0xa9d   : > { %v3779_v26 = vmul.f32 %v7007_v17, %v7007_v17  ;;  %v3781_v41 = vmul.f32 %v7010_v13, %v7010_v13  ;;  %v3807_v40 = vmul.f32 0.044715, %v3792_v38 }
 0xa9e   : > { %v3780_v48 = vmul.f32 %v7014_v0, %v7014_v0  ;;  %v3821_v59 = vadd.f32 %v3806_v54, %v6990_v34  ;;  %v3823_v1 = vadd.f32 %v3808_v36, %v6993_v24  ;;  %v3675_v60 = vpop.f32.mrb[72].mxu1  ;;  %v3766_v39 = vpop.f32.mrb[70].mxu0 }
 0xa9f   : > { %v3794_v25 = vmul.f32 %v3779_v26, %v7007_v17  ;;  %v3796_v23 = vmul.f32 %v3781_v41, %v7010_v13  ;;  %v3822_v61 = vadd.f32 %v3807_v40, %v6996_v63  ;;  %v7029_v42 = vadd.f32 %v3675_v60, %v6955_v28  ;;  %v3677_v50 = vpop.f32.mrb[73].mxu1  ;;  %v5057_v21 = vpop.f32.mrb[71].mxu0 }
 0xaa0   : > { %v3795_v32 = vmul.f32 %v3780_v48, %v7014_v0  ;;  %v7032_v8 = vadd.f32 %v3766_v39, %v6959_v45  ;;  %v3836_v29 = vmul.f32 0.7978846, %v3821_v59  ;;  %v3838_v27 = vmul.f32 0.7978846, %v3823_v1 }
 0xaa1   : > { %v3809_v49 = vmul.f32 0.044715, %v3794_v25  ;;  %v7035_v22 = vadd.f32 %v3677_v50, %v6963_v44  ;;  %v3837_v2 = vmul.f32 0.7978846, %v3822_v61  ;;  %v3811_v3 = vmul.f32 0.044715, %v3796_v23 }
 0xaa2   : > { %v3810_v15 = vmul.f32 0.044715, %v3795_v32  ;;  %v3782_v6 = vmul.f32 %v7029_v42, %v7029_v42  ;;  %v3784_v45 = vmul.f32 %v7032_v8, %v7032_v8  ;;  %5595 = vtanh.f32 %v3838_v27 }
 0xaa3   : > { %v3824_v28 = vadd.f32 %v3809_v49, %v7007_v17  ;;  %v3783_v19 = vmul.f32 %v7035_v22, %v7035_v22  ;;  %v3826_v35 = vadd.f32 %v3811_v3, %v7010_v13  ;;  %5597 = vtanh.f32 %v3837_v2 }
 0xaa4   : > { %v3825_v44 = vadd.f32 %v3810_v15, %v7014_v0  ;;  %v3797_v12 = vmul.f32 %v3782_v6, %v7029_v42  ;;  %v3799_v33 = vmul.f32 %v3784_v45, %v7032_v8  ;;  %5599 = vtanh.f32 %v3836_v29 }
 0xaa5   : > { %v3839_v7 = vmul.f32 0.7978846, %v3824_v28  ;;  %v3798_v37 = vmul.f32 %v3783_v19, %v7035_v22  ;;  %v3841_v52 = vmul.f32 0.7978846, %v3826_v35 }
 0xaa6   : > { %v3840_v46 = vmul.f32 0.7978846, %v3825_v44  ;;  %v3812_v11 = vmul.f32 0.044715, %v3797_v12  ;;  %v3814_v30 = vmul.f32 0.044715, %v3799_v33 }
 0xaa7   : > { %v3813_v4 = vmul.f32 0.044715, %v3798_v37  ;;  %5601 = vtanh.f32 %v3839_v7 }
 0xaa8   : > { %v3827_v58 = vadd.f32 %v3812_v11, %v7029_v42  ;;  %5603 = vtanh.f32 %v3841_v52  ;;  %v3829_v47 = vadd.f32 %v3814_v30, %v7032_v8 }
 0xaa9   : > { %v3828_v51 = vadd.f32 %v3813_v4, %v7035_v22  ;;  %5605 = vtanh.f32 %v3840_v46 }
 0xaaa   : > { %v3842_v10 = vmul.f32 0.7978846, %v3827_v58  ;;  %v3844_v56 = vmul.f32 0.7978846, %v3829_v47 }
 0xaab   : > { %v3843_v14 = vmul.f32 0.7978846, %v3828_v51 }
 0xaac   : > { %5607 = vtanh.f32 %v3842_v10  ;;  %v5596_v62 = vpop.eup %5595 }
 0xaad   : > { %5609 = vtanh.f32 %v3844_v56  ;;  %v5598_v5 = vpop.eup %5597  ;;  %v3868_v16 = vadd.f32 1.0, %v5596_v62 }
 0xaae   : > { %5611 = vtanh.f32 %v3843_v14  ;;  %v5600_v43 = vpop.eup %5599  ;;  %v3867_v20 = vadd.f32 1.0, %v5598_v5 }
 0xaaf   : > { %v3883_v38 = vmul.f32 0.5, %v3868_v16  ;;  %v3866_v54 = vadd.f32 1.0, %v5600_v43 }
 0xab0   : > { %v3882_v26 = vmul.f32 0.5, %v3867_v20 }
 0xab1   : > { %v5602_v36 = vpop.eup %5601  ;;  %v3898_v40 = vmul.f32 %v3883_v38, %v6993_v24  ;;  %v3881_v48 = vmul.f32 0.5, %v3866_v54 }
 0xab2   : > { %v5604_v41 = vpop.eup %5603  ;;  %v3869_v59 = vadd.f32 1.0, %v5602_v36  ;;  %v3897_v25 = vmul.f32 %v3882_v26, %v6996_v63 }
 0xab3   : > { %v5606_v1 = vpop.eup %5605  ;;  %v3871_v23 = vadd.f32 1.0, %v5604_v41  ;;  %5097 = vmatmul.mubr.f32.gmra.mrb[76].mxu0 %v3898_v40  ;;  %v3896_v60 = vmul.f32 %v3881_v48, %v6990_v34 }
 0xab4   : > { %v3870_v39 = vadd.f32 1.0, %v5606_v1  ;;  %4027 = vmatprep.mubr.f32.mxu1 %v3897_v25  ;;  %5099 = vmatprep.mubr.msk.f32.mxu0 %vm5628_vm5, %v5627_v57  ;;  %v3884_v32 = vmul.f32 0.5, %v3869_v59 }
 0xab5   : > { %v3886_v61 = vmul.f32 0.5, %v3871_v23  ;;  %4028 = vmatmul.mubr.f32.gmra.mrb[78].mxu1 %v3896_v60 }
 0xab6   : > { %v5608_v50 = vpop.eup %5607  ;;  %v3885_v21 = vmul.f32 0.5, %v3870_v39  ;;  %v3899_v34 = vmul.f32 %v3884_v32, %v7007_v17 }
 0xab7   : > { %v5610_v24 = vpop.eup %5609  ;;  %v3901_v29 = vmul.f32 %v3886_v61, %v7010_v13  ;;  %v3872_v27 = vadd.f32 1.0, %v5608_v50 }
 0xab8   : > { %v5612_v49 = vpop.eup %5611  ;;  %v3900_v63 = vmul.f32 %v3885_v21, %v7014_v0  ;;  %v3874_v2 = vadd.f32 1.0, %v5610_v24 }
 0xab9   : > { %5100 = vmatmul.mubr.f32.gmra.mrb[78].mxu0 %v3901_v29  ;;  %v3873_v3 = vadd.f32 1.0, %v5612_v49  ;;  %v3887_v6 = vmul.f32 0.5, %v3872_v27 }
 0xaba   : > { %4032 = vmatprep.mubr.f32.mxu1 %v3900_v63  ;;  %5102 = vmatprep.mubr.msk.f32.mxu0 %vm5628_vm5, %v5627_v57  ;;  %v3889_v15 = vmul.f32 0.5, %v3874_v2 }
 0xabb   : > { %4033 = vmatmul.mubr.f32.gmra.mrb[80].mxu1 %v3899_v34  ;;  %v3888_v28 = vmul.f32 0.5, %v3873_v3  ;;  %v3902_v0 = vmul.f32 %v3887_v6, %v7029_v42 }
 0xabc   : > { %v3904_v13 = vmul.f32 %v3889_v15, %v7032_v8  ;;  %v4455_v8 = vld [vmem:[%s7143_s20] ss:$0 sm:$0xff] }
 0xabd   : > { %v3903_v45 = vmul.f32 %v3888_v28, %v7035_v22 }
 0xabe   : > { %5103 = vmatmul.mubr.f32.gmra.mrb[80].mxu0 %v3904_v13 }
 0xabf   : > { %4037 = vmatprep.mubr.f32.mxu1 %v3903_v45 }
 0xac0   : > { %4038 = vmatmul.mubr.f32.gmra.mrb[82].mxu1 %v3902_v0 }
 0xb57   : > { %v4109_v17 = vpop.f32.mrb[72].mxu0 }
 0xb58   : > { %v5092_v19 = vpop.f32.mrb[73].mxu0 }
 0xb59   : > { %v4647_v35 = vpop.f32.mrb[74].mxu1 }
 0xb5a   : > { %v4648_v44 = vpop.f32.mrb[75].mxu1 }
 0xb5b   : > { %v4649_v57 = vadd.f32 %v4648_v44, %v4647_v35  ;;  %v4114_v12 = vpop.f32.mrb[74].mxu0 }
 0xb5c   : > { %v5095_v7 = vpop.f32.mrb[75].mxu0 }
 0xb5d   : > { %v4110_v33 = vadd.f32 %v4649_v57, %v4109_v17  ;;  %v4650_v37 = vpop.f32.mrb[76].mxu1 }
 0xb5e   : > { %v4651_v22 = vpop.f32.mrb[77].mxu1 }
 0xb5f   : > { %v4133_v42 = vadd.f32 %v4110_v33, %v6781_v18  ;;  %v4652_v52 = vadd.f32 %v4651_v22, %v4650_v37 }
 0xb61   : > { %v4145_v46 = vadd.f32 %v4455_v8, %v4133_v42  ;;  %v4115_v11 = vadd.f32 %v4652_v52, %v4114_v12 }
 0xb63   : > { %4150 = vst.msk [vmem:[#allocation2] sm:$0xff] %vm870_vm3, %v4145_v46  ;;  %4155 = vst.msk [vmem:[%s5805_s19] sm:$0xff] %vm870_vm3, %v4145_v46  ;;  %v4134_v30 = vadd.f32 %v4115_v11, %v6785_v31 }
 0xb65   : > { %v4146_v4 = vadd.f32 %v4455_v8, %v4134_v30 }
 0xb67   : > { %4151 = vst.msk [vmem:[#allocation2 + $0x8] sm:$0xff] %vm870_vm3, %v4146_v4  ;;  %4156 = vst.msk [vmem:[%s5805_s19 + $0x8] sm:$0xff] %vm870_vm3, %v4146_v4 }
 0xb86   : > { %v4119_v58 = vpop.f32.mrb[76].mxu0 }
 0xb87   : > { %v5098_v47 = vpop.f32.mrb[77].mxu0 }
 0xb88   : > { %v4653_v51 = vpop.f32.mrb[78].mxu1 }
 0xb89   : > { %v4654_v10 = vpop.f32.mrb[79].mxu1 }
 0xb8a   : > { %v4655_v18 = vadd.f32 %v4654_v10, %v4653_v51 }
 0xb8c   : > { %v4124_v56 = vpop.f32.mrb[78].mxu0  ;;  %v4120_v14 = vadd.f32 %v4655_v18, %v4119_v58 }
 0xb8d   : > { %v5101_v62 = vpop.f32.mrb[79].mxu0 }
 0xb8e   : > { %v4656_v5 = vpop.f32.mrb[80].mxu1  ;;  %v4135_v16 = vadd.f32 %v4120_v14, %v6789_v55 }
 0xb8f   : > { %v4657_v43 = vpop.f32.mrb[81].mxu1 }
 0xb90   : > { %v4658_v31 = vadd.f32 %v4657_v43, %v4656_v5  ;;  %v4147_v20 = vadd.f32 %v4455_v8, %v4135_v16 }
 0xb91   : > { %v4129_v38 = vpop.f32.mrb[80].mxu0 }
 0xb92   : > { %v4125_v54 = vadd.f32 %v4658_v31, %v4124_v56  ;;  %v5104_v36 = vpop.f32.mrb[81].mxu0  ;;  %4152 = vst.msk [vmem:[#allocation2 + $0x10] sm:$0xff] %vm870_vm3, %v4147_v20  ;;  %4157 = vst.msk [vmem:[%s5805_s19 + $0x10] sm:$0xff] %vm870_vm3, %v4147_v20 }
 0xb93   : > { %v4659_v26 = vpop.f32.mrb[82].mxu1 }
 0xb94   : > { %v4136_v41 = vadd.f32 %v4125_v54, %v6793_v9  ;;  %v4660_v40 = vpop.f32.mrb[83].mxu1 }
 0xb95   : > { %v4661_v48 = vadd.f32 %v4660_v40, %v4659_v26 }
 0xb96   : > { %v4148_v59 = vadd.f32 %v4455_v8, %v4136_v41 }
 0xb97   : > { %v4130_v1 = vadd.f32 %v4661_v48, %v4129_v38 }
 0xb98   : > { %4153 = vst.msk [vmem:[#allocation2 + $0x18] sm:$0xff] %vm870_vm3, %v4148_v59  ;;  %4158 = vst.msk [vmem:[%s5805_s19 + $0x18] sm:$0xff] %vm870_vm3, %v4148_v59 }
 0xb99   : > { %v4137_v55 = vadd.f32 %v4130_v1, %v6797_v53 }
 0xb9b   : > { %v4149_v25 = vadd.f32 %v4455_v8, %v4137_v55 }
 0xb9d   : > { %4154 = vst.msk [vmem:[#allocation2 + $0x20] sm:$0x3] %vm883_vm4, %v4149_v25  ;;  %4159 = vst.msk [vmem:[%s5805_s19 + $0x20] sm:$0x3] %vm883_vm4, %v4149_v25 }
 0xb9e PF: > { %s7144_s26 = sld [smem:[#allocation4_spill]] }
 0xba4   : > { %s27_s24 = sadd.s32 1, %s7144_s26  }
 0xba5   : > { %p24_p5 = scmp.ge.s32.totalorder %s27_s24, 14  }
 0xba7   :  { %26 = sbr.rel (!%p24_p5) target bundleno = 10 (0xa), region = 155 }

// kernel: my_vit_forward.8
= control target key start
LH: loop header
LB: loop body
LE: loop exit
PB: predicated region body
PF: predicated region fallthrough
CT: control target
= control target key end

     0   :  { %s808_s12 = smov 0   ;;  %s810_s13 = smov 0   ;;  %s880_s0 = inlined_call_operand.vmem [shape: f32[2,96,128], index: 0, kind: input, shape index: {}]   ;;  %s881_s1 = inlined_call_operand.vmem [shape: f32[2,2,32,48], index: 1, kind: input, shape index: {}]   ;;  %s882_s2 = inlined_call_operand.vmem [shape: f32[2,2,32,1], index: 2, kind: input, shape index: {}]   ;;  %s883_s3 = inlined_call_operand.vmem [shape: f32[2,64,128], index: 3, kind: output, shape index: {}]  }
   0x1   :  { %s812_s14 = smov 0  }
   0x2 LB: > { %s25_s15 = sadd.s32 1, %s781_s13  ;;  %p626_p0 = scmp.ge.s32.totalorder %s785_s14, 1  ;;  %s785_s14 = sphi %s812_s14, %s13_s14   ;;  %s781_s13 = sphi %s810_s13, %s885_s13   ;;  %s777_s12 = sphi %s808_s12, %s884_s12  }
   0x3   : > { %p27_p1 = scmp.ge.s32.totalorder %s25_s15, 2  ;;  %p176_p2 = scmp.lt.s32.totalorder %s785_s14, 3 }
   0x5   : > { %s887_s15 = smov (%p27_p1, %s25_s15), 0  ;;  %p177_p3 = pnand %p626_p0, %p176_p2 }
   0x6   : > { %p216_p4 = scmp.lt.s32.totalorder (!%p177_p3), %s777_s12, 1  ;;  %v787_v0 = vmov (!%p177_p3), 0   ;;  %vm276_vm0 = vcmask (!%p177_p3), 392192  }
   0x7   : > { %180 = sbr.rel (%p177_p3) target bundleno = 254 (0xfe), region = 32  ;;  %762 = vset.pattern.permute.xlu1 (!%p177_p3), %v787_v0  ;;  %761 = vset.pattern.permute.xlu0 (!%p177_p3), %v787_v0 }
   0xe   : > { %s889_s12 = smov (!%p216_p4, %s777_s12), 1 }
   0xf   : > { %s735_s16 = smul.u32 96, %s889_s12  ;;  %s826_s17 = sshll.u32 %s889_s12, 6 }
  0x10   : > { %s832_s20 = scalar_lea.vmem %s881_s1, %s826_s17  ;;  %s845_s26 = scalar_lea.vmem %s882_s2, %s826_s17 }
  0x11   : > { %s223_s23 = scalar_lea.vmem %s880_s0, %s735_s16  ;;  %v248_v1 = vld [vmem:[%s832_s20] sm:$0xff]  ;;  %v254_v20 = vld [vmem:[%s845_s26 + $0x10] sm:$0xff]  ;;  %v255_v23 = vld [vmem:[%s845_s26 + $0x18] sm:$0xff]  ;;  %s241_s29 = scalar_lea.vmem %s883_s3, %s826_s17 }
  0x12   : > { %v638_v2 = vld [vmem:[%s832_s20 + $0x20] sm:$0xff]  ;;  %v243_v4 = vld [vmem:[%s223_s23 + $0x8] sm:$0xff]  ;;  %v378_v5 = vld [vmem:[%s223_s23 + $0x30] sm:$0xff]  ;;  %687 = vmatprep.mubr.msk.f32.mxu0 %vm276_vm0, %v248_v1  ;;  %268 = vperm.xlu1 %762, %v254_v20  }
  0x13   : > { %v242_v3 = vld [vmem:[%s223_s23] sm:$0xff]  ;;  %705 = vmatprep.mubr.msk.f32.mxu1 %vm276_vm0, %v638_v2  ;;  %v379_v7 = vld [vmem:[%s223_s23 + $0x38] sm:$0xff]  ;;  %v244_v8 = vld [vmem:[%s223_s23 + $0x10] sm:$0xff] }
  0x14   : > { %v711_v6 = vpack.c.bf16 %v243_v4, %v242_v3  ;;  %v245_v9 = vld [vmem:[%s223_s23 + $0x18] sm:$0xff]  ;;  %v723_v10 = vpack.c.bf16 %v379_v7, %v378_v5  ;;  %v380_v12 = vld [vmem:[%s223_s23 + $0x40] sm:$0xff]  ;;  %v381_v13 = vld [vmem:[%s223_s23 + $0x48] sm:$0xff] }
  0x15   : > { %v715_v11 = vpack.c.bf16 %v245_v9, %v244_v8  ;;  %v246_v14 = vld [vmem:[%s223_s23 + $0x20] sm:$0xff]  ;;  %v727_v15 = vpack.c.bf16 %v381_v13, %v380_v12  ;;  %v247_v16 = vld [vmem:[%s223_s23 + $0x28] sm:$0xff]  ;;  %v382_v17 = vld [vmem:[%s223_s23 + $0x50] sm:$0xff] }
  0x16   : > { %712 = vmatprep.subr.bf16.mxu0 %v711_v6  ;;  %v383_v18 = vld [vmem:[%s223_s23 + $0x58] sm:$0xff]  ;;  %724 = vmatprep.subr.bf16.mxu1 %v723_v10  ;;  %v719_v19 = vpack.c.bf16 %v247_v16, %v246_v14  ;;  %v252_v22 = vld [vmem:[%s845_s26] sm:$0xff]  ;;  %v253_v24 = vld [vmem:[%s845_s26 + $0x8] sm:$0xff] }
  0x17   : > { %714 = vmatpush3.bf16.msra.mxu0 %v711_v6  ;;  %726 = vmatpush3.bf16.msra.mxu1 %v723_v10  ;;  %v731_v21 = vpack.c.bf16 %v383_v18, %v382_v17  ;;  %v643_v25 = vld [vmem:[%s845_s26 + $0x28] sm:$0xff]  ;;  %v642_v27 = vld [vmem:[%s845_s26 + $0x20] sm:$0xff]  ;;  %v250_v29 = vld [vmem:[%s832_s20 + $0x10] sm:$0xff] }
  0x18   : > { %716 = vmatprep.subr.bf16.mxu0 %v715_v11  ;;  %728 = vmatprep.subr.bf16.mxu1 %v727_v15  ;;  %v249_v26 = vld [vmem:[%s832_s20 + $0x8] sm:$0xff]  ;;  %v640_v30 = vld [vmem:[%s832_s20 + $0x30] sm:$0xff]  ;;  %v645_v31 = vld [vmem:[%s845_s26 + $0x38] sm:$0xff] }
  0x19   : > { %258 = vperm.xlu0 %761, %v252_v22   ;;  %273 = vperm.xlu1 %762, %v255_v23   ;;  %v639_v28 = vld [vmem:[%s832_s20 + $0x28] sm:$0xff]  ;;  %v251_v32 = vld [vmem:[%s832_s20 + $0x18] sm:$0xff]  ;;  %v644_v33 = vld [vmem:[%s845_s26 + $0x30] sm:$0xff] }
  0x1a   : > { %v641_v34 = vld [vmem:[%s832_s20 + $0x38] sm:$0xff] }
  0x1b   : > { %718 = vmatpush3.bf16.msra.mxu0 %v715_v11  ;;  %730 = vmatpush3.bf16.msra.mxu1 %v727_v15 }
  0x1c   : > { %720 = vmatprep.subr.bf16.mxu0 %v719_v19  ;;  %732 = vmatprep.subr.bf16.mxu1 %v731_v21 }
  0x1d   : > { %263 = vperm.xlu0 %761, %v253_v24   ;;  %401 = vperm.xlu1 %762, %v643_v25  }
  0x1f   : > { %722 = vmatpush3.bf16.msra.mxu0 %v719_v19  ;;  %734 = vmatpush3.bf16.msra.mxu1 %v731_v21 }
  0x21   : > { %396 = vperm.xlu0 %761, %v642_v27   ;;  %411 = vperm.xlu1 %762, %v645_v31  }
  0x22   : > { %688 = vmatmul.mubr.msk.f32.vlgmr.msra.gmra.mrb[0].mxu0 %vm276_vm0, %v249_v26  ;;  %706 = vmatmul.mubr.msk.f32.vlgmr.msra.gmra.mrb[0].mxu1 %vm276_vm0, %v639_v28 }
  0x23   : > { %690 = vmatprep.mubr.msk.f32.mxu0 %vm276_vm0, %v250_v29  ;;  %708 = vmatprep.mubr.msk.f32.mxu1 %vm276_vm0, %v640_v30 }
  0x25   : > { %406 = vperm.xlu0 %761, %v644_v33  }
  0x26   : > { %691 = vmatmul.mubr.msk.f32.gmra.mrb[2].mxu0 %vm276_vm0, %v251_v32  ;;  %709 = vmatmul.mubr.msk.f32.gmra.mrb[2].mxu1 %vm276_vm0, %v641_v34 }
  0x91   : > { %v269_v35 = vpop.permute.xlu1 %268 }
  0x98   : > { %v259_v36 = vpop.permute.xlu0 %258  ;;  %v274_v37 = vpop.permute.xlu1 %273 }
  0x9c   : > { %v264_v38 = vpop.permute.xlu0 %263  ;;  %v402_v39 = vpop.permute.xlu1 %401 }
  0xa0   : > { %v397_v40 = vpop.permute.xlu0 %396  ;;  %v412_v49 = vpop.permute.xlu1 %411 }
  0xa4   : > { %v407_v54 = vpop.permute.xlu0 %406 }
  0xf5   : > { %v689_v41 = vpop.f32.mrb[0].mxu0  ;;  %v707_v43 = vpop.f32.mrb[0].mxu1 }
  0xf6   : > { %v361_v42 = vadd.f32 %v689_v41, %v264_v38  ;;  %v355_v44 = vpop.f32.mrb[1].mxu0  ;;  %v498_v45 = vadd.f32 %v707_v43, %v402_v39  ;;  %v492_v47 = vpop.f32.mrb[1].mxu1 }
  0xf7   : > { %v356_v46 = vadd.f32 %v355_v44, %v259_v36  ;;  %v493_v48 = vadd.f32 %v492_v47, %v397_v40 }
  0xf8   : > { %375 = vst [vmem:[%s241_s29 + $0x8] sm:$0xff] %v361_v42  ;;  %512 = vst [vmem:[%s241_s29 + $0x28] sm:$0xff] %v498_v45 }
  0xf9   : > { %374 = vst [vmem:[%s241_s29] sm:$0xff] %v356_v46  ;;  %v692_v50 = vpop.f32.mrb[2].mxu0  ;;  %511 = vst [vmem:[%s241_s29 + $0x20] sm:$0xff] %v493_v48  ;;  %v710_v52 = vpop.f32.mrb[2].mxu1 }
  0xfa   : > { %v371_v51 = vadd.f32 %v692_v50, %v274_v37  ;;  %v365_v53 = vpop.f32.mrb[3].mxu0  ;;  %v508_v55 = vadd.f32 %v710_v52, %v412_v49  ;;  %v502_v57 = vpop.f32.mrb[3].mxu1 }
  0xfb   : > { %v366_v56 = vadd.f32 %v365_v53, %v269_v35  ;;  %v503_v58 = vadd.f32 %v502_v57, %v407_v54 }
  0xfc   : > { %377 = vst [vmem:[%s241_s29 + $0x18] sm:$0xff] %v371_v51  ;;  %514 = vst [vmem:[%s241_s29 + $0x38] sm:$0xff] %v508_v55 }
  0xfd   : > { %376 = vst [vmem:[%s241_s29 + $0x10] sm:$0xff] %v366_v56  ;;  %513 = vst [vmem:[%s241_s29 + $0x30] sm:$0xff] %v503_v58 }
  0xfe PF: > { %s13_s14 = sadd.s32 1, %s785_s14   ;;  %s884_s12 = smov %s781_s13 }
  0xff   : > { %p10_p5 = scmp.ge.s32.totalorder %s13_s14, 4   ;;  %s885_s13 = smov %s887_s15 }
 0x101   :  { %12 = sbr.rel (!%p10_p5) target bundleno = 2 (0x2), region = 70 }

// kernel: my_vit_forward.9
= control target key start
LH: loop header
LB: loop body
LE: loop exit
PB: predicated region body
PF: predicated region fallthrough
CT: control target
= control target key end

     0   :  { %v297_v3 = vmov 0.0   ;;  %v298_v8 = vmov 0   ;;  %vm58_vm0 = vcmask 261120   ;;  %s447_s0 = inlined_call_operand.vmem [shape: f32[1,32,512], index: 0, kind: input, shape index: {}]   ;;  %s448_s2 = inlined_call_operand.vmem [shape: f32[1,1,32,1], index: 2, kind: input, shape index: {}]   ;;  %s449_s1 = inlined_call_operand.vmem [shape: f32[1,1,32,32], index: 1, kind: input, shape index: {}]   ;;  %s450_s3 = inlined_call_operand.vmem [shape: f32[1,32,512], index: 3, kind: output, shape index: {}]  }
   0x1   :  { %v15_v0 = vld [vmem:[%s447_s0 + $0x8] sm:$0xff]  ;;  %v17_v2 = vld [vmem:[%s447_s0 + $0x18] sm:$0xff]  ;;  %135 = vmatprep.mubr.f32.mxu0 %v297_v3  ;;  %224 = vmatprep.mubr.f32.mxu1 %v297_v3  ;;  %v14_v6 = vld [vmem:[%s447_s0] sm:$0xff] }
   0x2   :  { %v19_v1 = vld [vmem:[%s447_s0 + $0x28] sm:$0xff]  ;;  %v21_v5 = vld [vmem:[%s447_s0 + $0x38] sm:$0xff]  ;;  %v18_v7 = vld [vmem:[%s447_s0 + $0x20] sm:$0xff]  ;;  %295 = vset.pattern.permute.xlu0 %v298_v8  ;;  %296 = vset.pattern.permute.xlu1 %v298_v8 }
   0x3   :  { %v277_v4 = vpack.c.bf16 %v19_v1, %v15_v0  ;;  %v285_v9 = vpack.c.bf16 %v21_v5, %v17_v2  ;;  %v279_v10 = vpack.c.bf16 %v18_v7, %v14_v6  ;;  %v16_v11 = vld [vmem:[%s447_s0 + $0x10] sm:$0xff]  ;;  %v23_v13 = vld [vmem:[%s447_s0 + $0x48] sm:$0xff]  ;;  %v25_v16 = vld [vmem:[%s447_s0 + $0x58] sm:$0xff] }
   0x4   :  { %v20_v12 = vld [vmem:[%s447_s0 + $0x30] sm:$0xff]  ;;  %v27_v15 = vld [vmem:[%s447_s0 + $0x68] sm:$0xff]  ;;  %v29_v17 = vld [vmem:[%s447_s0 + $0x78] sm:$0xff] }
   0x5   :  { %278 = vmatprep.subr.bf16.mxu0 %v277_v4  ;;  %v287_v14 = vpack.c.bf16 %v20_v12, %v16_v11  ;;  %286 = vmatprep.subr.bf16.mxu1 %v285_v9  ;;  %v281_v18 = vpack.c.bf16 %v27_v15, %v23_v13  ;;  %v289_v19 = vpack.c.bf16 %v29_v17, %v25_v16  ;;  %v22_v20 = vld [vmem:[%s447_s0 + $0x40] sm:$0xff]  ;;  %v24_v22 = vld [vmem:[%s447_s0 + $0x50] sm:$0xff]  ;;  %v35_v29 = vld [vmem:[%s448_s2 + $0x8] sm:$0xff] }
   0x6   :  { %280 = vmatpush1.bf16.msra.mxu0 %v279_v10  ;;  %v26_v21 = vld [vmem:[%s447_s0 + $0x60] sm:$0xff]  ;;  %v28_v24 = vld [vmem:[%s447_s0 + $0x70] sm:$0xff]  ;;  %v37_v30 = vld [vmem:[%s448_s2 + $0x18] sm:$0xff] }
   0x7   :  { %288 = vmatpush1.bf16.msra.mxu1 %v287_v14  ;;  %v283_v23 = vpack.c.bf16 %v26_v21, %v22_v20  ;;  %282 = vmatprep.subr.bf16.mxu0 %v281_v18  ;;  %v291_v25 = vpack.c.bf16 %v28_v24, %v24_v22  ;;  %v34_v26 = vld [vmem:[%s448_s2] sm:$0xff]  ;;  %v36_v27 = vld [vmem:[%s448_s2 + $0x10] sm:$0xff]  ;;  %v31_v31 = vld [vmem:[%s449_s1 + $0x8] sm:$0xff] }
   0x8   :  { %290 = vmatprep.subr.bf16.mxu1 %v289_v19  ;;  %40 = vperm.xlu0 %295, %v34_v26   ;;  %v30_v28 = vld [vmem:[%s449_s1] sm:$0xff]  ;;  %v32_v32 = vld [vmem:[%s449_s1 + $0x10] sm:$0xff]  ;;  %v33_v33 = vld [vmem:[%s449_s1 + $0x18] sm:$0xff] }
   0x9   :  { %50 = vperm.xlu1 %296, %v36_v27  }
   0xa   :  { %284 = vmatpush1.bf16.msra.mxu0 %v283_v23 }
   0xb   :  { %292 = vmatpush1.bf16.msra.mxu1 %v291_v25 }
   0xc   :  { %45 = vperm.xlu0 %295, %v35_v29  }
   0xd   :  { %269 = vmatmul.mubr.msk.f32.vlgmr.msra.gmra.mrb[0].mxu0 %vm58_vm0, %v30_v28  ;;  %55 = vperm.xlu1 %296, %v37_v30  }
   0xe   :  { %273 = vmatmul.mubr.msk.f32.vlgmr.msra.gmra.mrb[0].mxu1 %vm58_vm0, %v30_v28  ;;  %141 = vmatprep.mubr.f32.mxu0 %v297_v3 }
   0xf   :  { %230 = vmatprep.mubr.f32.mxu1 %v297_v3 }
  0x11   :  { %270 = vmatmul.mubr.msk.f32.gmra.mrb[2].mxu0 %vm58_vm0, %v31_v31 }
  0x12   :  { %274 = vmatmul.mubr.msk.f32.gmra.mrb[2].mxu1 %vm58_vm0, %v31_v31  ;;  %147 = vmatprep.mubr.f32.mxu0 %v297_v3 }
  0x13   :  { %236 = vmatprep.mubr.f32.mxu1 %v297_v3 }
  0x15   :  { %271 = vmatmul.mubr.msk.f32.gmra.mrb[4].mxu0 %vm58_vm0, %v32_v32 }
  0x16   :  { %275 = vmatmul.mubr.msk.f32.gmra.mrb[4].mxu1 %vm58_vm0, %v32_v32  ;;  %153 = vmatprep.mubr.f32.mxu0 %v297_v3 }
  0x17   :  { %242 = vmatprep.mubr.f32.mxu1 %v297_v3 }
  0x19   :  { %272 = vmatmul.mubr.msk.f32.gmra.mrb[6].mxu0 %vm58_vm0, %v33_v33 }
  0x1a   :  { %276 = vmatmul.mubr.msk.f32.gmra.mrb[6].mxu1 %vm58_vm0, %v33_v33 }
  0x87   :  { %v41_v34 = vpop.permute.xlu0 %40 }
  0x88   :  { %v51_v49 = vpop.permute.xlu1 %50 }
  0x8b   :  { %v46_v42 = vpop.permute.xlu0 %45 }
  0x8c   :  { %v56_v61 = vpop.permute.xlu1 %55 }
  0xe0   :  { %v137_v35 = vpop.f32.mrb[0].mxu0 }
  0xe1   :  { %v138_v36 = vadd.f32 %v137_v35, %v41_v34  ;;  %v226_v37 = vpop.f32.mrb[0].mxu1  ;;  %v139_v38 = vpop.f32.mrb[1].mxu0 }
  0xe2   :  { %v227_v39 = vadd.f32 %v226_v37, %v41_v34  ;;  %v140_v40 = vadd.f32 %v139_v38, %v41_v34  ;;  %v228_v41 = vpop.f32.mrb[1].mxu1 }
  0xe3   :  { %249 = vst [vmem:[%s450_s3] sm:$0xff] %v138_v36  ;;  %v229_v43 = vadd.f32 %v228_v41, %v41_v34 }
  0xe4   :  { %251 = vst [vmem:[%s450_s3 + $0x10] sm:$0xff] %v227_v39  ;;  %250 = vst [vmem:[%s450_s3 + $0x8] sm:$0xff] %v140_v40  ;;  %v143_v44 = vpop.f32.mrb[2].mxu0 }
  0xe5   :  { %252 = vst [vmem:[%s450_s3 + $0x18] sm:$0xff] %v229_v43  ;;  %v144_v45 = vadd.f32 %v143_v44, %v46_v42  ;;  %v232_v46 = vpop.f32.mrb[2].mxu1  ;;  %v145_v47 = vpop.f32.mrb[3].mxu0 }
  0xe6   :  { %v233_v48 = vadd.f32 %v232_v46, %v46_v42  ;;  %v146_v50 = vadd.f32 %v145_v47, %v46_v42  ;;  %v234_v51 = vpop.f32.mrb[3].mxu1 }
  0xe7   :  { %253 = vst [vmem:[%s450_s3 + $0x20] sm:$0xff] %v144_v45  ;;  %v235_v52 = vadd.f32 %v234_v51, %v46_v42 }
  0xe8   :  { %255 = vst [vmem:[%s450_s3 + $0x30] sm:$0xff] %v233_v48  ;;  %254 = vst [vmem:[%s450_s3 + $0x28] sm:$0xff] %v146_v50  ;;  %v149_v53 = vpop.f32.mrb[4].mxu0 }
  0xe9   :  { %256 = vst [vmem:[%s450_s3 + $0x38] sm:$0xff] %v235_v52  ;;  %v150_v54 = vadd.f32 %v149_v53, %v51_v49  ;;  %v238_v55 = vpop.f32.mrb[4].mxu1  ;;  %v151_v56 = vpop.f32.mrb[5].mxu0 }
  0xea   :  { %v239_v57 = vadd.f32 %v238_v55, %v51_v49  ;;  %v152_v58 = vadd.f32 %v151_v56, %v51_v49  ;;  %v240_v59 = vpop.f32.mrb[5].mxu1 }
  0xeb   :  { %257 = vst [vmem:[%s450_s3 + $0x40] sm:$0xff] %v150_v54  ;;  %v241_v60 = vadd.f32 %v240_v59, %v51_v49 }
  0xec   :  { %259 = vst [vmem:[%s450_s3 + $0x50] sm:$0xff] %v239_v57  ;;  %258 = vst [vmem:[%s450_s3 + $0x48] sm:$0xff] %v152_v58  ;;  %v155_v62 = vpop.f32.mrb[6].mxu0 }
  0xed   :  { %260 = vst [vmem:[%s450_s3 + $0x58] sm:$0xff] %v241_v60  ;;  %v156_v63 = vadd.f32 %v155_v62, %v56_v61  ;;  %v244_v0 = vpop.f32.mrb[6].mxu1  ;;  %v157_v1 = vpop.f32.mrb[7].mxu0 }
  0xee   :  { %v245_v2 = vadd.f32 %v244_v0, %v56_v61  ;;  %v158_v3 = vadd.f32 %v157_v1, %v56_v61  ;;  %v246_v4 = vpop.f32.mrb[7].mxu1 }
  0xef   :  { %261 = vst [vmem:[%s450_s3 + $0x60] sm:$0xff] %v156_v63  ;;  %v247_v5 = vadd.f32 %v246_v4, %v56_v61 }
  0xf0   :  { %263 = vst [vmem:[%s450_s3 + $0x70] sm:$0xff] %v245_v2  ;;  %262 = vst [vmem:[%s450_s3 + $0x68] sm:$0xff] %v158_v3 }
  0xf1   :  { %264 = vst [vmem:[%s450_s3 + $0x78] sm:$0xff] %v247_v5 }

// kernel: my_vit_forward.10
= control target key start
LH: loop header
LB: loop body
LE: loop exit
PB: predicated region body
PF: predicated region fallthrough
CT: control target
= control target key end

     0   :  { %v640_v3 = vmov 0.0   ;;  %vm37_vm0 = vcmask 64512   ;;  %v641_v19 = vmov 0   ;;  %s772_s0 = inlined_call_operand.vmem [shape: f32[1,8,2048], index: 0, kind: input, shape index: {}]   ;;  %s773_s1 = inlined_call_operand.vmem [shape: f32[1,1,8,8], index: 1, kind: input, shape index: {}]   ;;  %s774_s2 = inlined_call_operand.vmem [shape: f32[1,1,8,1], index: 2, kind: input, shape index: {}]   ;;  %s775_s3 = inlined_call_operand.vmem [shape: f32[1,8,2048], index: 3, kind: output, shape index: {}]  }
   0x1   :  { %v15_v0 = vld [vmem:[%s772_s0 + $0x8] sm:$0xff]  ;;  %v17_v1 = vld [vmem:[%s772_s0 + $0x18] sm:$0xff]  ;;  %v14_v2 = vld [vmem:[%s772_s0] sm:$0xff]  ;;  %105 = vmatprep.mubr.f32.mxu0 %v640_v3  ;;  %176 = vmatprep.mubr.f32.mxu1 %v640_v3 }
   0x2   :  { %41 = vmatprep.subr.mxu0 %v15_v0  ;;  %112 = vmatprep.subr.mxu1 %v17_v1  ;;  %v16_v4 = vld [vmem:[%s772_s0 + $0x10] sm:$0xff]  ;;  %v30_v5 = vld [vmem:[%s773_s1] sm:$0xff]  ;;  %v19_v6 = vld [vmem:[%s772_s0 + $0x28] sm:$0xff] }
   0x3   :  { %42 = vmatpush1.msra.mxu0 %v14_v2  ;;  %113 = vmatpush1.msra.mxu1 %v16_v4  ;;  %v21_v7 = vld [vmem:[%s772_s0 + $0x38] sm:$0xff]  ;;  %v18_v8 = vld [vmem:[%s772_s0 + $0x20] sm:$0xff]  ;;  %v20_v9 = vld [vmem:[%s772_s0 + $0x30] sm:$0xff] }
   0x4   :  { %629 = vmatmul.mubr.msk.f32.vlgmr.msra.gmra.mrb[0].mxu0 %vm37_vm0, %v30_v5  ;;  %630 = vmatmul.mubr.msk.f32.vlgmr.msra.gmra.mrb[0].mxu1 %vm37_vm0, %v30_v5  ;;  %v23_v10 = vld [vmem:[%s772_s0 + $0x48] sm:$0xff]  ;;  %v25_v11 = vld [vmem:[%s772_s0 + $0x58] sm:$0xff]  ;;  %v22_v12 = vld [vmem:[%s772_s0 + $0x40] sm:$0xff] }
   0x5   :  { %183 = vmatprep.subr.mxu0 %v19_v6  ;;  %254 = vmatprep.subr.mxu1 %v21_v7  ;;  %v24_v13 = vld [vmem:[%s772_s0 + $0x50] sm:$0xff]  ;;  %v27_v14 = vld [vmem:[%s772_s0 + $0x68] sm:$0xff]  ;;  %v29_v15 = vld [vmem:[%s772_s0 + $0x78] sm:$0xff] }
   0x6   :  { %184 = vmatpush1.msra.mxu0 %v18_v8  ;;  %255 = vmatpush1.msra.mxu1 %v20_v9  ;;  %v26_v16 = vld [vmem:[%s772_s0 + $0x60] sm:$0xff]  ;;  %v28_v17 = vld [vmem:[%s772_s0 + $0x70] sm:$0xff] }
   0x7   :  { %247 = vmatprep.mubr.f32.mxu0 %v640_v3  ;;  %318 = vmatprep.mubr.f32.mxu1 %v640_v3  ;;  %v31_v18 = vld [vmem:[%s774_s2] sm:$0xff] }
   0x8   :  { %631 = vmatmul.mubr.msk.f32.vlgmr.msra.gmra.mrb[2].mxu0 %vm37_vm0, %v30_v5  ;;  %632 = vmatmul.mubr.msk.f32.vlgmr.msra.gmra.mrb[2].mxu1 %vm37_vm0, %v30_v5 }
   0x9   :  { %325 = vmatprep.subr.mxu0 %v23_v10  ;;  %396 = vmatprep.subr.mxu1 %v25_v11 }
   0xa   :  { %326 = vmatpush1.msra.mxu0 %v22_v12  ;;  %397 = vmatpush1.msra.mxu1 %v24_v13 }
   0xb   :  { %389 = vmatprep.mubr.f32.mxu0 %v640_v3  ;;  %460 = vmatprep.mubr.f32.mxu1 %v640_v3 }
   0xc   :  { %633 = vmatmul.mubr.msk.f32.vlgmr.msra.gmra.mrb[4].mxu0 %vm37_vm0, %v30_v5  ;;  %634 = vmatmul.mubr.msk.f32.vlgmr.msra.gmra.mrb[4].mxu1 %vm37_vm0, %v30_v5 }
   0xd   :  { %467 = vmatprep.subr.mxu0 %v27_v14  ;;  %538 = vmatprep.subr.mxu1 %v29_v15 }
   0xe   :  { %468 = vmatpush1.msra.mxu0 %v26_v16  ;;  %539 = vmatpush1.msra.mxu1 %v28_v17 }
   0xf   :  { %531 = vmatprep.mubr.f32.mxu0 %v640_v3  ;;  %602 = vmatprep.mubr.f32.mxu1 %v640_v3 }
  0x10   :  { %635 = vmatmul.mubr.msk.f32.vlgmr.msra.gmra.mrb[6].mxu0 %vm37_vm0, %v30_v5  ;;  %636 = vmatmul.mubr.msk.f32.vlgmr.msra.gmra.mrb[6].mxu1 %vm37_vm0, %v30_v5 }
  0x11   :  { %639 = vset.pattern.permute.xlu0 %v641_v19 }
  0x12   :  { %34 = vperm.xlu0 %639, %v31_v18  }
  0x91   :  { %v35_v20 = vpop.permute.xlu0 %34 }
  0xd7   :  { %v107_v21 = vpop.f32.mrb[0].mxu0  ;;  %v178_v22 = vpop.f32.mrb[0].mxu1 }
  0xd8   :  { %v108_v23 = vadd.f32 %v107_v21, %v35_v20  ;;  %v179_v24 = vadd.f32 %v178_v22, %v35_v20  ;;  %v109_v25 = vpop.f32.mrb[1].mxu0  ;;  %v180_v26 = vpop.f32.mrb[1].mxu1 }
  0xd9   :  { %v110_v27 = vadd.f32 %v109_v25, %v35_v20  ;;  %v181_v28 = vadd.f32 %v180_v26, %v35_v20 }
  0xda   :  { %609 = vst [vmem:[%s775_s3] sm:$0xff] %v108_v23  ;;  %611 = vst [vmem:[%s775_s3 + $0x10] sm:$0xff] %v179_v24 }
  0xdb   :  { %610 = vst [vmem:[%s775_s3 + $0x8] sm:$0xff] %v110_v27  ;;  %612 = vst [vmem:[%s775_s3 + $0x18] sm:$0xff] %v181_v28  ;;  %v249_v29 = vpop.f32.mrb[2].mxu0  ;;  %v320_v30 = vpop.f32.mrb[2].mxu1 }
  0xdc   :  { %v250_v31 = vadd.f32 %v249_v29, %v35_v20  ;;  %v321_v32 = vadd.f32 %v320_v30, %v35_v20  ;;  %v251_v33 = vpop.f32.mrb[3].mxu0  ;;  %v322_v34 = vpop.f32.mrb[3].mxu1 }
  0xdd   :  { %v252_v35 = vadd.f32 %v251_v33, %v35_v20  ;;  %v323_v36 = vadd.f32 %v322_v34, %v35_v20 }
  0xde   :  { %613 = vst [vmem:[%s775_s3 + $0x20] sm:$0xff] %v250_v31  ;;  %615 = vst [vmem:[%s775_s3 + $0x30] sm:$0xff] %v321_v32 }
  0xdf   :  { %614 = vst [vmem:[%s775_s3 + $0x28] sm:$0xff] %v252_v35  ;;  %616 = vst [vmem:[%s775_s3 + $0x38] sm:$0xff] %v323_v36  ;;  %v391_v37 = vpop.f32.mrb[4].mxu0  ;;  %v462_v38 = vpop.f32.mrb[4].mxu1 }
  0xe0   :  { %v392_v39 = vadd.f32 %v391_v37, %v35_v20  ;;  %v463_v40 = vadd.f32 %v462_v38, %v35_v20  ;;  %v393_v41 = vpop.f32.mrb[5].mxu0  ;;  %v464_v42 = vpop.f32.mrb[5].mxu1 }
  0xe1   :  { %v394_v43 = vadd.f32 %v393_v41, %v35_v20  ;;  %v465_v44 = vadd.f32 %v464_v42, %v35_v20 }
  0xe2   :  { %617 = vst [vmem:[%s775_s3 + $0x40] sm:$0xff] %v392_v39  ;;  %619 = vst [vmem:[%s775_s3 + $0x50] sm:$0xff] %v463_v40 }
  0xe3   :  { %618 = vst [vmem:[%s775_s3 + $0x48] sm:$0xff] %v394_v43  ;;  %620 = vst [vmem:[%s775_s3 + $0x58] sm:$0xff] %v465_v44  ;;  %v533_v45 = vpop.f32.mrb[6].mxu0  ;;  %v604_v46 = vpop.f32.mrb[6].mxu1 }
  0xe4   :  { %v534_v47 = vadd.f32 %v533_v45, %v35_v20  ;;  %v605_v48 = vadd.f32 %v604_v46, %v35_v20  ;;  %v535_v49 = vpop.f32.mrb[7].mxu0  ;;  %v606_v50 = vpop.f32.mrb[7].mxu1 }
  0xe5   :  { %v536_v51 = vadd.f32 %v535_v49, %v35_v20  ;;  %v607_v52 = vadd.f32 %v606_v50, %v35_v20 }
  0xe6   :  { %621 = vst [vmem:[%s775_s3 + $0x60] sm:$0xff] %v534_v47  ;;  %623 = vst [vmem:[%s775_s3 + $0x70] sm:$0xff] %v605_v48 }
  0xe7   :  { %622 = vst [vmem:[%s775_s3 + $0x68] sm:$0xff] %v536_v51  ;;  %624 = vst [vmem:[%s775_s3 + $0x78] sm:$0xff] %v607_v52 }

// kernel: my_vit_forward.11
= control target key start
LH: loop header
LB: loop body
LE: loop exit
PB: predicated region body
PF: predicated region fallthrough
CT: control target
= control target key end

     0   :  { %s1181_s12 = smov 0   ;;  %s1183_s13 = smov 0   ;;  %s1274_s0 = inlined_call_operand.vmem [shape: f32[1,2,8192], index: 0, kind: input, shape index: {}]   ;;  %s1275_s1 = inlined_call_operand.vmem [shape: f32[1,1,5,2], index: 1, kind: input, shape index: {}]   ;;  %s1276_s2 = inlined_call_operand.vmem [shape: f32[1,1,5,1], index: 2, kind: input, shape index: {}]   ;;  %s1277_s3 = inlined_call_operand.vmem [shape: f32[1,5,8192], index: 3, kind: output, shape index: {}]  }
   0x1   :  { %s1185_s14 = smov 0  }
   0x2 LB: > { %s22_s15 = sadd.s32 1, %s1152_s13  ;;  %p1071_p0 = scmp.ge.s32.totalorder %s1156_s14, 1  ;;  %s1156_s14 = sphi %s1185_s14, %s13_s14   ;;  %s1152_s13 = sphi %s1183_s13, %s1279_s13   ;;  %s1148_s12 = sphi %s1181_s12, %s1278_s12  }
   0x3   : > { %p23_p1 = scmp.ge.s32.totalorder %s22_s15, 4  ;;  %p176_p2 = scmp.lt.s32.totalorder %s1156_s14, 5 }
   0x5   : > { %s1281_s15 = smov (%p23_p1, %s22_s15), 0  ;;  %p177_p3 = pnand %p1071_p0, %p176_p2 }
   0x6   : > { %s1072_s16 = sshll.u32 (!%p177_p3), %s1148_s12, 4  ;;  %v263_v0 = vlaneseq (!%p177_p3)  ;;  %v1158_v1 = vmov (!%p177_p3), 1983009808   ;;  %v1159_v3 = vmov (!%p177_p3), 0.0   ;;  %v1160_v5 = vmov (!%p177_p3), 0  }
   0x7   : > { %180 = sbr.rel (%p177_p3) target bundleno = 254 (0xfe), region = 32  ;;  %p219_p4 = scmp.lt.s32.totalorder (!%p177_p3), %s1072_s16, 63  ;;  %v261_v2 = vunpack.c.l.s4 (!%p177_p3), %v1158_v1  ;;  %428 = vmatprep.mubr.f32.mxu0 (!%p177_p3), %v1159_v3  ;;  %499 = vmatprep.mubr.f32.mxu1 (!%p177_p3), %v1159_v3  ;;  %v249_v6 = vld [vmem:[%s1276_s2] sm:$0x1f] (!%p177_p3)  ;;  %vm331_vm0 = vcmask (!%p177_p3), 1041408   ;;  %vm327_vm1 = vcmask (!%p177_p3), 15360  }
   0x8   : > { %v264_v4 = vshrl.u32 (!%p177_p3), %v263_v0, 7  ;;  %1129 = vset.pattern.permute.xlu0 (!%p177_p3), %v1160_v5  ;;  %v248_v21 = vld [vmem:[%s1275_s1] sm:$0x1f] (!%p177_p3) }
   0x9   : > { %v262_v7 = vunpack.c.0.s8 (!%p177_p3), %v261_v2  ;;  %252 = vperm.xlu0 (!%p177_p3), %1129, %v249_v6  }
   0xb   : > { %v265_v8 = vsub.s32 (!%p177_p3), %v262_v7, %v264_v4 }
   0xe   : > { %s1283_s16 = smov (!%p219_p4, %s1072_s16), 63 }
   0xf   : > { %s1073_s19 = sshll.u32 %s1283_s16, 1  ;;  %s1075_s25 = sshll.u32 %s1283_s16, 3 }
  0x10   : > { %s224_s22 = scalar_lea.vmem %s1274_s0, %s1073_s19  ;;  %s1247_s28 = scalar_lea.vmem %s1277_s3, %s1075_s25 }
  0x11   : > { %v244_v9 = vld [vmem:[%s224_s22] sm:$0xff]  ;;  %v245_v10 = vld [vmem:[%s224_s22 + $0x8] sm:$0xff]  ;;  %v246_v11 = vld [vmem:[%s224_s22 + $0x10] sm:$0xff] }
  0x12   : > { %v266_v12 = vrot.slane %v244_v9, %v265_v8  ;;  %v259_v13 = vcombine.high %v244_v9, %v244_v9  ;;  %v283_v14 = vrot.slane %v245_v10, %v265_v8  ;;  %v276_v15 = vcombine.high %v245_v10, %v245_v10  ;;  %v247_v17 = vld [vmem:[%s224_s22 + $0x18] sm:$0xff] }
  0x13   : > { %v293_v16 = vcombine.high %v246_v11, %v246_v11  ;;  %v300_v23 = vrot.slane %v246_v11, %v265_v8  ;;  %v310_v27 = vcombine.high %v247_v17, %v247_v17  ;;  %v317_v29 = vrot.slane %v247_v17, %v265_v8 }
  0x14   : > { %v274_v18 = vcombine.high %v266_v12, %v266_v12  ;;  %v273_v19 = vrot.slane %v259_v13, %v265_v8  ;;  %v290_v20 = vrot.slane %v276_v15, %v265_v8  ;;  %v291_v22 = vcombine.high %v283_v14, %v283_v14 }
  0x15   : > { %v307_v26 = vrot.slane %v293_v16, %v265_v8  ;;  %v308_v28 = vcombine.high %v300_v23, %v300_v23  ;;  %v324_v31 = vrot.slane %v310_v27, %v265_v8  ;;  %v325_v32 = vcombine.high %v317_v29, %v317_v29 }
  0x16   : > { %1076 = vmatprep.subr.msk.mxu0 %vm331_vm0, %v274_v18  ;;  %v275_v24 = vcombine.high %v273_v19, %v273_v19  ;;  %v292_v25 = vcombine.high %v290_v20, %v290_v20 }
  0x17   : > { %1077 = vmatpush1.msk.msra.mxu0 %vm331_vm0, %v266_v12  ;;  %v309_v30 = vcombine.high %v307_v26, %v307_v26  ;;  %v326_v33 = vcombine.high %v324_v31, %v324_v31 }
  0x18   : > { %1079 = vmatprep.subr.msk.mxu1 %vm331_vm0, %v275_v24  ;;  %1078 = vmatmul.mubr.msk.f32.vlgmr.msra.gmra.mrb[0].mxu0 %vm327_vm1, %v248_v21 }
  0x19   : > { %1080 = vmatpush1.msk.msra.mxu1 %vm331_vm0, %v273_v19  ;;  %1082 = vmatprep.subr.msk.mxu0 %vm331_vm0, %v291_v22 }
  0x1a   : > { %1081 = vmatmul.mubr.msk.f32.vlgmr.msra.gmra.mrb[0].mxu1 %vm327_vm1, %v248_v21  ;;  %1085 = vmatprep.subr.msk.mxu1 %vm331_vm0, %v292_v25 }
  0x1b   : > { %1083 = vmatpush1.msk.msra.mxu0 %vm331_vm0, %v283_v14  ;;  %1086 = vmatpush1.msk.msra.mxu1 %vm331_vm0, %v290_v20 }
  0x1c   : > { %570 = vmatprep.mubr.f32.mxu0 %v1159_v3  ;;  %641 = vmatprep.mubr.f32.mxu1 %v1159_v3 }
  0x1d   : > { %1084 = vmatmul.mubr.msk.f32.vlgmr.msra.gmra.mrb[2].mxu0 %vm327_vm1, %v248_v21  ;;  %1088 = vmatprep.subr.msk.mxu0 %vm331_vm0, %v308_v28 }
  0x1e   : > { %1087 = vmatmul.mubr.msk.f32.vlgmr.msra.gmra.mrb[2].mxu1 %vm327_vm1, %v248_v21  ;;  %1091 = vmatprep.subr.msk.mxu1 %vm331_vm0, %v309_v30 }
  0x1f   : > { %1089 = vmatpush1.msk.msra.mxu0 %vm331_vm0, %v300_v23  ;;  %1092 = vmatpush1.msk.msra.mxu1 %vm331_vm0, %v307_v26 }
  0x20   : > { %712 = vmatprep.mubr.f32.mxu0 %v1159_v3  ;;  %783 = vmatprep.mubr.f32.mxu1 %v1159_v3 }
  0x21   : > { %1090 = vmatmul.mubr.msk.f32.vlgmr.msra.gmra.mrb[4].mxu0 %vm327_vm1, %v248_v21  ;;  %1094 = vmatprep.subr.msk.mxu0 %vm331_vm0, %v325_v32 }
  0x22   : > { %1093 = vmatmul.mubr.msk.f32.vlgmr.msra.gmra.mrb[4].mxu1 %vm327_vm1, %v248_v21  ;;  %1097 = vmatprep.subr.msk.mxu1 %vm331_vm0, %v326_v33 }
  0x23   : > { %1095 = vmatpush1.msk.msra.mxu0 %vm331_vm0, %v317_v29  ;;  %1098 = vmatpush1.msk.msra.mxu1 %vm331_vm0, %v324_v31 }
  0x24   : > { %854 = vmatprep.mubr.f32.mxu0 %v1159_v3  ;;  %925 = vmatprep.mubr.f32.mxu1 %v1159_v3 }
  0x25   : > { %1096 = vmatmul.mubr.msk.f32.vlgmr.msra.gmra.mrb[6].mxu0 %vm327_vm1, %v248_v21 }
  0x26   : > { %1099 = vmatmul.mubr.msk.f32.vlgmr.msra.gmra.mrb[6].mxu1 %vm327_vm1, %v248_v21 }
  0x88   : > { %v253_v34 = vpop.permute.xlu0 %252 }
  0xeb   : > { %v430_v35 = vpop.f32.mrb[0].mxu0 }
  0xec   : > { %v431_v36 = vadd.f32 %v430_v35, %v253_v34  ;;  %v432_v37 = vpop.f32.mrb[1].mxu0 }
  0xed   : > { %v501_v38 = vpop.f32.mrb[0].mxu1  ;;  %v433_v39 = vadd.f32 %v432_v37, %v253_v34 }
  0xee   : > { %v502_v40 = vadd.f32 %v501_v38, %v253_v34  ;;  %932 = vst [vmem:[%s1247_s28] sm:$0x1f] %v431_v36  ;;  %v503_v41 = vpop.f32.mrb[1].mxu1 }
  0xef   : > { %933 = vst [vmem:[%s1247_s28 + $0x8] sm:$0x1f] %v433_v39  ;;  %v504_v42 = vadd.f32 %v503_v41, %v253_v34 }
  0xf0   : > { %934 = vst [vmem:[%s1247_s28 + $0x10] sm:$0x1f] %v502_v40  ;;  %v572_v43 = vpop.f32.mrb[2].mxu0 }
  0xf1   : > { %935 = vst [vmem:[%s1247_s28 + $0x18] sm:$0x1f] %v504_v42  ;;  %v573_v44 = vadd.f32 %v572_v43, %v253_v34  ;;  %v643_v45 = vpop.f32.mrb[2].mxu1  ;;  %v574_v46 = vpop.f32.mrb[3].mxu0 }
  0xf2   : > { %v644_v47 = vadd.f32 %v643_v45, %v253_v34  ;;  %v575_v48 = vadd.f32 %v574_v46, %v253_v34  ;;  %v645_v49 = vpop.f32.mrb[3].mxu1 }
  0xf3   : > { %936 = vst [vmem:[%s1247_s28 + $0x20] sm:$0x1f] %v573_v44  ;;  %v646_v50 = vadd.f32 %v645_v49, %v253_v34 }
  0xf4   : > { %938 = vst [vmem:[%s1247_s28 + $0x30] sm:$0x1f] %v644_v47  ;;  %937 = vst [vmem:[%s1247_s28 + $0x28] sm:$0x1f] %v575_v48  ;;  %v714_v51 = vpop.f32.mrb[4].mxu0 }
  0xf5   : > { %939 = vst [vmem:[%s1247_s28 + $0x38] sm:$0x1f] %v646_v50  ;;  %v715_v52 = vadd.f32 %v714_v51, %v253_v34  ;;  %v785_v53 = vpop.f32.mrb[4].mxu1  ;;  %v716_v54 = vpop.f32.mrb[5].mxu0 }
  0xf6   : > { %v786_v55 = vadd.f32 %v785_v53, %v253_v34  ;;  %v717_v56 = vadd.f32 %v716_v54, %v253_v34  ;;  %v787_v57 = vpop.f32.mrb[5].mxu1 }
  0xf7   : > { %940 = vst [vmem:[%s1247_s28 + $0x40] sm:$0x1f] %v715_v52  ;;  %v788_v58 = vadd.f32 %v787_v57, %v253_v34 }
  0xf8   : > { %942 = vst [vmem:[%s1247_s28 + $0x50] sm:$0x1f] %v786_v55  ;;  %941 = vst [vmem:[%s1247_s28 + $0x48] sm:$0x1f] %v717_v56  ;;  %v856_v59 = vpop.f32.mrb[6].mxu0 }
  0xf9   : > { %943 = vst [vmem:[%s1247_s28 + $0x58] sm:$0x1f] %v788_v58  ;;  %v857_v60 = vadd.f32 %v856_v59, %v253_v34  ;;  %v927_v61 = vpop.f32.mrb[6].mxu1  ;;  %v858_v62 = vpop.f32.mrb[7].mxu0 }
  0xfa   : > { %v928_v63 = vadd.f32 %v927_v61, %v253_v34  ;;  %v859_v0 = vadd.f32 %v858_v62, %v253_v34  ;;  %v929_v1 = vpop.f32.mrb[7].mxu1 }
  0xfb   : > { %944 = vst [vmem:[%s1247_s28 + $0x60] sm:$0x1f] %v857_v60  ;;  %v930_v2 = vadd.f32 %v929_v1, %v253_v34 }
  0xfc   : > { %946 = vst [vmem:[%s1247_s28 + $0x70] sm:$0x1f] %v928_v63  ;;  %945 = vst [vmem:[%s1247_s28 + $0x68] sm:$0x1f] %v859_v0 }
  0xfd   : > { %947 = vst [vmem:[%s1247_s28 + $0x78] sm:$0x1f] %v930_v2 }
  0xfe PF: > { %s13_s14 = sadd.s32 1, %s1156_s14   ;;  %s1278_s12 = smov %s1152_s13 }
  0xff   : > { %p10_p5 = scmp.ge.s32.totalorder %s13_s14, 6   ;;  %s1279_s13 = smov %s1281_s15 }
 0x101   :  { %12 = sbr.rel (!%p10_p5) target bundleno = 2 (0x2), region = 68 }

</bundles_post_ra>
